<compile_context>
chip_gen: v7x
topology: tpu7x:2x2x1
jax: 0.10.0
libtpu: 0.0.40
codegen_flags: <defaults>
</compile_context>

<pallas_src>
import jax
import jax.numpy as jnp
from jax import lax
from jax.experimental import pallas as pl
from jax.experimental.pallas import tpu as pltpu

EPS = 1e-5
KSIZE = 3
MXU_DTYPE = jnp.bfloat16


# --------------------------------------------------------------------------- #
# In-kernel helpers (pure VMEM index shuffling / VALU / MXU work)
# --------------------------------------------------------------------------- #
def _shift_rows_reflect(x, ky):
    """Rows i + ky - 1 of x with reflection padding (pad=1).  x: (H, W, C)."""
    H = x.shape[0]
    if ky == 0:                               # padded rows [-1..H-2] -> [1, 0..H-2]
        return jnp.concatenate([x[1:2], x[:H - 1]], axis=0)
    if ky == 1:
        return x
    return jnp.concatenate([x[1:], x[H - 2:H - 1]], axis=0)       # ky == 2


def _shift_cols_reflect(x, kx):
    """Cols j + kx - 1 of x with reflection padding (pad=1).  x: (H, W, C)."""
    W = x.shape[1]
    if kx == 0:
        return jnp.concatenate([x[:, 1:2], x[:, :W - 1]], axis=1)
    if kx == 1:
        return x
    return jnp.concatenate([x[:, 1:], x[:, W - 2:W - 1]], axis=1)  # kx == 2


def _conv3x3_instance_norm(x, w_ref, gamma, beta):
    """3x3 reflect-pad conv (3 row-grouped K=3C bf16 matmuls) + affine InstanceNorm.

    x      : (H, W, C)   f32, resident in VMEM
    w_ref  : (3, 3C, C)  bf16 ref; w_ref[ky] is the (3C, C) slice laid out
             row-major over (kx, cin)
    gamma, beta : (C,) f32
    returns (H*W, C) f32.  No conv bias: it cancels exactly under InstanceNorm.
    """
    H, W, C = x.shape
    acc = None
    for ky in range(KSIZE):
        row = _shift_rows_reflect(x, ky)                            # (H, W, C) f32
        slab = jnp.concatenate(
            [_shift_cols_reflect(row, kx) for kx in range(KSIZE)],
            axis=-1).reshape(H * W, KSIZE * C).astype(MXU_DTYPE)    # (H*W, 3C) bf16
        part = jnp.dot(slab, w_ref[ky], preferred_element_type=jnp.float32)
        acc = part if acc is None else acc + part                   # (H*W, C) f32

    # InstanceNorm: two-pass (centered) variance in f32, affine folded into one FMA.
    inv_hw = 1.0 / (H * W)
    mean = jnp.sum(acc, axis=0, keepdims=True) * inv_hw             # (1, C)
    centered = acc - mean
    var = jnp.sum(centered * centered, axis=0, keepdims=True) * inv_hw
    scale = gamma * lax.rsqrt(var + EPS)                            # (1, C)
    return centered * scale + beta


def residual_block_kernel(x_ref, w1_ref, g1_ref, be1_ref,
                          w2_ref, g2_ref, be2_ref, o_ref):
    """Fused: relu(in1(conv1(x))) -> in2(conv2(.)) + x, one image per grid step.

    Intermediate activation `h` and the residual never leave VMEM.
    """
    x = x_ref[0]                                    # (H, W, C), caller dtype
    H, W, C = x.shape
    x32 = x.astype(jnp.float32)

    h = _conv3x3_instance_norm(x32, w1_ref, g1_ref[0], be1_ref[0])
    h = jnp.maximum(h, 0.0).reshape(H, W, C)        # ReLU

    y = _conv3x3_instance_norm(h, w2_ref, g2_ref[0], be2_ref[0])
    o_ref[0] = (y.reshape(H, W, C) + x32).astype(o_ref.dtype)


# --------------------------------------------------------------------------- #
# Wrappers
# --------------------------------------------------------------------------- #
def _vmem_limit_bytes(H, W, C, io_itemsize):
    """Scoped-VMEM budget from per-step block math, capped by the real chip."""
    hw = H * W
    f32, bf16 = 4, 2
    io = 2 * 2 * hw * C * io_itemsize                       # in+out blocks, double-buffered
    params = 2 * 2 * (9 * C * C * bf16 + 2 * C * f32)       # both stages' weights/affine
    live = hw * C * (5 * f32 + 3 * bf16)                    # x32/acc/h/centered/out + 1 slab
    need = 2 * (io + params + live)                         # 2x headroom for compiler temps
    try:
        cap = getattr(pltpu.get_tpu_info(), "vmem_capacity_bytes", 64 * 1024 * 1024)
    except Exception:
        cap = 64 * 1024 * 1024                              # conservative (v7x per-TC)
    return int(min(max(need, 16 * 1024 * 1024), int(0.85 * cap)))


def residual_block_nhwc(x, params):
    """ResidualBlock forward, NHWC layout.

    params = (w1, b1, g1, be1, w2, b2, g2, be2) with conv weights HWIO (3,3,C,C)
    (PyTorch OIHW -> w.transpose(2, 3, 1, 0)).  Conv biases are accepted but
    unused: InstanceNorm subtracts the per-channel mean so they cancel exactly.
    """
    # TODO(synk): add a row-strip grid axis (1-row halo, cross-strip IN stats via an
    # 'arbitrary' axis + pl.when finalize) so v7x's two TensorCores get work at
    # batch=1 and very large H*W*C streams the im2col instead of holding it whole.
    w1, _b1, g1, be1, w2, _b2, g2, be2 = params
    N, H, W, C = x.shape

    as_w = lambda w: w.astype(MXU_DTYPE).reshape(KSIZE, KSIZE * C, C)   # (3, 3C, C)
    as_row = lambda v: v.astype(jnp.float32).reshape(1, C)

    per_img = lambda n: (n, 0, 0, 0)
    shared3 = lambda n: (0, 0, 0)
    shared2 = lambda n: (0, 0)

    out = pl.pallas_call(
        residual_block_kernel,
        out_shape=jax.ShapeDtypeStruct((N, H, W, C), x.dtype),
        grid_spec=pltpu.PrefetchScalarGridSpec(
            num_scalar_prefetch=0,
            grid=(N,),
            in_specs=[
                pl.BlockSpec((1, H, W, C), per_img),            # x (residual + conv1 input)
                pl.BlockSpec((KSIZE, KSIZE * C, C), shared3),   # w1 (3, 3C, C) bf16
                pl.BlockSpec((1, C), shared2),                  # gamma1
                pl.BlockSpec((1, C), shared2),                  # beta1
                pl.BlockSpec((KSIZE, KSIZE * C, C), shared3),   # w2 (3, 3C, C) bf16
                pl.BlockSpec((1, C), shared2),                  # gamma2
                pl.BlockSpec((1, C), shared2),                  # beta2
            ],
            out_specs=pl.BlockSpec((1, H, W, C), per_img),
        ),
        compiler_params=pltpu.CompilerParams(
            dimension_semantics=("parallel",),                  # batch images independent
            vmem_limit_bytes=_vmem_limit_bytes(H, W, C, x.dtype.itemsize),
        ),
    )(x, as_w(w1), as_row(g1), as_row(be1), as_w(w2), as_row(g2), as_row(be2))
    return out


def residual_block(x_nchw, params):
    """PyTorch-layout (NCHW) adapter around the fused NHWC kernel."""
    x = jnp.transpose(x_nchw, (0, 2, 3, 1))                 # NCHW -> NHWC
    out = residual_block_nhwc(x, params)
    return jnp.transpose(out, (0, 3, 1, 2))                 # NHWC -> NCHW


# --------------------------------------------------------------------------- #
# Pure-JAX f32 reference (keeps the conv bias, full f32 matmuls)
# --------------------------------------------------------------------------- #
def _ref_conv(x, w, b):
    xpad = jnp.pad(x, ((0, 0), (1, 1), (1, 1), (0, 0)), mode="reflect")
    y = lax.conv_general_dilated(xpad, w, (1, 1), "VALID",
                                 dimension_numbers=("NHWC", "HWIO", "NHWC"))
    return y + b


def _ref_in(y, g, be):
    m = jnp.mean(y, axis=(1, 2), keepdims=True)
    v = jnp.mean((y - m) ** 2, axis=(1, 2), keepdims=True)
    return (y - m) * lax.rsqrt(v + EPS) * g + be


def residual_block_ref(x_nchw, params):
    w1, b1, g1, be1, w2, b2, g2, be2 = params
    x = jnp.transpose(x_nchw, (0, 2, 3, 1)).astype(jnp.float32)
    h = jnp.maximum(_ref_in(_ref_conv(x, w1, b1), g1, be1), 0.0)
    out = _ref_in(_ref_conv(h, w2, b2), g2, be2) + x
    return jnp.transpose(out, (0, 3, 1, 2))


# --------------------------------------------------------------------------- #
if __name__ == "__main__":
    N, C, H, W = 2, 4, 16, 16
    key = jax.random.PRNGKey(0)
    kx, k1, k2, k3, k4, k5, k6 = jax.random.split(key, 7)

    x = jax.random.normal(kx, (N, C, H, W), dtype=jnp.float32)

    # Conv weights stored HWIO (3,3,Cin,Cout); equivalent to PyTorch OIHW params.
    w1 = jax.random.normal(k1, (KSIZE, KSIZE, C, C), dtype=jnp.float32) * 0.1
    b1 = jax.random.normal(k2, (C,), dtype=jnp.float32) * 0.1
    g1 = jnp.ones((C,), jnp.float32) + 0.05 * jax.random.normal(k3, (C,))
    be1 = 0.05 * jax.random.normal(k3, (C,), dtype=jnp.float32)

    w2 = jax.random.normal(k4, (KSIZE, KSIZE, C, C), dtype=jnp.float32) * 0.1
    b2 = jax.random.normal(k5, (C,), dtype=jnp.float32) * 0.1
    g2 = jnp.ones((C,), jnp.float32) + 0.05 * jax.random.normal(k6, (C,))
    be2 = 0.05 * jax.random.normal(k6, (C,), dtype=jnp.float32)

    params = (w1, b1, g1, be1, w2, b2, g2, be2)

    out = residual_block(x, params)
    out = jax.block_until_ready(out)

    ref = residual_block_ref(x, params)
    assert out.shape == (N, C, H, W)
    # Tolerance reflects the bf16 MXU operands (conv matmuls); accumulation,
    # InstanceNorm statistics and the residual add are all f32.
    assert jnp.allclose(out, ref, rtol=3e-2, atol=3e-2), "mismatch vs reference"

    print("KERNEL_OK")
</pallas_src>

<mosaic_0001>
module attributes {stable_mosaic.version = 11 : i64} {
  func.func @residual_block_kernel(%arg0: i32, %arg1: memref<1x16x16x4xf32, #tpu.memory_space<vmem>>, %arg2: memref<3x12x4xbf16, #tpu.memory_space<vmem>>, %arg3: memref<1x4xf32, #tpu.memory_space<vmem>>, %arg4: memref<1x4xf32, #tpu.memory_space<vmem>>, %arg5: memref<3x12x4xbf16, #tpu.memory_space<vmem>>, %arg6: memref<1x4xf32, #tpu.memory_space<vmem>>, %arg7: memref<1x4xf32, #tpu.memory_space<vmem>>, %arg8: memref<1x16x16x4xf32, #tpu.memory_space<vmem>>) attributes {dimension_semantics = [#tpu.dimension_semantics<parallel>], iteration_bounds = array<i64: 2>, scalar_prefetch = 0 : i64, scratch_operands = 0 : i64, tpu.core_type = #tpu.core_type<tc>, window_params = [{transform_indices = @transform_0, window_bounds = array<i64: 1, 16, 16, 4>}, {pipeline_mode = #tpu.pipeline_mode<synchronous>, transform_indices = @transform_1, window_bounds = array<i64: 3, 12, 4>}, {pipeline_mode = #tpu.pipeline_mode<synchronous>, transform_indices = @transform_2, window_bounds = array<i64: 1, 4>}, {pipeline_mode = #tpu.pipeline_mode<synchronous>, transform_indices = @transform_3, window_bounds = array<i64: 1, 4>}, {pipeline_mode = #tpu.pipeline_mode<synchronous>, transform_indices = @transform_4, window_bounds = array<i64: 3, 12, 4>}, {pipeline_mode = #tpu.pipeline_mode<synchronous>, transform_indices = @transform_5, window_bounds = array<i64: 1, 4>}, {pipeline_mode = #tpu.pipeline_mode<synchronous>, transform_indices = @transform_6, window_bounds = array<i64: 1, 4>}, {transform_indices = @transform_7, window_bounds = array<i64: 1, 16, 16, 4>}]} {
    %c0 = arith.constant 0 : index
    %c0_0 = arith.constant 0 : index
    %c0_1 = arith.constant 0 : index
    %c0_2 = arith.constant 0 : index
    %0 = vector.load %arg1[%c0, %c0_0, %c0_1, %c0_2] : memref<1x16x16x4xf32, #tpu.memory_space<vmem>>, vector<1x16x16x4xf32>
    %1 = vector.shape_cast %0 : vector<1x16x16x4xf32> to vector<16x16x4xf32>
    %c0_3 = arith.constant 0 : index
    %c0_4 = arith.constant 0 : index
    %2 = vector.load %arg3[%c0_3, %c0_4] : memref<1x4xf32, #tpu.memory_space<vmem>>, vector<1x4xf32>
    %3 = vector.shape_cast %2 : vector<1x4xf32> to vector<4xf32>
    %c0_5 = arith.constant 0 : index
    %c0_6 = arith.constant 0 : index
    %4 = vector.load %arg4[%c0_5, %c0_6] : memref<1x4xf32, #tpu.memory_space<vmem>>, vector<1x4xf32>
    %5 = vector.shape_cast %4 : vector<1x4xf32> to vector<4xf32>
    %6 = vector.extract_strided_slice %1 {offsets = [1, 0, 0], sizes = [1, 16, 4], strides = [1, 1, 1]} : vector<16x16x4xf32> to vector<1x16x4xf32>
    %7 = vector.extract_strided_slice %1 {offsets = [0, 0, 0], sizes = [15, 16, 4], strides = [1, 1, 1]} : vector<16x16x4xf32> to vector<15x16x4xf32>
    %8 = tpu.concatenate %6, %7 in 0 : vector<1x16x4xf32>, vector<15x16x4xf32> -> vector<16x16x4xf32>
    %9 = vector.extract_strided_slice %8 {offsets = [0, 1, 0], sizes = [16, 1, 4], strides = [1, 1, 1]} : vector<16x16x4xf32> to vector<16x1x4xf32>
    %10 = vector.extract_strided_slice %8 {offsets = [0, 0, 0], sizes = [16, 15, 4], strides = [1, 1, 1]} : vector<16x16x4xf32> to vector<16x15x4xf32>
    %11 = tpu.concatenate %9, %10 in 1 : vector<16x1x4xf32>, vector<16x15x4xf32> -> vector<16x16x4xf32>
    %12 = vector.extract_strided_slice %8 {offsets = [0, 1, 0], sizes = [16, 15, 4], strides = [1, 1, 1]} : vector<16x16x4xf32> to vector<16x15x4xf32>
    %13 = vector.extract_strided_slice %8 {offsets = [0, 14, 0], sizes = [16, 1, 4], strides = [1, 1, 1]} : vector<16x16x4xf32> to vector<16x1x4xf32>
    %14 = tpu.concatenate %12, %13 in 1 : vector<16x15x4xf32>, vector<16x1x4xf32> -> vector<16x16x4xf32>
    %15 = tpu.concatenate %11, %8, %14 in 2 : vector<16x16x4xf32>, vector<16x16x4xf32>, vector<16x16x4xf32> -> vector<16x16x12xf32>
    %16 = vector.shape_cast %15 : vector<16x16x12xf32> to vector<256x12xf32>
    %17 = arith.truncf %16 : vector<256x12xf32> to vector<256x12xbf16>
    %c0_7 = arith.constant 0 : index
    %c0_8 = arith.constant 0 : index
    %c0_9 = arith.constant 0 : index
    %18 = vector.load %arg2[%c0_7, %c0_8, %c0_9] : memref<3x12x4xbf16, #tpu.memory_space<vmem>>, vector<1x12x4xbf16>
    %19 = vector.shape_cast %18 : vector<1x12x4xbf16> to vector<12x4xbf16>
    %cst = arith.constant dense<0.000000e+00> : vector<256x4xf32>
    %20 = tpu.matmul %17, %19, %cst {dimension_numbers = #tpu.dot_dimension_numbers<[1], [0], [0], [1], [0, 0, 1, 1], [], []>} : vector<256x12xbf16>, vector<12x4xbf16>, vector<256x4xf32> -> vector<256x4xf32>
    %21 = vector.extract_strided_slice %1 {offsets = [0, 1, 0], sizes = [16, 1, 4], strides = [1, 1, 1]} : vector<16x16x4xf32> to vector<16x1x4xf32>
    %22 = vector.extract_strided_slice %1 {offsets = [0, 0, 0], sizes = [16, 15, 4], strides = [1, 1, 1]} : vector<16x16x4xf32> to vector<16x15x4xf32>
    %23 = tpu.concatenate %21, %22 in 1 : vector<16x1x4xf32>, vector<16x15x4xf32> -> vector<16x16x4xf32>
    %24 = vector.extract_strided_slice %1 {offsets = [0, 1, 0], sizes = [16, 15, 4], strides = [1, 1, 1]} : vector<16x16x4xf32> to vector<16x15x4xf32>
    %25 = vector.extract_strided_slice %1 {offsets = [0, 14, 0], sizes = [16, 1, 4], strides = [1, 1, 1]} : vector<16x16x4xf32> to vector<16x1x4xf32>
    %26 = tpu.concatenate %24, %25 in 1 : vector<16x15x4xf32>, vector<16x1x4xf32> -> vector<16x16x4xf32>
    %27 = tpu.concatenate %23, %1, %26 in 2 : vector<16x16x4xf32>, vector<16x16x4xf32>, vector<16x16x4xf32> -> vector<16x16x12xf32>
    %28 = vector.shape_cast %27 : vector<16x16x12xf32> to vector<256x12xf32>
    %29 = arith.truncf %28 : vector<256x12xf32> to vector<256x12xbf16>
    %c1 = arith.constant 1 : index
    %c0_10 = arith.constant 0 : index
    %c0_11 = arith.constant 0 : index
    %30 = vector.load %arg2[%c1, %c0_10, %c0_11] : memref<3x12x4xbf16, #tpu.memory_space<vmem>>, vector<1x12x4xbf16>
    %31 = vector.shape_cast %30 : vector<1x12x4xbf16> to vector<12x4xbf16>
    %cst_12 = arith.constant dense<0.000000e+00> : vector<256x4xf32>
    %32 = tpu.matmul %29, %31, %cst_12 {dimension_numbers = #tpu.dot_dimension_numbers<[1], [0], [0], [1], [0, 0, 1, 1], [], []>} : vector<256x12xbf16>, vector<12x4xbf16>, vector<256x4xf32> -> vector<256x4xf32>
    %33 = arith.addf %20, %32 : vector<256x4xf32>
    %34 = vector.extract_strided_slice %1 {offsets = [1, 0, 0], sizes = [15, 16, 4], strides = [1, 1, 1]} : vector<16x16x4xf32> to vector<15x16x4xf32>
    %35 = vector.extract_strided_slice %1 {offsets = [14, 0, 0], sizes = [1, 16, 4], strides = [1, 1, 1]} : vector<16x16x4xf32> to vector<1x16x4xf32>
    %36 = tpu.concatenate %34, %35 in 0 : vector<15x16x4xf32>, vector<1x16x4xf32> -> vector<16x16x4xf32>
    %37 = vector.extract_strided_slice %36 {offsets = [0, 1, 0], sizes = [16, 1, 4], strides = [1, 1, 1]} : vector<16x16x4xf32> to vector<16x1x4xf32>
    %38 = vector.extract_strided_slice %36 {offsets = [0, 0, 0], sizes = [16, 15, 4], strides = [1, 1, 1]} : vector<16x16x4xf32> to vector<16x15x4xf32>
    %39 = tpu.concatenate %37, %38 in 1 : vector<16x1x4xf32>, vector<16x15x4xf32> -> vector<16x16x4xf32>
    %40 = vector.extract_strided_slice %36 {offsets = [0, 1, 0], sizes = [16, 15, 4], strides = [1, 1, 1]} : vector<16x16x4xf32> to vector<16x15x4xf32>
    %41 = vector.extract_strided_slice %36 {offsets = [0, 14, 0], sizes = [16, 1, 4], strides = [1, 1, 1]} : vector<16x16x4xf32> to vector<16x1x4xf32>
    %42 = tpu.concatenate %40, %41 in 1 : vector<16x15x4xf32>, vector<16x1x4xf32> -> vector<16x16x4xf32>
    %43 = tpu.concatenate %39, %36, %42 in 2 : vector<16x16x4xf32>, vector<16x16x4xf32>, vector<16x16x4xf32> -> vector<16x16x12xf32>
    %44 = vector.shape_cast %43 : vector<16x16x12xf32> to vector<256x12xf32>
    %45 = arith.truncf %44 : vector<256x12xf32> to vector<256x12xbf16>
    %c2 = arith.constant 2 : index
    %c0_13 = arith.constant 0 : index
    %c0_14 = arith.constant 0 : index
    %46 = vector.load %arg2[%c2, %c0_13, %c0_14] : memref<3x12x4xbf16, #tpu.memory_space<vmem>>, vector<1x12x4xbf16>
    %47 = vector.shape_cast %46 : vector<1x12x4xbf16> to vector<12x4xbf16>
    %cst_15 = arith.constant dense<0.000000e+00> : vector<256x4xf32>
    %48 = tpu.matmul %45, %47, %cst_15 {dimension_numbers = #tpu.dot_dimension_numbers<[1], [0], [0], [1], [0, 0, 1, 1], [], []>} : vector<256x12xbf16>, vector<12x4xbf16>, vector<256x4xf32> -> vector<256x4xf32>
    %49 = arith.addf %33, %48 : vector<256x4xf32>
    %cst_16 = arith.constant dense<0.000000e+00> : vector<4xf32>
    %50 = vector.multi_reduction <add>, %49, %cst_16 [0] : vector<256x4xf32> to vector<4xf32>
    %51 = vector.shape_cast %50 : vector<4xf32> to vector<1x4xf32>
    %cst_17 = arith.constant 3.906250e-03 : f32
    %52 = vector.broadcast %cst_17 : f32 to vector<1x4xf32>
    %53 = arith.mulf %51, %52 : vector<1x4xf32>
    %54 = vector.broadcast %53 : vector<1x4xf32> to vector<256x4xf32>
    %55 = arith.subf %49, %54 : vector<256x4xf32>
    %56 = arith.mulf %55, %55 : vector<256x4xf32>
    %cst_18 = arith.constant dense<0.000000e+00> : vector<4xf32>
    %57 = vector.multi_reduction <add>, %56, %cst_18 [0] : vector<256x4xf32> to vector<4xf32>
    %58 = vector.shape_cast %57 : vector<4xf32> to vector<1x4xf32>
    %cst_19 = arith.constant 3.906250e-03 : f32
    %59 = vector.broadcast %cst_19 : f32 to vector<1x4xf32>
    %60 = arith.mulf %58, %59 : vector<1x4xf32>
    %cst_20 = arith.constant 9.99999974E-6 : f32
    %61 = vector.broadcast %cst_20 : f32 to vector<1x4xf32>
    %62 = arith.addf %60, %61 : vector<1x4xf32>
    %63 = math.rsqrt %62 : vector<1x4xf32>
    %64 = vector.shape_cast %3 : vector<4xf32> to vector<1x4xf32>
    %65 = arith.mulf %64, %63 : vector<1x4xf32>
    %66 = vector.broadcast %65 : vector<1x4xf32> to vector<256x4xf32>
    %67 = arith.mulf %55, %66 : vector<256x4xf32>
    %68 = vector.shape_cast %5 : vector<4xf32> to vector<1x4xf32>
    %69 = vector.broadcast %68 : vector<1x4xf32> to vector<256x4xf32>
    %70 = arith.addf %67, %69 : vector<256x4xf32>
    %cst_21 = arith.constant 0.000000e+00 : f32
    %71 = vector.broadcast %cst_21 : f32 to vector<256x4xf32>
    %72 = arith.maximumf %70, %71 : vector<256x4xf32>
    %73 = vector.shape_cast %72 : vector<256x4xf32> to vector<16x16x4xf32>
    %c0_22 = arith.constant 0 : index
    %c0_23 = arith.constant 0 : index
    %74 = vector.load %arg6[%c0_22, %c0_23] : memref<1x4xf32, #tpu.memory_space<vmem>>, vector<1x4xf32>
    %75 = vector.shape_cast %74 : vector<1x4xf32> to vector<4xf32>
    %c0_24 = arith.constant 0 : index
    %c0_25 = arith.constant 0 : index
    %76 = vector.load %arg7[%c0_24, %c0_25] : memref<1x4xf32, #tpu.memory_space<vmem>>, vector<1x4xf32>
    %77 = vector.shape_cast %76 : vector<1x4xf32> to vector<4xf32>
    %78 = vector.extract_strided_slice %73 {offsets = [1, 0, 0], sizes = [1, 16, 4], strides = [1, 1, 1]} : vector<16x16x4xf32> to vector<1x16x4xf32>
    %79 = vector.extract_strided_slice %73 {offsets = [0, 0, 0], sizes = [15, 16, 4], strides = [1, 1, 1]} : vector<16x16x4xf32> to vector<15x16x4xf32>
    %80 = tpu.concatenate %78, %79 in 0 : vector<1x16x4xf32>, vector<15x16x4xf32> -> vector<16x16x4xf32>
    %81 = vector.extract_strided_slice %80 {offsets = [0, 1, 0], sizes = [16, 1, 4], strides = [1, 1, 1]} : vector<16x16x4xf32> to vector<16x1x4xf32>
    %82 = vector.extract_strided_slice %80 {offsets = [0, 0, 0], sizes = [16, 15, 4], strides = [1, 1, 1]} : vector<16x16x4xf32> to vector<16x15x4xf32>
    %83 = tpu.concatenate %81, %82 in 1 : vector<16x1x4xf32>, vector<16x15x4xf32> -> vector<16x16x4xf32>
    %84 = vector.extract_strided_slice %80 {offsets = [0, 1, 0], sizes = [16, 15, 4], strides = [1, 1, 1]} : vector<16x16x4xf32> to vector<16x15x4xf32>
    %85 = vector.extract_strided_slice %80 {offsets = [0, 14, 0], sizes = [16, 1, 4], strides = [1, 1, 1]} : vector<16x16x4xf32> to vector<16x1x4xf32>
    %86 = tpu.concatenate %84, %85 in 1 : vector<16x15x4xf32>, vector<16x1x4xf32> -> vector<16x16x4xf32>
    %87 = tpu.concatenate %83, %80, %86 in 2 : vector<16x16x4xf32>, vector<16x16x4xf32>, vector<16x16x4xf32> -> vector<16x16x12xf32>
    %88 = vector.shape_cast %87 : vector<16x16x12xf32> to vector<256x12xf32>
    %89 = arith.truncf %88 : vector<256x12xf32> to vector<256x12xbf16>
    %c0_26 = arith.constant 0 : index
    %c0_27 = arith.constant 0 : index
    %c0_28 = arith.constant 0 : index
    %90 = vector.load %arg5[%c0_26, %c0_27, %c0_28] : memref<3x12x4xbf16, #tpu.memory_space<vmem>>, vector<1x12x4xbf16>
    %91 = vector.shape_cast %90 : vector<1x12x4xbf16> to vector<12x4xbf16>
    %cst_29 = arith.constant dense<0.000000e+00> : vector<256x4xf32>
    %92 = tpu.matmul %89, %91, %cst_29 {dimension_numbers = #tpu.dot_dimension_numbers<[1], [0], [0], [1], [0, 0, 1, 1], [], []>} : vector<256x12xbf16>, vector<12x4xbf16>, vector<256x4xf32> -> vector<256x4xf32>
    %93 = vector.extract_strided_slice %73 {offsets = [0, 1, 0], sizes = [16, 1, 4], strides = [1, 1, 1]} : vector<16x16x4xf32> to vector<16x1x4xf32>
    %94 = vector.extract_strided_slice %73 {offsets = [0, 0, 0], sizes = [16, 15, 4], strides = [1, 1, 1]} : vector<16x16x4xf32> to vector<16x15x4xf32>
    %95 = tpu.concatenate %93, %94 in 1 : vector<16x1x4xf32>, vector<16x15x4xf32> -> vector<16x16x4xf32>
    %96 = vector.extract_strided_slice %73 {offsets = [0, 1, 0], sizes = [16, 15, 4], strides = [1, 1, 1]} : vector<16x16x4xf32> to vector<16x15x4xf32>
    %97 = vector.extract_strided_slice %73 {offsets = [0, 14, 0], sizes = [16, 1, 4], strides = [1, 1, 1]} : vector<16x16x4xf32> to vector<16x1x4xf32>
    %98 = tpu.concatenate %96, %97 in 1 : vector<16x15x4xf32>, vector<16x1x4xf32> -> vector<16x16x4xf32>
    %99 = tpu.concatenate %95, %73, %98 in 2 : vector<16x16x4xf32>, vector<16x16x4xf32>, vector<16x16x4xf32> -> vector<16x16x12xf32>
    %100 = vector.shape_cast %99 : vector<16x16x12xf32> to vector<256x12xf32>
    %101 = arith.truncf %100 : vector<256x12xf32> to vector<256x12xbf16>
    %c1_30 = arith.constant 1 : index
    %c0_31 = arith.constant 0 : index
    %c0_32 = arith.constant 0 : index
    %102 = vector.load %arg5[%c1_30, %c0_31, %c0_32] : memref<3x12x4xbf16, #tpu.memory_space<vmem>>, vector<1x12x4xbf16>
    %103 = vector.shape_cast %102 : vector<1x12x4xbf16> to vector<12x4xbf16>
    %cst_33 = arith.constant dense<0.000000e+00> : vector<256x4xf32>
    %104 = tpu.matmul %101, %103, %cst_33 {dimension_numbers = #tpu.dot_dimension_numbers<[1], [0], [0], [1], [0, 0, 1, 1], [], []>} : vector<256x12xbf16>, vector<12x4xbf16>, vector<256x4xf32> -> vector<256x4xf32>
    %105 = arith.addf %92, %104 : vector<256x4xf32>
    %106 = vector.extract_strided_slice %73 {offsets = [1, 0, 0], sizes = [15, 16, 4], strides = [1, 1, 1]} : vector<16x16x4xf32> to vector<15x16x4xf32>
    %107 = vector.extract_strided_slice %73 {offsets = [14, 0, 0], sizes = [1, 16, 4], strides = [1, 1, 1]} : vector<16x16x4xf32> to vector<1x16x4xf32>
    %108 = tpu.concatenate %106, %107 in 0 : vector<15x16x4xf32>, vector<1x16x4xf32> -> vector<16x16x4xf32>
    %109 = vector.extract_strided_slice %108 {offsets = [0, 1, 0], sizes = [16, 1, 4], strides = [1, 1, 1]} : vector<16x16x4xf32> to vector<16x1x4xf32>
    %110 = vector.extract_strided_slice %108 {offsets = [0, 0, 0], sizes = [16, 15, 4], strides = [1, 1, 1]} : vector<16x16x4xf32> to vector<16x15x4xf32>
    %111 = tpu.concatenate %109, %110 in 1 : vector<16x1x4xf32>, vector<16x15x4xf32> -> vector<16x16x4xf32>
    %112 = vector.extract_strided_slice %108 {offsets = [0, 1, 0], sizes = [16, 15, 4], strides = [1, 1, 1]} : vector<16x16x4xf32> to vector<16x15x4xf32>
    %113 = vector.extract_strided_slice %108 {offsets = [0, 14, 0], sizes = [16, 1, 4], strides = [1, 1, 1]} : vector<16x16x4xf32> to vector<16x1x4xf32>
    %114 = tpu.concatenate %112, %113 in 1 : vector<16x15x4xf32>, vector<16x1x4xf32> -> vector<16x16x4xf32>
    %115 = tpu.concatenate %111, %108, %114 in 2 : vector<16x16x4xf32>, vector<16x16x4xf32>, vector<16x16x4xf32> -> vector<16x16x12xf32>
    %116 = vector.shape_cast %115 : vector<16x16x12xf32> to vector<256x12xf32>
    %117 = arith.truncf %116 : vector<256x12xf32> to vector<256x12xbf16>
    %c2_34 = arith.constant 2 : index
    %c0_35 = arith.constant 0 : index
    %c0_36 = arith.constant 0 : index
    %118 = vector.load %arg5[%c2_34, %c0_35, %c0_36] : memref<3x12x4xbf16, #tpu.memory_space<vmem>>, vector<1x12x4xbf16>
    %119 = vector.shape_cast %118 : vector<1x12x4xbf16> to vector<12x4xbf16>
    %cst_37 = arith.constant dense<0.000000e+00> : vector<256x4xf32>
    %120 = tpu.matmul %117, %119, %cst_37 {dimension_numbers = #tpu.dot_dimension_numbers<[1], [0], [0], [1], [0, 0, 1, 1], [], []>} : vector<256x12xbf16>, vector<12x4xbf16>, vector<256x4xf32> -> vector<256x4xf32>
    %121 = arith.addf %105, %120 : vector<256x4xf32>
    %cst_38 = arith.constant dense<0.000000e+00> : vector<4xf32>
    %122 = vector.multi_reduction <add>, %121, %cst_38 [0] : vector<256x4xf32> to vector<4xf32>
    %123 = vector.shape_cast %122 : vector<4xf32> to vector<1x4xf32>
    %cst_39 = arith.constant 3.906250e-03 : f32
    %124 = vector.broadcast %cst_39 : f32 to vector<1x4xf32>
    %125 = arith.mulf %123, %124 : vector<1x4xf32>
    %126 = vector.broadcast %125 : vector<1x4xf32> to vector<256x4xf32>
    %127 = arith.subf %121, %126 : vector<256x4xf32>
    %128 = arith.mulf %127, %127 : vector<256x4xf32>
    %cst_40 = arith.constant dense<0.000000e+00> : vector<4xf32>
    %129 = vector.multi_reduction <add>, %128, %cst_40 [0] : vector<256x4xf32> to vector<4xf32>
    %130 = vector.shape_cast %129 : vector<4xf32> to vector<1x4xf32>
    %cst_41 = arith.constant 3.906250e-03 : f32
    %131 = vector.broadcast %cst_41 : f32 to vector<1x4xf32>
    %132 = arith.mulf %130, %131 : vector<1x4xf32>
    %cst_42 = arith.constant 9.99999974E-6 : f32
    %133 = vector.broadcast %cst_42 : f32 to vector<1x4xf32>
    %134 = arith.addf %132, %133 : vector<1x4xf32>
    %135 = math.rsqrt %134 : vector<1x4xf32>
    %136 = vector.shape_cast %75 : vector<4xf32> to vector<1x4xf32>
    %137 = arith.mulf %136, %135 : vector<1x4xf32>
    %138 = vector.broadcast %137 : vector<1x4xf32> to vector<256x4xf32>
    %139 = arith.mulf %127, %138 : vector<256x4xf32>
    %140 = vector.shape_cast %77 : vector<4xf32> to vector<1x4xf32>
    %141 = vector.broadcast %140 : vector<1x4xf32> to vector<256x4xf32>
    %142 = arith.addf %139, %141 : vector<256x4xf32>
    %143 = vector.shape_cast %142 : vector<256x4xf32> to vector<16x16x4xf32>
    %144 = arith.addf %143, %1 : vector<16x16x4xf32>
    %c0_43 = arith.constant 0 : index
    %c0_44 = arith.constant 0 : index
    %c0_45 = arith.constant 0 : index
    %c0_46 = arith.constant 0 : index
    %145 = vector.load %arg8[%c0_43, %c0_44, %c0_45, %c0_46] : memref<1x16x16x4xf32, #tpu.memory_space<vmem>>, vector<1x16x16x4xf32>
    %146 = vector.shape_cast %145 : vector<1x16x16x4xf32> to vector<16x16x4xf32>
    %147 = vector.shape_cast %144 : vector<16x16x4xf32> to vector<1x16x16x4xf32>
    tpu.vector_store %arg8[%c0_43, %c0_44, %c0_45, %c0_46], %147 {strides = array<i32>} : memref<1x16x16x4xf32, #tpu.memory_space<vmem>>, vector<1x16x16x4xf32>,
    return
  }
  func.func @transform_0(%arg0: i32) -> (i32, i32, i32, i32) {
    %c0_i32 = arith.constant 0 : i32
    %c0_i32_0 = arith.constant 0 : i32
    %c0_i32_1 = arith.constant 0 : i32
    %c0_i32_2 = arith.constant 0 : i32
    return %arg0, %c0_i32, %c0_i32_0, %c0_i32_1 : i32, i32, i32, i32
  }
  func.func @transform_1(%arg0: i32) -> (i32, i32, i32) {
    %c0_i32 = arith.constant 0 : i32
    %c0_i32_0 = arith.constant 0 : i32
    %c0_i32_1 = arith.constant 0 : i32
    %c0_i32_2 = arith.constant 0 : i32
    return %c0_i32, %c0_i32_0, %c0_i32_1 : i32, i32, i32
  }
  func.func @transform_2(%arg0: i32) -> (i32, i32) {
    %c0_i32 = arith.constant 0 : i32
    %c0_i32_0 = arith.constant 0 : i32
    %c0_i32_1 = arith.constant 0 : i32
    return %c0_i32, %c0_i32_0 : i32, i32
  }
  func.func @transform_3(%arg0: i32) -> (i32, i32) {
    %c0_i32 = arith.constant 0 : i32
    %c0_i32_0 = arith.constant 0 : i32
    %c0_i32_1 = arith.constant 0 : i32
    return %c0_i32, %c0_i32_0 : i32, i32
  }
  func.func @transform_4(%arg0: i32) -> (i32, i32, i32) {
    %c0_i32 = arith.constant 0 : i32
    %c0_i32_0 = arith.constant 0 : i32
    %c0_i32_1 = arith.constant 0 : i32
    %c0_i32_2 = arith.constant 0 : i32
    return %c0_i32, %c0_i32_0, %c0_i32_1 : i32, i32, i32
  }
  func.func @transform_5(%arg0: i32) -> (i32, i32) {
    %c0_i32 = arith.constant 0 : i32
    %c0_i32_0 = arith.constant 0 : i32
    %c0_i32_1 = arith.constant 0 : i32
    return %c0_i32, %c0_i32_0 : i32, i32
  }
  func.func @transform_6(%arg0: i32) -> (i32, i32) {
    %c0_i32 = arith.constant 0 : i32
    %c0_i32_0 = arith.constant 0 : i32
    %c0_i32_1 = arith.constant 0 : i32
    return %c0_i32, %c0_i32_0 : i32, i32
  }
  func.func @transform_7(%arg0: i32) -> (i32, i32, i32, i32) {
    %c0_i32 = arith.constant 0 : i32
    %c0_i32_0 = arith.constant 0 : i32
    %c0_i32_1 = arith.constant 0 : i32
    %c0_i32_2 = arith.constant 0 : i32
    return %arg0, %c0_i32, %c0_i32_0, %c0_i32_1 : i32, i32, i32, i32
  }
}

</mosaic_0001>

<bundles_post_ra>
// kernel: tpu_custom_call.1
= control target key start
LH: loop header
LB: loop body
LE: loop exit
PB: predicated region body
PF: predicated region fallthrough
CT: control target
= control target key end

     0   :  { %s4272_s24 = smov 0   ;;  %s6518_s0 = inlined_call_operand.vmem [shape: f32[2,16,16,4], index: 0, kind: input, shape index: {}]   ;;  %s6519_s1 = inlined_call_operand.vmem [shape: bf16[3,12,4], index: 1, kind: input, shape index: {}]   ;;  %s6520_s2 = inlined_call_operand.vmem [shape: f32[1,4], index: 2, kind: input, shape index: {}]   ;;  %s6521_s3 = inlined_call_operand.vmem [shape: f32[1,4], index: 3, kind: input, shape index: {}]   ;;  %s6522_s4 = inlined_call_operand.vmem [shape: bf16[3,12,4], index: 4, kind: input, shape index: {}]   ;;  %s6523_s5 = inlined_call_operand.vmem [shape: f32[1,4], index: 5, kind: input, shape index: {}]   ;;  %s6524_s6 = inlined_call_operand.vmem [shape: f32[1,4], index: 6, kind: input, shape index: {}]   ;;  %s6525_s7 = inlined_call_operand.vmem [shape: f32[2,16,16,4], index: 7, kind: output, shape index: {}]  }
   0x1 LB: > { %s3285_s25 = sadd.s32 4294967295, %s4228_s24   ;;  %p3289_p0 = scmp.ge.s32.totalorder %s4228_s24, 1  ;;  %s4228_s24 = sphi %s4272_s24, %s17_s24  }
   0x2   : > { %p237_p1 = scmp.lt.s32.totalorder %s4228_s24, 3 }
   0x4   : > { %p238_p2 = pnand %p3289_p0, %p237_p1 }
   0x6   : > { %241 = sbr.rel (%p238_p2) target bundleno = 1391 (0x56f), region = 48 }
   0xd   : > { %p269_p3 = scmp.lt.s32.totalorder %s3285_s25, 1  ;;  %v4180_v0 = vld [vmem:[%s6519_s1 + $0x8] sm:$0x3f]   ;;  %vm905_vm0 = vcmask 1045504   ;;  %vm465_vm1 = vcmask 1046528   ;;  %s4230_s9 = smov 4  }
   0xe   : > { %3844 = vmatprep.subr.msk.bf16.mxu0 %vm905_vm0, %v4180_v0  ;;  %v907_v1 = vsel %vm905_vm0, %v4180_v0, 0  ;;  %s4231_s10 = smov 8   ;;  %v4378_v40 = vld [vmem:[%s6519_s1] sm:$0x3f]   ;;  %vm374_vm2 = vcmask 1040384   ;;  %vm736_vm3 = vcmask 31744  }
   0xf   : > { %s6637_s25 = smov (!%p269_p3, %s3285_s25), 1  ;;  %3513 = vmatpush3.bf16.msra.mxu0 %v907_v1  ;;  %vm767_vm4 = vcmask 64512   ;;  %vm856_vm5 = vcmask 97280  }
  0x10   : > { %s3408_s28 = sshll.u32 %s6637_s25, 8  ;;  %3845 = vmatprep.subr.msk.bf16.mxu0 %vm905_vm0, %v4378_v40 }
  0x11   : > { %s4291_s8 = scalar_lea.vmem %s6518_s0, %s3408_s28  ;;  %s6397_s12 = scalar_lea.vmem %s6525_s7, %s3408_s28 }
  0x12   : > { %v4296_v2 = vld [vmem:[%s4291_s8] sm:$0xff]  ;;  %v4299_v3 = vld [vmem:[%s4291_s8 + $0x8] sm:$0xff]  ;;  %v4302_v4 = vld [vmem:[%s4291_s8 + $0x10] sm:$0xff] }
  0x13   : > { %v3860_v5 = vpack.i.bf16 %v4299_v3, %v4296_v2  ;;  %v330_v6 = vrot.slane %v4296_v2, 1  ;;  %v379_v7 = vrot.slane %v4299_v3, 7  ;;  %v4309_v8 = vld [vmem:[%s4291_s8 + $0x18] sm:$0xff]  ;;  %v468_v9 = vrot.slane %v4299_v3, 1  ;;  %v4314_v11 = vld [vmem:[%s4291_s8 + $0x20] sm:$0xff]  ;;  %v4322_v15 = vld [vmem:[%s4291_s8 + $0x28] sm:$0xff] }
  0x14   : > { %v329_v10 = vrot.slane %v4302_v4, 1  ;;  %v3865_v12 = vpack.i.bf16 %v4309_v8, %v4302_v4  ;;  %v376_v13 = vrot.slane %v4309_v8, 7  ;;  %v466_v14 = vrot.slane %v4309_v8, 1  ;;  %v4331_v18 = vld [vmem:[%s4291_s8 + $0x30] sm:$0xff]  ;;  %v4340_v22 = vld [vmem:[%s4291_s8 + $0x38] sm:$0xff]  ;;  %v4359_v33 = vld [vmem:[%s4291_s8 + $0x40] sm:$0xff] }
  0x15   : > { %3861 = vrot.lane.b32.xlu0 %v3860_v5, %s4230_s9  ;;  %v469_v16 = vsel %vm465_vm1, %v330_v6, %v468_v9  ;;  %v527_v17 = vsel %vm465_vm1, %v468_v9, %v379_v7  ;;  %v331_v23 = vrot.slane %v4314_v11, 1  ;;  %v382_v24 = vrot.slane %v4322_v15, 7  ;;  %v4362_v34 = vld [vmem:[%s4291_s8 + $0x48] sm:$0xff]  ;;  %v4365_v35 = vld [vmem:[%s4291_s8 + $0x50] sm:$0xff]  ;;  %v4372_v38 = vld [vmem:[%s4291_s8 + $0x58] sm:$0xff] }
  0x16   : > { %v3875_v19 = vpack.i.bf16 %v527_v17, %v469_v16  ;;  %v467_v20 = vsel %vm465_vm1, %v329_v10, %v466_v14  ;;  %v526_v21 = vsel %vm465_vm1, %v466_v14, %v376_v13  ;;  %v470_v25 = vrot.slane %v4322_v15, 1  ;;  %v4404_v52 = vld [vmem:[%s4291_s8 + $0x60] sm:$0xff]  ;;  %v4407_v53 = vld [vmem:[%s4291_s8 + $0x68] sm:$0xff]  ;;  %v4420_v58 = vld [vmem:[%s4291_s8 + $0x70] sm:$0xff] }
  0x17   : > { %v3880_v26 = vpack.i.bf16 %v526_v21, %v467_v20  ;;  %v3870_v27 = vpack.i.bf16 %v4322_v15, %v4314_v11  ;;  %v332_v28 = vrot.slane %v4331_v18, 1  ;;  %v385_v31 = vrot.slane %v4340_v22, 7  ;;  %v4423_v59 = vld [vmem:[%s4291_s8 + $0x78] sm:$0xff]  ;;  %v4442_v16 = vld [vmem:[%s4291_s8 + $0x80] sm:$0xff]  ;;  %v4445_v17 = vld [vmem:[%s4291_s8 + $0x88] sm:$0xff] }
  0x18   : > { %3876 = vrot.lane.b32.xlu1 %v3875_v19, %s4231_s10  ;;  %v471_v29 = vsel %vm465_vm1, %v331_v23, %v470_v25  ;;  %v528_v30 = vsel %vm465_vm1, %v470_v25, %v382_v24  ;;  %v472_v32 = vrot.slane %v4340_v22, 1  ;;  %v3885_v36 = vpack.i.bf16 %v4340_v22, %v4331_v18 }
  0x19   : > { %3866 = vrot.lane.b32.xlu0 %v3865_v12, %s4230_s9  ;;  %v3890_v37 = vpack.i.bf16 %v528_v30, %v471_v29  ;;  %v333_v39 = vrot.slane %v4359_v33, 1  ;;  %v388_v43 = vrot.slane %v4362_v34, 7  ;;  %v474_v44 = vrot.slane %v4362_v34, 1 }
  0x1a   : > { %v473_v41 = vsel %vm465_vm1, %v332_v28, %v472_v32  ;;  %v529_v42 = vsel %vm465_vm1, %v472_v32, %v385_v31  ;;  %v3900_v46 = vpack.i.bf16 %v4362_v34, %v4359_v33  ;;  %v334_v47 = vrot.slane %v4365_v35, 1 }
  0x1b   : > { %v3895_v45 = vpack.i.bf16 %v529_v42, %v473_v41  ;;  %v476_v48 = vrot.slane %v4372_v38, 1  ;;  %v475_v49 = vsel %vm465_vm1, %v333_v39, %v474_v44  ;;  %v530_v50 = vsel %vm465_vm1, %v474_v44, %v388_v43 }
  0x1c   : > { %3881 = vrot.lane.b32.xlu1 %v3880_v26, %s4231_s10  ;;  %v391_v51 = vrot.slane %v4372_v38, 7  ;;  %v3905_v54 = vpack.i.bf16 %v4372_v38, %v4365_v35  ;;  %v3910_v55 = vpack.i.bf16 %v530_v50, %v475_v49  ;;  %v335_v60 = vrot.slane %v4404_v52, 1  ;;  %v4458_v26 = vld [vmem:[%s4291_s8 + $0x90] sm:$0xff]  ;;  %v4483_v49 = vld [vmem:[%s4291_s8 + $0xa8] sm:$0xff] }
  0x1d   : > { %3871 = vrot.lane.b32.xlu0 %v3870_v27, %s4230_s9  ;;  %v477_v56 = vsel %vm465_vm1, %v334_v47, %v476_v48  ;;  %v394_v61 = vrot.slane %v4407_v53, 7  ;;  %v478_v62 = vrot.slane %v4407_v53, 1  ;;  %v3920_v0 = vpack.i.bf16 %v4407_v53, %v4404_v52  ;;  %v4461_v27 = vld [vmem:[%s4291_s8 + $0x98] sm:$0xff] }
  0x1e   : > { %v531_v57 = vsel %vm465_vm1, %v476_v48, %v391_v51  ;;  %v336_v1 = vrot.slane %v4420_v58, 1  ;;  %v480_v5 = vrot.slane %v4423_v59, 1  ;;  %v397_v14 = vrot.slane %v4423_v59, 7  ;;  %v4480_v48 = vld [vmem:[%s4291_s8 + $0xa0] sm:$0xff] }
  0x1f   : > { %v3915_v63 = vpack.i.bf16 %v531_v57, %v477_v56  ;;  %v479_v9 = vsel %vm465_vm1, %v335_v60, %v478_v62  ;;  %v532_v12 = vsel %vm465_vm1, %v478_v62, %v394_v61  ;;  %v3925_v19 = vpack.i.bf16 %v4423_v59, %v4420_v58  ;;  %v4496_v57 = vld [vmem:[%s4291_s8 + $0xb0] sm:$0xff]  ;;  %v4499_v62 = vld [vmem:[%s4291_s8 + $0xb8] sm:$0xff] }
  0x20   : > { %3886 = vrot.lane.b32.xlu1 %v3885_v36, %s4230_s9  ;;  %v3930_v20 = vpack.i.bf16 %v532_v12, %v479_v9  ;;  %v481_v21 = vsel %vm465_vm1, %v336_v1, %v480_v5  ;;  %v533_v25 = vsel %vm465_vm1, %v480_v5, %v397_v14  ;;  %v337_v29 = vrot.slane %v4442_v16, 1 }
  0x21   : > { %3891 = vrot.lane.b32.xlu0 %v3890_v37, %s4231_s10  ;;  %v400_v30 = vrot.slane %v4445_v17, 7  ;;  %v482_v32 = vrot.slane %v4445_v17, 1  ;;  %v3935_v36 = vpack.i.bf16 %v533_v25, %v481_v21  ;;  %v3940_v37 = vpack.i.bf16 %v4445_v17, %v4442_v16 }
  0x22   : > { %v6532_v41 = vrot.slane %v4458_v26, 1  ;;  %v484_v42 = vrot.slane %v4461_v27, 1  ;;  %v3945_v50 = vpack.i.bf16 %v4461_v27, %v4458_v26  ;;  %v486_v5 = vrot.slane %v4483_v49, 1 }
  0x23   : > { %v483_v44 = vsel %vm465_vm1, %v337_v29, %v482_v32  ;;  %v3960_v12 = vpack.i.bf16 %v4483_v49, %v4480_v48  ;;  %v390_v34 = vrot.slane %v4365_v35, 7  ;;  %v396_v53 = vrot.slane %v4420_v58, 7 }
  0x24   : > { %3896 = vrot.lane.b32.xlu1 %v3895_v45, %s4231_s10  ;;  %v534_v45 = vsel %vm465_vm1, %v482_v32, %v400_v30  ;;  %v6528_v32 = vrot.slane %v4499_v62, 7  ;;  %v402_v17 = vrot.slane %v4458_v26, 7 }
  0x25   : > { %3901 = vrot.lane.b32.xlu0 %v3900_v46, %s4230_s9  ;;  %v6535_v46 = vrot.slane %v4461_v27, 7 }
  0x27   : > { %v535_v56 = vsel %vm465_vm1, %v484_v42, %v6535_v46 }
  0x28   : > { %3906 = vrot.lane.b32.xlu1 %v3905_v54, %s4230_s9  ;;  %v3950_v54 = vpack.i.bf16 %v534_v45, %v483_v44 }
  0x29   : > { %3911 = vrot.lane.b32.xlu0 %v3910_v55, %s4231_s10  ;;  %v485_v55 = vsel %vm465_vm1, %v6532_v41, %v484_v42  ;;  %v3965_v42 = vpack.i.bf16 %v4499_v62, %v4496_v57  ;;  %v4575_v41 = vld [vmem:[%s4291_s8 + $0xf0] sm:$0xff] }
  0x2a   : > { %v3955_v9 = vpack.i.bf16 %v535_v56, %v485_v55 }
  0x2c   : > { %3916 = vrot.lane.b32.xlu1 %v3915_v63, %s4231_s10  ;;  %v6529_v63 = vrot.slane %v4480_v48, 1 }
  0x2d   : > { %3921 = vrot.lane.b32.xlu0 %v3920_v0, %s4230_s9  ;;  %v6531_v0 = vrot.slane %v4483_v49, 7 }
  0x2e   : > { %v487_v21 = vsel %vm465_vm1, %v6529_v63, %v486_v5 }
  0x2f   : > { %v536_v25 = vsel %vm465_vm1, %v486_v5, %v6531_v0 }
  0x30   : > { %3926 = vrot.lane.b32.xlu1 %v3925_v19, %s4230_s9  ;;  %v6526_v19 = vrot.slane %v4496_v57, 1  ;;  %v3970_v44 = vpack.i.bf16 %v536_v25, %v487_v21 }
  0x31   : > { %3931 = vrot.lane.b32.xlu0 %v3930_v20, %s4231_s10  ;;  %v488_v20 = vrot.slane %v4499_v62, 1 }
  0x33   : > { %v489_v45 = vsel %vm465_vm1, %v6526_v19, %v488_v20 }
  0x34   : > { %3936 = vrot.lane.b32.xlu1 %v3935_v36, %s4231_s10  ;;  %v4518_v36 = vld [vmem:[%s4291_s8 + $0xc0] sm:$0xff] }
  0x35   : > { %3941 = vrot.lane.b32.xlu0 %v3940_v37, %s4230_s9  ;;  %v4521_v37 = vld [vmem:[%s4291_s8 + $0xc8] sm:$0xff]  ;;  %v6527_v55 = vrot.slane %v4518_v36, 1 }
  0x36   : > { %v6530_v56 = vrot.slane %v4521_v37, 7  ;;  %v490_v5 = vrot.slane %v4521_v37, 1  ;;  %v3980_v21 = vpack.i.bf16 %v4521_v37, %v4518_v36 }
  0x38   : > { %3946 = vrot.lane.b32.xlu1 %v3945_v50, %s4230_s9  ;;  %v537_v50 = vsel %vm465_vm1, %v488_v20, %v6528_v32  ;;  %v491_v25 = vsel %vm465_vm1, %v6527_v55, %v490_v5  ;;  %v538_v19 = vsel %vm465_vm1, %v490_v5, %v6530_v56 }
  0x39   : > { %3951 = vrot.lane.b32.xlu0 %v3950_v54, %s4231_s10  ;;  %v4534_v54 = vld [vmem:[%s4291_s8 + $0xd0] sm:$0xff]  ;;  %v3990_v32 = vpack.i.bf16 %v538_v19, %v491_v25 }
  0x3a   : > { %v6533_v20 = vrot.slane %v4534_v54, 1 }
  0x3c   : > { %3956 = vrot.lane.b32.xlu1 %v3955_v9, %s4231_s10  ;;  %v4540_v9 = vld [vmem:[%s4291_s8 + $0xd8] sm:$0xff] }
  0x3d   : > { %3961 = vrot.lane.b32.xlu0 %v3960_v12, %s4230_s9  ;;  %v3975_v12 = vpack.i.bf16 %v537_v50, %v489_v45  ;;  %v4556_v45 = vld [vmem:[%s4291_s8 + $0xe0] sm:$0xff]  ;;  %v4559_v50 = vld [vmem:[%s4291_s8 + $0xe8] sm:$0xff]  ;;  %v3985_v55 = vpack.i.bf16 %v4540_v9, %v4534_v54 }
  0x3e   : > { %v6536_v63 = vrot.slane %v4556_v45, 1  ;;  %v6539_v0 = vrot.slane %v4559_v50, 7  ;;  %v4000_v25 = vpack.i.bf16 %v4559_v50, %v4556_v45 }
  0x40   : > { %3966 = vrot.lane.b32.xlu1 %v3965_v42, %s4230_s9  ;;  %v6534_v42 = vrot.slane %v4540_v9, 7 }
  0x41   : > { %3971 = vrot.lane.b32.xlu0 %v3970_v44, %s4231_s10  ;;  %v492_v44 = vrot.slane %v4540_v9, 1 }
  0x43   : > { %v493_v5 = vsel %vm465_vm1, %v6533_v20, %v492_v44  ;;  %v539_v56 = vsel %vm465_vm1, %v492_v44, %v6534_v42  ;;  %v6537_v20 = vrot.slane %v4575_v41, 1 }
  0x44   : > { %3976 = vrot.lane.b32.xlu1 %v3975_v12, %s4231_s10  ;;  %v494_v12 = vrot.slane %v4559_v50, 1  ;;  %v3995_v19 = vpack.i.bf16 %v539_v56, %v493_v5 }
  0x45   : > { %3981 = vrot.lane.b32.xlu0 %v3980_v21, %s4230_s9  ;;  %v4578_v21 = vld [vmem:[%s4291_s8 + $0xf8] sm:$0xff] }
  0x46   : > { %v495_v44 = vsel %vm465_vm1, %v6536_v63, %v494_v12  ;;  %v540_v42 = vsel %vm465_vm1, %v494_v12, %v6539_v0  ;;  %v6538_v46 = vrot.slane %v4578_v21, 7  ;;  %v4010_v56 = vpack.i.bf16 %v4578_v21, %v4575_v41 }
  0x48   : > { %3986 = vrot.lane.b32.xlu1 %v3985_v55, %s4230_s9  ;;  %v825_v55 = vrot.slane %v4578_v21, 1 }
  0x49   : > { %3991 = vrot.lane.b32.xlu0 %v3990_v32, %s4231_s10  ;;  %v4005_v32 = vpack.i.bf16 %v540_v42, %v495_v44  ;;  %v378_v42 = vrot.slane %v4296_v2, 7 }
  0x4a   : > { %v826_v5 = vsel %vm465_vm1, %v6537_v20, %v825_v55  ;;  %v829_v12 = vsel %vm465_vm1, %v825_v55, %v6538_v46 }
  0x4b   : > { %v4015_v63 = vpack.i.bf16 %v829_v12, %v826_v5  ;;  %v380_v55 = vsel %vm374_vm2, %v378_v42, %v379_v7 }
  0x4c   : > { %3996 = vrot.lane.b32.xlu1 %v3995_v19, %s4231_s10  ;;  %v375_v19 = vrot.slane %v4302_v4, 7 }
  0x4d   : > { %4001 = vrot.lane.b32.xlu0 %v4000_v25, %s4230_s9 }
  0x4e   : > { %v377_v5 = vsel %vm374_vm2, %v375_v19, %v376_v13  ;;  %v450_v12 = vsel %vm374_vm2, %v329_v10, %v375_v19 }
  0x50   : > { %4006 = vrot.lane.b32.xlu1 %v4005_v32, %s4231_s10  ;;  %v451_v32 = vsel %vm374_vm2, %v330_v6, %v378_v42 }
  0x51   : > { %4011 = vrot.lane.b32.xlu0 %v4010_v56, %s4230_s9  ;;  %v381_v56 = vrot.slane %v4314_v11, 7 }
  0x53   : > { %v383_v0 = vsel %vm374_vm2, %v381_v56, %v382_v24  ;;  %v452_v19 = vsel %vm374_vm2, %v331_v23, %v381_v56 }
  0x54   : > { %4016 = vrot.lane.b32.xlu1 %v4015_v63, %s4231_s10 }
  0x87   : > { %v3862_v25 = vpop.permute.xlu0 %3861 }
  0x88   : > { %v3864_v44 = vunpack.i.h.bf16 %v3862_v25  ;;  %v3863_v20 = vunpack.i.l.bf16 %v3862_v25 }
  0x8a   : > { %v3877_v63 = vpop.permute.xlu1 %3876  ;;  %v739_v3 = vsel %vm736_vm3, %v451_v32, %v3863_v20  ;;  %v740_v7 = vsel %vm736_vm3, %v380_v55, %v3864_v44 }
  0x8b   : > { %v3867_v25 = vpop.permute.xlu0 %3866  ;;  %v3879_v2 = vunpack.i.h.bf16 %v3877_v63  ;;  %v3878_v46 = vunpack.i.l.bf16 %v3877_v63 }
  0x8c   : > { %v3869_v6 = vunpack.i.h.bf16 %v3867_v25  ;;  %v3868_v42 = vunpack.i.l.bf16 %v3867_v25 }
  0x8d   : > { %v770_v8 = vsel %vm767_vm4, %v739_v3, %v3878_v46  ;;  %v771_v13 = vsel %vm767_vm4, %v740_v7, %v3879_v2  ;;  %v384_v46 = vrot.slane %v4331_v18, 7  ;;  %v1076_v2 = vsel %vm905_vm0, %v4378_v40, 0 }
  0x8e   : > { %v738_v4 = vsel %vm736_vm3, %v377_v5, %v3869_v6  ;;  %v737_v10 = vsel %vm736_vm3, %v450_v12, %v3868_v42  ;;  %v3882_v20 = vpop.permute.xlu1 %3881  ;;  %v4633_v55 = vpack.c.bf16 %v771_v13, %v770_v8  ;;  %v387_v5 = vrot.slane %v4359_v33, 7  ;;  %v4650_v6 = vld [vmem:[%s6519_s1 + $0x10] sm:$0x3f]  }
  0x8f   : > { %v3872_v44 = vpop.permute.xlu0 %3871  ;;  %v3884_v15 = vunpack.i.h.bf16 %v3882_v20  ;;  %v3883_v32 = vunpack.i.l.bf16 %v3882_v20  ;;  %v453_v40 = vsel %vm374_vm2, %v332_v28, %v384_v46 }
  0x90   : > { %v3874_v24 = vunpack.i.h.bf16 %v3872_v44  ;;  %v3873_v63 = vunpack.i.l.bf16 %v3872_v44  ;;  %3514 = vmatprep.mubr.msk.bf16.mxu0 %vm856_vm5, %v4633_v55  ;;  %v454_v22 = vsel %vm374_vm2, %v333_v39, %v387_v5 }
  0x91   : > { %v769_v12 = vsel %vm767_vm4, %v738_v4, %v3884_v15  ;;  %v768_v11 = vsel %vm767_vm4, %v737_v10, %v3883_v32  ;;  %v389_v15 = vsel %vm374_vm2, %v387_v5, %v388_v43  ;;  %v393_v43 = vrot.slane %v4404_v52, 7 }
  0x92   : > { %v4641_v25 = vpack.c.bf16 %v769_v12, %v768_v11  ;;  %v742_v23 = vsel %vm736_vm3, %v383_v0, %v3874_v24  ;;  %v741_v56 = vsel %vm736_vm3, %v452_v19, %v3873_v63  ;;  %v3887_v3 = vpop.permute.xlu1 %3886  ;;  %v386_v0 = vsel %vm374_vm2, %v384_v46, %v385_v31 }
  0x93   : > { %v3892_v7 = vpop.permute.xlu0 %3891  ;;  %v3889_v13 = vunpack.i.h.bf16 %v3887_v3  ;;  %v3888_v4 = vunpack.i.l.bf16 %v3887_v3  ;;  %v456_v38 = vsel %vm374_vm2, %v335_v60, %v393_v43  ;;  %v399_v60 = vrot.slane %v4442_v16, 7 }
  0x94   : > { %v3894_v42 = vunpack.i.h.bf16 %v3892_v7  ;;  %v3893_v8 = vunpack.i.l.bf16 %v3892_v7  ;;  %3515 = vmatmul.mubr.msk.bf16.vlgmr.msra.gmra.mrb[0].mxu0 %vm856_vm5, %v4641_v25 }
  0x95   : > { %3547 = vmatpush3.bf16.msra.mxu0 %v1076_v2  ;;  %v744_v63 = vsel %vm736_vm3, %v386_v0, %v3889_v13  ;;  %v743_v46 = vsel %vm736_vm3, %v453_v40, %v3888_v4  ;;  %v455_v13 = vsel %vm374_vm2, %v334_v47, %v390_v34  ;;  %v458_v59 = vsel %vm374_vm2, %v337_v29, %v399_v60 }
  0x96   : > { %v772_v10 = vsel %vm767_vm4, %v741_v56, %v3893_v8  ;;  %v773_v20 = vsel %vm767_vm4, %v742_v23, %v3894_v42  ;;  %v3897_v44 = vpop.permute.xlu1 %3896  ;;  %3846 = vmatprep.subr.msk.bf16.mxu0 %vm905_vm0, %v4650_v6  ;;  %v392_v8 = vsel %vm374_vm2, %v390_v34, %v391_v51  ;;  %v405_v29 = vrot.slane %v4480_v48, 7 }
  0x97   : > { %v4662_v19 = vpack.c.bf16 %v773_v20, %v772_v10  ;;  %v3902_v31 = vpop.permute.xlu0 %3901  ;;  %v3899_v18 = vunpack.i.h.bf16 %v3897_v44  ;;  %v3898_v28 = vunpack.i.l.bf16 %v3897_v44  ;;  %v395_v20 = vsel %vm374_vm2, %v393_v43, %v394_v61 }
  0x98   : > { %v3904_v32 = vunpack.i.h.bf16 %v3902_v31  ;;  %v3903_v24 = vunpack.i.l.bf16 %v3902_v31  ;;  %v398_v43 = vsel %vm374_vm2, %v396_v53, %v397_v14 }
  0x99   : > { %3518 = vmatprep.mubr.msk.bf16.mxu0 %vm856_vm5, %v4662_v19  ;;  %v774_v33 = vsel %vm767_vm4, %v743_v46, %v3898_v28  ;;  %v775_v39 = vsel %vm767_vm4, %v744_v63, %v3899_v18 }
  0x9a   : > { %v4680_v5 = vpack.c.bf16 %v775_v39, %v774_v33  ;;  %v746_v12 = vsel %vm736_vm3, %v389_v15, %v3904_v32  ;;  %v745_v11 = vsel %vm736_vm3, %v454_v22, %v3903_v24  ;;  %v3907_v23 = vpop.permute.xlu1 %3906 }
  0x9b   : > { %v3912_v56 = vpop.permute.xlu0 %3911  ;;  %v3909_v2 = vunpack.i.h.bf16 %v3907_v23  ;;  %v3908_v42 = vunpack.i.l.bf16 %v3907_v23 }
  0x9c   : > { %v3914_v3 = vunpack.i.h.bf16 %v3912_v56  ;;  %v3913_v7 = vunpack.i.l.bf16 %v3912_v56  ;;  %3519 = vmatmul.mubr.msk.bf16.gmra.mrb[4].mxu0 %vm856_vm5, %v4680_v5 }
  0x9d   : > { %v748_v22 = vsel %vm736_vm3, %v392_v8, %v3909_v2  ;;  %v747_v31 = vsel %vm736_vm3, %v455_v13, %v3908_v42 }
  0x9e   : > { %v776_v4 = vsel %vm767_vm4, %v745_v11, %v3913_v7  ;;  %v777_v0 = vsel %vm767_vm4, %v746_v12, %v3914_v3  ;;  %v3917_v10 = vpop.permute.xlu1 %3916  ;;  %v457_v12 = vsel %vm374_vm2, %v336_v1, %v396_v53  ;;  %v401_v7 = vsel %vm374_vm2, %v399_v60, %v400_v30 }
  0x9f   : > { %v4694_v40 = vpack.c.bf16 %v777_v0, %v776_v4  ;;  %v3922_v51 = vpop.permute.xlu0 %3921  ;;  %v3919_v44 = vunpack.i.h.bf16 %v3917_v10  ;;  %v3918_v35 = vunpack.i.l.bf16 %v3917_v10 }
  0xa0   : > { %v3924_v15 = vunpack.i.h.bf16 %v3922_v51  ;;  %v3923_v47 = vunpack.i.l.bf16 %v3922_v51 }
  0xa1   : > { %3522 = vmatprep.mubr.msk.bf16.mxu0 %vm856_vm5, %v4694_v40  ;;  %v778_v61 = vsel %vm767_vm4, %v747_v31, %v3918_v35  ;;  %v779_v52 = vsel %vm767_vm4, %v748_v22, %v3919_v44  ;;  %v6558_v31 = vrot.slane %v4458_v26, 1 }
  0xa2   : > { %v4710_v18 = vpack.c.bf16 %v779_v52, %v778_v61  ;;  %v750_v28 = vsel %vm736_vm3, %v395_v20, %v3924_v15  ;;  %v749_v32 = vsel %vm736_vm3, %v456_v38, %v3923_v47  ;;  %v3927_v24 = vpop.permute.xlu1 %3926  ;;  %v6557_v47 = vrot.slane %v4461_v27, 7 }
  0xa3   : > { %v3932_v63 = vpop.permute.xlu0 %3931  ;;  %v3929_v33 = vunpack.i.h.bf16 %v3927_v24  ;;  %v3928_v39 = vunpack.i.l.bf16 %v3927_v24  ;;  %v459_v53 = vsel %vm374_vm2, %v6558_v31, %v402_v17 }
  0xa4   : > { %v3934_v46 = vunpack.i.h.bf16 %v3932_v63  ;;  %v3933_v34 = vunpack.i.l.bf16 %v3932_v63  ;;  %3523 = vmatmul.mubr.msk.bf16.gmra.mrb[8].mxu0 %vm856_vm5, %v4710_v18  ;;  %v404_v22 = vsel %vm374_vm2, %v402_v17, %v6557_v47  ;;  %v6560_v63 = vrot.slane %v4480_v48, 1 }
  0xa5   : > { %v752_v8 = vsel %vm736_vm3, %v398_v43, %v3929_v33  ;;  %v751_v13 = vsel %vm736_vm3, %v457_v12, %v3928_v39 }
  0xa6   : > { %v780_v11 = vsel %vm767_vm4, %v749_v32, %v3933_v34  ;;  %v781_v23 = vsel %vm767_vm4, %v750_v28, %v3934_v46  ;;  %v3937_v3 = vpop.permute.xlu1 %3936  ;;  %v6559_v32 = vrot.slane %v4483_v49, 7  ;;  %v460_v27 = vsel %vm374_vm2, %v6560_v63, %v405_v29 }
  0xa7   : > { %v4724_v56 = vpack.c.bf16 %v781_v23, %v780_v11  ;;  %v3942_v14 = vpop.permute.xlu0 %3941  ;;  %v3939_v2 = vunpack.i.h.bf16 %v3937_v3  ;;  %v3938_v58 = vunpack.i.l.bf16 %v3937_v3  ;;  %v408_v49 = vrot.slane %v4496_v57, 7 }
  0xa8   : > { %v3944_v42 = vunpack.i.h.bf16 %v3942_v14  ;;  %v3943_v1 = vunpack.i.l.bf16 %v3942_v14  ;;  %v407_v24 = vsel %vm374_vm2, %v405_v29, %v6559_v32  ;;  %v411_v23 = vrot.slane %v4518_v36, 7 }
  0xa9   : > { %3526 = vmatprep.mubr.msk.bf16.mxu0 %vm856_vm5, %v4724_v56  ;;  %v782_v30 = vsel %vm767_vm4, %v751_v13, %v3938_v58  ;;  %v783_v16 = vsel %vm767_vm4, %v752_v8, %v3939_v2  ;;  %v6561_v13 = vrot.slane %v4499_v62, 7 }
  0xaa   : > { %v4740_v4 = vpack.c.bf16 %v783_v16, %v782_v30  ;;  %v754_v0 = vsel %vm736_vm3, %v401_v7, %v3944_v42  ;;  %v753_v10 = vsel %vm736_vm3, %v458_v59, %v3943_v1  ;;  %v3947_v20 = vpop.permute.xlu1 %3946  ;;  %v6562_v30 = vrot.slane %v4496_v57, 1 }
  0xab   : > { %v3952_v38 = vpop.permute.xlu0 %3951  ;;  %v3949_v35 = vunpack.i.h.bf16 %v3947_v20  ;;  %v3948_v15 = vunpack.i.l.bf16 %v3947_v20  ;;  %v410_v17 = vsel %vm374_vm2, %v408_v49, %v6561_v13 }
  0xac   : > { %v3954_v51 = vunpack.i.h.bf16 %v3952_v38  ;;  %v3953_v44 = vunpack.i.l.bf16 %v3952_v38  ;;  %3527 = vmatmul.mubr.msk.bf16.gmra.mrb[12].mxu0 %vm856_vm5, %v4740_v4  ;;  %v461_v16 = vsel %vm374_vm2, %v6562_v30, %v408_v49  ;;  %v6563_v38 = vrot.slane %v4521_v37, 7 }
  0xad   : > { %v756_v43 = vsel %vm736_vm3, %v404_v22, %v3949_v35  ;;  %v755_v12 = vsel %vm736_vm3, %v459_v53, %v3948_v15  ;;  %v414_v37 = vrot.slane %v4534_v54, 7  ;;  %v6566_v49 = vrot.slane %v4534_v54, 1 }
  0xae   : > { %v784_v61 = vsel %vm767_vm4, %v753_v10, %v3953_v44  ;;  %v785_v52 = vsel %vm767_vm4, %v754_v0, %v3954_v51  ;;  %v3957_v28 = vpop.permute.xlu1 %3956  ;;  %v413_v51 = vsel %vm374_vm2, %v411_v23, %v6563_v38  ;;  %v6564_v44 = vrot.slane %v4518_v36, 1 }
  0xaf   : > { %v4754_v60 = vpack.c.bf16 %v785_v52, %v784_v61  ;;  %v3962_v46 = vpop.permute.xlu0 %3961  ;;  %v3959_v34 = vunpack.i.h.bf16 %v3957_v28  ;;  %v3958_v26 = vunpack.i.l.bf16 %v3957_v28  ;;  %v417_v52 = vrot.slane %v4556_v45, 7 }
  0xb0   : > { %v3964_v33 = vunpack.i.h.bf16 %v3962_v46  ;;  %v3963_v39 = vunpack.i.l.bf16 %v3962_v46  ;;  %v462_v62 = vsel %vm374_vm2, %v6564_v44, %v411_v23  ;;  %v6570_v44 = vrot.slane %v4575_v41, 1 }
  0xb1   : > { %3530 = vmatprep.mubr.msk.bf16.mxu0 %vm856_vm5, %v4754_v60  ;;  %v786_v11 = vsel %vm767_vm4, %v755_v12, %v3958_v26  ;;  %v787_v48 = vsel %vm767_vm4, %v756_v43, %v3959_v34  ;;  %v819_v26 = vrot.slane %v4575_v41, 7  ;;  %v6565_v43 = vrot.slane %v4540_v9, 7 }
  0xb2   : > { %v4770_v3 = vpack.c.bf16 %v787_v48, %v786_v11  ;;  %v758_v7 = vsel %vm736_vm3, %v407_v24, %v3964_v33  ;;  %v757_v59 = vsel %vm736_vm3, %v460_v27, %v3963_v39  ;;  %v3967_v14 = vpop.permute.xlu1 %3966  ;;  %v463_v11 = vsel %vm374_vm2, %v6566_v49, %v414_v37 }
  0xb3   : > { %v3972_v2 = vpop.permute.xlu0 %3971  ;;  %v3969_v1 = vunpack.i.h.bf16 %v3967_v14  ;;  %v3968_v8 = vunpack.i.l.bf16 %v3967_v14  ;;  %v416_v12 = vsel %vm374_vm2, %v414_v37, %v6565_v43  ;;  %v6567_v14 = vrot.slane %v4559_v50, 7 }
  0xb4   : > { %v3974_v58 = vunpack.i.h.bf16 %v3972_v2  ;;  %v3973_v42 = vunpack.i.l.bf16 %v3972_v2  ;;  %3531 = vmatmul.mubr.msk.bf16.gmra.mrb[16].mxu0 %vm856_vm5, %v4770_v3 }
  0xb5   : > { %v760_v31 = vsel %vm736_vm3, %v410_v17, %v3969_v1  ;;  %v759_v53 = vsel %vm736_vm3, %v461_v16, %v3968_v8  ;;  %v419_v2 = vsel %vm374_vm2, %v417_v52, %v6567_v14 }
  0xb6   : > { %v788_v29 = vsel %vm767_vm4, %v757_v59, %v3973_v42  ;;  %v789_v0 = vsel %vm767_vm4, %v758_v7, %v3974_v58  ;;  %v3977_v20 = vpop.permute.xlu1 %3976  ;;  %v6568_v58 = vrot.slane %v4556_v45, 1  ;;  %v6569_v45 = vrot.slane %v4578_v21, 7 }
  0xb7   : > { %v4784_v10 = vpack.c.bf16 %v789_v0, %v788_v29  ;;  %v3982_v35 = vpop.permute.xlu0 %3981  ;;  %v3979_v15 = vunpack.i.h.bf16 %v3977_v20  ;;  %v3978_v57 = vunpack.i.l.bf16 %v3977_v20 }
  0xb8   : > { %v3984_v47 = vunpack.i.h.bf16 %v3982_v35  ;;  %v3983_v22 = vunpack.i.l.bf16 %v3982_v35  ;;  %v464_v9 = vsel %vm374_vm2, %v6568_v58, %v417_v52  ;;  %v821_v29 = vsel %vm374_vm2, %v819_v26, %v6569_v45 }
  0xb9   : > { %3534 = vmatprep.mubr.msk.bf16.mxu0 %vm856_vm5, %v4784_v10  ;;  %v790_v61 = vsel %vm767_vm4, %v759_v53, %v3978_v57  ;;  %v791_v36 = vsel %vm767_vm4, %v760_v31, %v3979_v15 }
  0xba   : > { %v4800_v28 = vpack.c.bf16 %v791_v36, %v790_v61  ;;  %v762_v32 = vsel %vm736_vm3, %v413_v51, %v3984_v47  ;;  %v761_v24 = vsel %vm736_vm3, %v462_v62, %v3983_v22  ;;  %v3987_v63 = vpop.permute.xlu1 %3986  ;;  %v824_v62 = vsel %vm374_vm2, %v6570_v44, %v819_v26 }
  0xbb   : > { %v3992_v27 = vpop.permute.xlu0 %3991  ;;  %v3989_v33 = vunpack.i.h.bf16 %v3987_v63  ;;  %v3988_v39 = vunpack.i.l.bf16 %v3987_v63 }
  0xbc   : > { %v3994_v46 = vunpack.i.h.bf16 %v3992_v27  ;;  %v3993_v34 = vunpack.i.l.bf16 %v3992_v27  ;;  %3535 = vmatmul.mubr.msk.bf16.gmra.mrb[20].mxu0 %vm856_vm5, %v4800_v28  ;;  %v1248_v27 = vsel %vm905_vm0, %v4650_v6, 0 }
  0xbd   : > { %v764_v17 = vsel %vm736_vm3, %v416_v12, %v3989_v33  ;;  %v763_v30 = vsel %vm736_vm3, %v463_v11, %v3988_v39 }
  0xbe   : > { %v792_v48 = vsel %vm767_vm4, %v761_v24, %v3993_v34  ;;  %v793_v23 = vsel %vm767_vm4, %v762_v32, %v3994_v46  ;;  %v3997_v59 = vpop.permute.xlu1 %3996 }
  0xbf   : > { %v4815_v7 = vpack.c.bf16 %v793_v23, %v792_v48  ;;  %v4002_v42 = vpop.permute.xlu0 %4001  ;;  %v3999_v1 = vunpack.i.h.bf16 %v3997_v59  ;;  %v3998_v54 = vunpack.i.l.bf16 %v3997_v59 }
  0xc0   : > { %v4004_v8 = vunpack.i.h.bf16 %v4002_v42  ;;  %v4003_v13 = vunpack.i.l.bf16 %v4002_v42 }
  0xc1   : > { %3538 = vmatprep.mubr.msk.bf16.mxu0 %vm856_vm5, %v4815_v7  ;;  %v794_v50 = vsel %vm767_vm4, %v763_v30, %v3998_v54  ;;  %v795_v16 = vsel %vm767_vm4, %v764_v17, %v3999_v1 }
  0xc2   : > { %v811_v0 = vpack.c.bf16 %v795_v16, %v794_v50  ;;  %v766_v20 = vsel %vm736_vm3, %v419_v2, %v4004_v8  ;;  %v765_v38 = vsel %vm736_vm3, %v464_v9, %v4003_v13  ;;  %v4007_v51 = vpop.permute.xlu1 %4006 }
  0xc3   : > { %v4012_v35 = vpop.permute.xlu0 %4011  ;;  %v4009_v15 = vunpack.i.h.bf16 %v4007_v51  ;;  %v4008_v57 = vunpack.i.l.bf16 %v4007_v51 }
  0xc4   : > { %v4014_v47 = vunpack.i.h.bf16 %v4012_v35  ;;  %v4013_v22 = vunpack.i.l.bf16 %v4012_v35  ;;  %3539 = vmatmul.mubr.msk.bf16.gmra.mrb[24].mxu0 %vm856_vm5, %v811_v0 }
  0xc5   : > { %v797_v21 = vsel %vm767_vm4, %v766_v20, %v4009_v15  ;;  %v796_v31 = vsel %vm767_vm4, %v765_v38, %v4008_v57 }
  0xc6   : > { %v812_v53 = vpack.c.bf16 %v797_v21, %v796_v31  ;;  %v844_v37 = vsel %vm736_vm3, %v821_v29, %v4014_v47  ;;  %v843_v61 = vsel %vm736_vm3, %v824_v62, %v4013_v22  ;;  %v4017_v36 = vpop.permute.xlu1 %4016 }
  0xc7   : > { %v4019_v41 = vunpack.i.h.bf16 %v4017_v36  ;;  %v4018_v52 = vunpack.i.l.bf16 %v4017_v36 }
  0xc8   : > { %3542 = vmatprep.mubr.msk.bf16.mxu0 %vm856_vm5, %v812_v53 }
  0xc9   : > { %v846_v32 = vsel %vm767_vm4, %v844_v37, %v4019_v41  ;;  %v845_v24 = vsel %vm767_vm4, %v843_v61, %v4018_v52 }
  0xca   : > { %v847_v63 = vpack.c.bf16 %v846_v32, %v845_v24 }
  0xcc   : > { %3543 = vmatmul.mubr.msk.bf16.gmra.mrb[28].mxu0 %vm856_vm5, %v847_v63 }
  0xcd   : > { %3548 = vmatprep.mubr.msk.bf16.mxu0 %vm856_vm5, %v4641_v25 }
  0xd4   : > { %3549 = vmatmul.mubr.msk.bf16.vlgmr.msra.gmra.mrb[0].mxu0 %vm856_vm5, %v4633_v55 }
  0xd5   : > { %3581 = vmatpush3.bf16.msra.mxu0 %v1248_v27  ;;  %3552 = vmatprep.mubr.msk.bf16.mxu0 %vm856_vm5, %v4641_v25 }
  0xdc   : > { %3553 = vmatmul.mubr.msk.bf16.gmra.mrb[4].mxu0 %vm856_vm5, %v4662_v19 }
  0xdd   : > { %3556 = vmatprep.mubr.msk.bf16.mxu0 %vm856_vm5, %v4680_v5 }
  0xe4   : > { %3557 = vmatmul.mubr.msk.bf16.gmra.mrb[8].mxu0 %vm856_vm5, %v4694_v40 }
  0xe5   : > { %3560 = vmatprep.mubr.msk.bf16.mxu0 %vm856_vm5, %v4710_v18 }
  0xec   : > { %3561 = vmatmul.mubr.msk.bf16.gmra.mrb[12].mxu0 %vm856_vm5, %v4724_v56 }
  0xed   : > { %3564 = vmatprep.mubr.msk.bf16.mxu0 %vm856_vm5, %v4740_v4 }
  0xf4   : > { %3565 = vmatmul.mubr.msk.bf16.gmra.mrb[16].mxu0 %vm856_vm5, %v4754_v60 }
  0xf5   : > { %3568 = vmatprep.mubr.msk.bf16.mxu0 %vm856_vm5, %v4770_v3 }
  0xfc   : > { %3569 = vmatmul.mubr.msk.bf16.gmra.mrb[20].mxu0 %vm856_vm5, %v4784_v10 }
  0xfd   : > { %3572 = vmatprep.mubr.msk.bf16.mxu0 %vm856_vm5, %v4800_v28 }
 0x104   : > { %3573 = vmatmul.mubr.msk.bf16.gmra.mrb[24].mxu0 %vm856_vm5, %v4815_v7 }
 0x105   : > { %3576 = vmatprep.mubr.msk.bf16.mxu0 %vm856_vm5, %v811_v0 }
 0x10c   : > { %3577 = vmatmul.mubr.msk.bf16.gmra.mrb[28].mxu0 %vm856_vm5, %v812_v53 }
 0x10d   : > { %3582 = vmatprep.mubr.msk.bf16.mxu0 %vm856_vm5, %v4641_v25 }
 0x114   : > { %3583 = vmatmul.mubr.msk.bf16.vlgmr.msra.gmra.mrb[0].mxu0 %vm856_vm5, %v4662_v19 }
 0x115   : > { %3586 = vmatprep.mubr.msk.bf16.mxu0 %vm856_vm5, %v4680_v5 }
 0x11c   : > { %3587 = vmatmul.mubr.msk.bf16.gmra.mrb[4].mxu0 %vm856_vm5, %v4694_v40 }
 0x11d   : > { %3590 = vmatprep.mubr.msk.bf16.mxu0 %vm856_vm5, %v4710_v18 }
 0x124   : > { %3591 = vmatmul.mubr.msk.bf16.gmra.mrb[8].mxu0 %vm856_vm5, %v4724_v56 }
 0x125   : > { %3594 = vmatprep.mubr.msk.bf16.mxu0 %vm856_vm5, %v4740_v4 }
 0x12c   : > { %3595 = vmatmul.mubr.msk.bf16.gmra.mrb[12].mxu0 %vm856_vm5, %v4754_v60 }
 0x12d   : > { %3598 = vmatprep.mubr.msk.bf16.mxu0 %vm856_vm5, %v4770_v3 }
 0x134   : > { %3599 = vmatmul.mubr.msk.bf16.gmra.mrb[16].mxu0 %vm856_vm5, %v4784_v10 }
 0x135   : > { %3602 = vmatprep.mubr.msk.bf16.mxu0 %vm856_vm5, %v4800_v28 }
 0x13c   : > { %3603 = vmatmul.mubr.msk.bf16.gmra.mrb[20].mxu0 %vm856_vm5, %v4815_v7 }
 0x13d   : > { %3606 = vmatprep.mubr.msk.bf16.mxu0 %vm856_vm5, %v811_v0 }
 0x144   : > { %3607 = vmatmul.mubr.msk.bf16.gmra.mrb[24].mxu0 %vm856_vm5, %v812_v53 }
 0x145   : > { %3610 = vmatprep.mubr.msk.bf16.mxu0 %vm856_vm5, %v847_v63 }
 0x14c   : > { %3611 = vmatmul.mubr.msk.bf16.gmra.mrb[28].mxu0 %vm856_vm5, %v812_v53 }
 0x1e7   : > { %v4906_v55 = vpop.f32.mrb[0].mxu0 }
 0x1e8   : > { %v4908_v25 = vpop.f32.mrb[1].mxu0  ;;  %v1446_v56 = vsel %vm736_vm3, %v4906_v55, 0.0 }
 0x1e9   : > { %v4910_v6 = vpop.f32.mrb[2].mxu0  ;;  %v1443_v5 = vsel %vm736_vm3, %v4908_v25, 0.0 }
 0x1ea   : > { %v4912_v19 = vpop.f32.mrb[3].mxu0  ;;  %v1448_v60 = vsel %vm736_vm3, %v4910_v6, 0.0 }
 0x1eb   : > { %v1444_v40 = vsel %vm736_vm3, %v4912_v19, 0.0 }
 0x1ec   : > { %v1445_v18 = vadd.f32 %v1444_v40, %v1443_v5 }
 0x1ee   : > { %v1447_v4 = vadd.f32 %v1446_v56, %v1445_v18 }
 0x1ef   : > { %v4922_v3 = vpop.f32.mrb[4].mxu0 }
 0x1f0   : > { %v4924_v10 = vpop.f32.mrb[5].mxu0  ;;  %v1449_v28 = vadd.f32 %v1448_v60, %v1447_v4  ;;  %v1454_v12 = vsel %vm736_vm3, %v4922_v3, 0.0 }
 0x1f1   : > { %v1450_v46 = vsel %vm736_vm3, %v4924_v10, 0.0  ;;  %v4928_v34 = vpop.f32.mrb[6].mxu0 }
 0x1f2   : > { %v1451_v26 = vadd.f32 %v1450_v46, %v1449_v28  ;;  %v4930_v33 = vpop.f32.mrb[7].mxu0  ;;  %v1456_v11 = vsel %vm736_vm3, %v4928_v34, 0.0 }
 0x1f3   : > { %v1452_v39 = vsel %vm736_vm3, %v4930_v33, 0.0 }
 0x1f4   : > { %v1453_v43 = vadd.f32 %v1452_v39, %v1451_v26 }
 0x1f6   : > { %v1455_v49 = vadd.f32 %v1454_v12, %v1453_v43 }
 0x1f7   : > { %v4938_v48 = vpop.f32.mrb[8].mxu0 }
 0x1f8   : > { %v4940_v23 = vpop.f32.mrb[9].mxu0  ;;  %v1457_v7 = vadd.f32 %v1456_v11, %v1455_v49  ;;  %v1462_v1 = vsel %vm736_vm3, %v4938_v48, 0.0 }
 0x1f9   : > { %v1458_v59 = vsel %vm736_vm3, %v4940_v23, 0.0  ;;  %v4944_v14 = vpop.f32.mrb[10].mxu0 }
 0x1fa   : > { %v1459_v2 = vadd.f32 %v1458_v59, %v1457_v7  ;;  %v4946_v58 = vpop.f32.mrb[11].mxu0  ;;  %v1464_v8 = vsel %vm736_vm3, %v4944_v14, 0.0 }
 0x1fb   : > { %v1460_v9 = vsel %vm736_vm3, %v4946_v58, 0.0 }
 0x1fc   : > { %v1461_v42 = vadd.f32 %v1460_v9, %v1459_v2 }
 0x1fe   : > { %v1463_v54 = vadd.f32 %v1462_v1, %v1461_v42 }
 0x1ff   : > { %v4954_v13 = vpop.f32.mrb[12].mxu0 }
 0x200   : > { %v4956_v17 = vpop.f32.mrb[13].mxu0  ;;  %v1465_v30 = vadd.f32 %v1464_v8, %v1463_v54  ;;  %v1470_v38 = vsel %vm736_vm3, %v4954_v13, 0.0 }
 0x201   : > { %v1466_v50 = vsel %vm736_vm3, %v4956_v17, 0.0  ;;  %v4960_v16 = vpop.f32.mrb[14].mxu0 }
 0x202   : > { %v1467_v45 = vadd.f32 %v1466_v50, %v1465_v30  ;;  %v4962_v29 = vpop.f32.mrb[15].mxu0  ;;  %v1472_v44 = vsel %vm736_vm3, %v4960_v16, 0.0 }
 0x203   : > { %v1468_v0 = vsel %vm736_vm3, %v4962_v29, 0.0 }
 0x204   : > { %v1469_v20 = vadd.f32 %v1468_v0, %v1467_v45 }
 0x206   : > { %v1471_v51 = vadd.f32 %v1470_v38, %v1469_v20 }
 0x207   : > { %v4970_v62 = vpop.f32.mrb[16].mxu0 }
 0x208   : > { %v4972_v35 = vpop.f32.mrb[17].mxu0  ;;  %v1473_v15 = vadd.f32 %v1472_v44, %v1471_v51  ;;  %v1478_v37 = vsel %vm736_vm3, %v4970_v62, 0.0 }
 0x209   : > { %v1474_v57 = vsel %vm736_vm3, %v4972_v35, 0.0  ;;  %v4976_v47 = vpop.f32.mrb[18].mxu0 }
 0x20a   : > { %v1475_v22 = vadd.f32 %v1474_v57, %v1473_v15  ;;  %v4978_v21 = vpop.f32.mrb[19].mxu0  ;;  %v1480_v36 = vsel %vm736_vm3, %v4976_v47, 0.0 }
 0x20b   : > { %v1476_v31 = vsel %vm736_vm3, %v4978_v21, 0.0 }
 0x20c   : > { %v1477_v53 = vadd.f32 %v1476_v31, %v1475_v22 }
 0x20e   : > { %v1479_v61 = vadd.f32 %v1478_v37, %v1477_v53 }
 0x20f   : > { %v4986_v41 = vpop.f32.mrb[20].mxu0 }
 0x210   : > { %v4988_v52 = vpop.f32.mrb[21].mxu0  ;;  %v1481_v32 = vadd.f32 %v1480_v36, %v1479_v61  ;;  %v1486_v56 = vsel %vm736_vm3, %v4986_v41, 0.0 }
 0x211   : > { %v1482_v24 = vsel %vm736_vm3, %v4988_v52, 0.0  ;;  %v4992_v63 = vpop.f32.mrb[22].mxu0 }
 0x212   : > { %v1483_v27 = vadd.f32 %v1482_v24, %v1481_v32  ;;  %v1367_v5 = vpop.f32.mrb[23].mxu0  ;;  %v1488_v60 = vsel %vm736_vm3, %v4992_v63, 0.0 }
 0x213   : > { %v1484_v40 = vsel %vm736_vm3, %v1367_v5, 0.0 }
 0x214   : > { %v1485_v18 = vadd.f32 %v1484_v40, %v1483_v27 }
 0x216   : > { %v1487_v4 = vadd.f32 %v1486_v56, %v1485_v18 }
 0x217   : > { %v3608_v28 = vpop.f32.mrb[24].mxu0 }
 0x218   : > { %v1380_v46 = vpop.f32.mrb[25].mxu0  ;;  %v1489_v26 = vadd.f32 %v1488_v60, %v1487_v4  ;;  %v1494_v59 = vsel %vm736_vm3, %v3608_v28, 0.0 }
 0x219   : > { %v1490_v39 = vsel %vm736_vm3, %v1380_v46, 0.0  ;;  %v3609_v43 = vpop.f32.mrb[26].mxu0 }
 0x21a   : > { %v1491_v12 = vadd.f32 %v1490_v39, %v1489_v26  ;;  %v1383_v49 = vpop.f32.mrb[27].mxu0  ;;  %v1496_v9 = vsel %vm736_vm3, %v3609_v43, 0.0 }
 0x21b   : > { %v1492_v11 = vsel %vm736_vm3, %v1383_v49, 0.0 }
 0x21c   : > { %v1493_v7 = vadd.f32 %v1492_v11, %v1491_v12 }
 0x21e   : > { %v1495_v2 = vadd.f32 %v1494_v59, %v1493_v7 }
 0x21f   : > { %v3612_v42 = vpop.f32.mrb[28].mxu0 }
 0x220   : > { %v1396_v1 = vpop.f32.mrb[29].mxu0  ;;  %v1497_v54 = vadd.f32 %v1496_v9, %v1495_v2  ;;  %v1502_v38 = vsel %vm736_vm3, %v3612_v42, 0.0 }
 0x221   : > { %v1498_v8 = vsel %vm736_vm3, %v1396_v1, 0.0  ;;  %v3613_v30 = vpop.f32.mrb[30].mxu0 }
 0x222   : > { %v1499_v50 = vadd.f32 %v1498_v8, %v1497_v54  ;;  %v1399_v45 = vpop.f32.mrb[31].mxu0  ;;  %v1504_v44 = vsel %vm736_vm3, %v3613_v30, 0.0 }
 0x223   : > { %v1500_v0 = vsel %vm736_vm3, %v1399_v45, 0.0 }
 0x224   : > { %v1501_v20 = vadd.f32 %v1500_v0, %v1499_v50 }
 0x226   : > { %v1503_v51 = vadd.f32 %v1502_v38, %v1501_v20 }
 0x228   : > { %v1505_v15 = vadd.f32 %v1504_v44, %v1503_v51 }
 0x22a   : > { %v1506_v57 = vrot.slane %v1505_v15, 4 }
 0x22c   : > { %v1507_v22 = vadd.f32 %v1506_v57, %v1505_v15 }
 0x22e   : > { %v1508_v31 = vrot.slane %v1507_v22, 2 }
 0x230   : > { %v1509_v53 = vadd.f32 %v1508_v31, %v1507_v22 }
 0x232   : > { %v1510_v37 = vrot.slane %v1509_v53, 1 }
 0x234   : > { %v1511_v61 = vadd.f32 %v1510_v37, %v1509_v53 }
 0x236   : > { %v1512_v36 = vmul.f32 0.00390625, %v1511_v61 }
 0x238   : > { %v5008_v32 = vsub.f32 %v4908_v25, %v1512_v36  ;;  %v5011_v24 = vsub.f32 %v4912_v19, %v1512_v36  ;;  %v5014_v27 = vsub.f32 %v4906_v55, %v1512_v36  ;;  %v5017_v40 = vsub.f32 %v4910_v6, %v1512_v36 }
 0x239   : > { %v5020_v18 = vsub.f32 %v4924_v10, %v1512_v36  ;;  %v5023_v56 = vsub.f32 %v4930_v33, %v1512_v36  ;;  %v5026_v4 = vsub.f32 %v4922_v3, %v1512_v36  ;;  %v5029_v25 = vsub.f32 %v4928_v34, %v1512_v36 }
 0x23a   : > { %v5032_v19 = vsub.f32 %v4940_v23, %v1512_v36  ;;  %v5035_v55 = vsub.f32 %v4946_v58, %v1512_v36  ;;  %v5038_v6 = vsub.f32 %v4938_v48, %v1512_v36  ;;  %v5041_v10 = vsub.f32 %v4944_v14, %v1512_v36 }
 0x23b   : > { %v5044_v33 = vsub.f32 %v4956_v17, %v1512_v36  ;;  %v5047_v3 = vsub.f32 %v4962_v29, %v1512_v36  ;;  %v5050_v34 = vsub.f32 %v4954_v13, %v1512_v36  ;;  %v5053_v23 = vsub.f32 %v4960_v16, %v1512_v36 }
 0x23c   : > { %v5056_v58 = vsub.f32 %v4972_v35, %v1512_v36  ;;  %v5059_v48 = vsub.f32 %v4978_v21, %v1512_v36  ;;  %v5062_v14 = vsub.f32 %v4970_v62, %v1512_v36  ;;  %v5065_v17 = vsub.f32 %v4976_v47, %v1512_v36 }
 0x23d   : > { %v5068_v29 = vsub.f32 %v4988_v52, %v1512_v36  ;;  %v5070_v13 = vsub.f32 %v1367_v5, %v1512_v36  ;;  %v5073_v16 = vsub.f32 %v4986_v41, %v1512_v36  ;;  %v5076_v35 = vsub.f32 %v4992_v63, %v1512_v36 }
 0x23e   : > { %v5078_v60 = vsub.f32 %v1380_v46, %v1512_v36  ;;  %v5080_v21 = vsub.f32 %v1383_v49, %v1512_v36  ;;  %v5082_v62 = vsub.f32 %v3608_v28, %v1512_v36  ;;  %v5084_v26 = vsub.f32 %v3609_v43, %v1512_v36 }
 0x23f   : > { %v5086_v47 = vsub.f32 %v1396_v1, %v1512_v36  ;;  %v5088_v52 = vsub.f32 %v1399_v45, %v1512_v36  ;;  %v5090_v5 = vsub.f32 %v3612_v42, %v1512_v36  ;;  %v5092_v39 = vsub.f32 %v3613_v30, %v1512_v36 }
 0x240   : > { %v1545_v41 = vmul.f32 %v5008_v32, %v5008_v32  ;;  %v1546_v63 = vmul.f32 %v5011_v24, %v5011_v24  ;;  %v1547_v28 = vmul.f32 %v5014_v27, %v5014_v27  ;;  %v1548_v46 = vmul.f32 %v5017_v40, %v5017_v40 }
 0x241   : > { %v1549_v11 = vmul.f32 %v5020_v18, %v5020_v18  ;;  %v1550_v2 = vmul.f32 %v5023_v56, %v5023_v56  ;;  %v1551_v1 = vmul.f32 %v5026_v4, %v5026_v4  ;;  %v1552_v30 = vmul.f32 %v5029_v25, %v5029_v25 }
 0x242   : > { %v1577_v43 = vsel %vm736_vm3, %v1545_v41, 0.0  ;;  %v1578_v12 = vsel %vm736_vm3, %v1546_v63, 0.0  ;;  %v1580_v7 = vsel %vm736_vm3, %v1547_v28, 0.0  ;;  %v1582_v9 = vsel %vm736_vm3, %v1548_v46, 0.0 }
 0x243   : > { %v1579_v49 = vadd.f32 %v1578_v12, %v1577_v43  ;;  %v1584_v54 = vsel %vm736_vm3, %v1549_v11, 0.0  ;;  %v1586_v50 = vsel %vm736_vm3, %v1550_v2, 0.0  ;;  %v1553_v0 = vmul.f32 %v5032_v19, %v5032_v19 }
 0x244   : > { %v1588_v20 = vsel %vm736_vm3, %v1551_v1, 0.0  ;;  %v1554_v51 = vmul.f32 %v5035_v55, %v5035_v55  ;;  %v1590_v44 = vsel %vm736_vm3, %v1552_v30, 0.0  ;;  %v1555_v57 = vmul.f32 %v5038_v6, %v5038_v6 }
 0x245   : > { %v1581_v59 = vadd.f32 %v1580_v7, %v1579_v49  ;;  %v1592_v22 = vsel %vm736_vm3, %v1553_v0, 0.0  ;;  %v1556_v53 = vmul.f32 %v5041_v10, %v5041_v10  ;;  %v1557_v36 = vmul.f32 %v5044_v33, %v5044_v33 }
 0x246   : > { %v1594_v37 = vsel %vm736_vm3, %v1554_v51, 0.0  ;;  %v1596_v41 = vsel %vm736_vm3, %v1555_v57, 0.0  ;;  %v1558_v28 = vmul.f32 %v5047_v3, %v5047_v3  ;;  %v1559_v12 = vmul.f32 %v5050_v34, %v5050_v34 }
 0x247   : > { %v1583_v42 = vadd.f32 %v1582_v9, %v1581_v59  ;;  %v1598_v46 = vsel %vm736_vm3, %v1556_v53, 0.0  ;;  %v1600_v49 = vsel %vm736_vm3, %v1557_v36, 0.0  ;;  %v1560_v7 = vmul.f32 %v5053_v23, %v5053_v23 }
 0x248   : > { %v1602_v59 = vsel %vm736_vm3, %v1558_v28, 0.0  ;;  %v1561_v9 = vmul.f32 %v5056_v58, %v5056_v58 }
 0x249   : > { %v1585_v8 = vadd.f32 %v1584_v54, %v1583_v42  ;;  %v1604_v42 = vsel %vm736_vm3, %v1559_v12, 0.0  ;;  %v1562_v54 = vmul.f32 %v5059_v48, %v5059_v48 }
 0x24b   : > { %v1587_v45 = vadd.f32 %v1586_v50, %v1585_v8  ;;  %v1606_v8 = vsel %vm736_vm3, %v1560_v7, 0.0  ;;  %v1563_v50 = vmul.f32 %v5062_v14, %v5062_v14 }
 0x24d   : > { %v1589_v38 = vadd.f32 %v1588_v20, %v1587_v45  ;;  %v1608_v45 = vsel %vm736_vm3, %v1561_v9, 0.0  ;;  %v1564_v20 = vmul.f32 %v5065_v17, %v5065_v17 }
 0x24f   : > { %v1591_v15 = vadd.f32 %v1590_v44, %v1589_v38  ;;  %v1610_v38 = vsel %vm736_vm3, %v1562_v54, 0.0  ;;  %v1565_v44 = vmul.f32 %v5068_v29, %v5068_v29 }
 0x251   : > { %v1593_v31 = vadd.f32 %v1592_v22, %v1591_v15  ;;  %v1612_v15 = vsel %vm736_vm3, %v1563_v50, 0.0  ;;  %v1566_v22 = vmul.f32 %v5070_v13, %v5070_v13 }
 0x253   : > { %v1595_v61 = vadd.f32 %v1594_v37, %v1593_v31  ;;  %v1614_v31 = vsel %vm736_vm3, %v1564_v20, 0.0  ;;  %v1567_v37 = vmul.f32 %v5073_v16, %v5073_v16 }
 0x255   : > { %v1597_v63 = vadd.f32 %v1596_v41, %v1595_v61  ;;  %v1616_v61 = vsel %vm736_vm3, %v1565_v44, 0.0  ;;  %v1568_v41 = vmul.f32 %v5076_v35, %v5076_v35 }
 0x257   : > { %v1599_v43 = vadd.f32 %v1598_v46, %v1597_v63  ;;  %v1618_v63 = vsel %vm736_vm3, %v1566_v22, 0.0  ;;  %v1569_v46 = vmul.f32 %v5078_v60, %v5078_v60 }
 0x259   : > { %v1601_v11 = vadd.f32 %v1600_v49, %v1599_v43  ;;  %v1620_v43 = vsel %vm736_vm3, %v1567_v37, 0.0  ;;  %v1570_v49 = vmul.f32 %v5080_v21, %v5080_v21 }
 0x25b   : > { %v1603_v2 = vadd.f32 %v1602_v59, %v1601_v11  ;;  %v1622_v11 = vsel %vm736_vm3, %v1568_v41, 0.0  ;;  %v1571_v59 = vmul.f32 %v5082_v62, %v5082_v62 }
 0x25d   : > { %v1605_v1 = vadd.f32 %v1604_v42, %v1603_v2  ;;  %v1624_v2 = vsel %vm736_vm3, %v1569_v46, 0.0  ;;  %v1572_v42 = vmul.f32 %v5084_v26, %v5084_v26 }
 0x25f   : > { %v1607_v30 = vadd.f32 %v1606_v8, %v1605_v1  ;;  %v1626_v1 = vsel %vm736_vm3, %v1570_v49, 0.0  ;;  %v1573_v8 = vmul.f32 %v5086_v47, %v5086_v47 }
 0x261   : > { %v1609_v0 = vadd.f32 %v1608_v45, %v1607_v30  ;;  %v1628_v30 = vsel %vm736_vm3, %v1571_v59, 0.0  ;;  %v1574_v45 = vmul.f32 %v5088_v52, %v5088_v52  ;;  %v312_v59 = vld [vmem:[%s6520_s2] sm:$0x1] }
 0x263   : > { %v1611_v51 = vadd.f32 %v1610_v38, %v1609_v0  ;;  %v1630_v0 = vsel %vm736_vm3, %v1572_v42, 0.0  ;;  %v1575_v38 = vmul.f32 %v5090_v5, %v5090_v5 }
 0x265   : > { %v1613_v57 = vadd.f32 %v1612_v15, %v1611_v51  ;;  %v1632_v51 = vsel %vm736_vm3, %v1573_v8, 0.0  ;;  %v1576_v15 = vmul.f32 %v5092_v39, %v5092_v39 }
 0x267   : > { %v1615_v53 = vadd.f32 %v1614_v31, %v1613_v57  ;;  %v1634_v57 = vsel %vm736_vm3, %v1574_v45, 0.0  ;;  %v1636_v31 = vsel %vm736_vm3, %v1575_v38, 0.0  ;;  %v1638_v37 = vsel %vm736_vm3, %v1576_v15, 0.0 }
 0x269   : > { %v1617_v36 = vadd.f32 %v1616_v61, %v1615_v53 }
 0x26b   : > { %v1619_v28 = vadd.f32 %v1618_v63, %v1617_v36 }
 0x26d   : > { %v1621_v12 = vadd.f32 %v1620_v43, %v1619_v28 }
 0x26f   : > { %v1623_v7 = vadd.f32 %v1622_v11, %v1621_v12  ;;  %v1651_v11 = vlaneseq }
 0x271   : > { %v1625_v9 = vadd.f32 %v1624_v2, %v1623_v7  ;;  %v5190_v7 = vshrl.u32 %v1651_v11, 7 }
 0x273   : > { %v1627_v54 = vadd.f32 %v1626_v1, %v1625_v9  ;;  %6571 = vst [vmem:[#allocation2_spill] sm:$0xff] %v5190_v7  ;;  %v6540_v2 = vsub.s32 0, %v5190_v7 }
 0x275   : > { %v1629_v50 = vadd.f32 %v1628_v30, %v1627_v54  ;;  %v5201_v54 = vld [vmem:[%s6521_s3] ss:$0 sm:$0xff] }
 0x277   : > { %v1631_v20 = vadd.f32 %v1630_v0, %v1629_v50 }
 0x279   : > { %v1633_v44 = vadd.f32 %v1632_v51, %v1631_v20 }
 0x27b   : > { %v1635_v22 = vadd.f32 %v1634_v57, %v1633_v44 }
 0x27d   : > { %v1637_v53 = vadd.f32 %v1636_v31, %v1635_v22 }
 0x27f   : > { %v1639_v61 = vadd.f32 %v1638_v37, %v1637_v53 }
 0x281   : > { %v1640_v36 = vrot.slane %v1639_v61, 4 }
 0x283   : > { %v1641_v41 = vadd.f32 %v1640_v36, %v1639_v61 }
 0x285   : > { %v1642_v63 = vrot.slane %v1641_v41, 2 }
 0x287   : > { %v1643_v28 = vadd.f32 %v1642_v63, %v1641_v41 }
 0x289   : > { %v1644_v46 = vrot.slane %v1643_v28, 1 }
 0x28b   : > { %v1645_v43 = vadd.f32 %v1644_v46, %v1643_v28 }
 0x28d   : > { %v1646_v12 = vmul.f32 0.00390625, %v1645_v43 }
 0x28f   : > { %v1647_v49 = vadd.f32 1e-05, %v1646_v12 }
 0x291   : > { %4186 = vrsqrt.f32 %v1647_v49 }
 0x29b   : > { %v4187_v9 = vpop.eup %4186 }
 0x29c   : > { %v1649_v42 = vmul.f32 %v4187_v9, %v312_v59 }
 0x29e   : > { %v1654_v1 = vrot.slane %v1649_v42, %v6540_v2 }
 0x2a0   : > { %v1685_v8 = vmul.f32 %v1654_v1, %v5088_v52  ;;  %v1658_v50 = vmul.f32 %v1654_v1, %v5014_v27  ;;  %v1659_v45 = vmul.f32 %v1654_v1, %v5017_v40  ;;  %v1656_v0 = vmul.f32 %v1654_v1, %v5008_v32 }
 0x2a1   : > { %v1657_v20 = vmul.f32 %v1654_v1, %v5011_v24  ;;  %v1660_v38 = vmul.f32 %v1654_v1, %v5020_v18  ;;  %v1661_v51 = vmul.f32 %v1654_v1, %v5023_v56  ;;  %v1662_v44 = vmul.f32 %v1654_v1, %v5026_v4 }
 0x2a2   : > { %v1723_v30 = vadd.f32 %v5201_v54, %v1685_v8  ;;  %v1663_v15 = vmul.f32 %v1654_v1, %v5029_v25  ;;  %v1664_v52 = vmul.f32 %v1654_v1, %v5032_v19  ;;  %v1665_v57 = vmul.f32 %v1654_v1, %v5035_v55 }
 0x2a3   : > { %v1666_v27 = vmul.f32 %v1654_v1, %v5038_v6  ;;  %v1667_v40 = vmul.f32 %v1654_v1, %v5041_v10  ;;  %v1668_v32 = vmul.f32 %v1654_v1, %v5044_v33  ;;  %v1669_v24 = vmul.f32 %v1654_v1, %v5047_v3 }
 0x2a4   : > { %v5219_v22 = vmax.f32 %v1723_v30, 0.0  ;;  %v1670_v18 = vmul.f32 %v1654_v1, %v5050_v34  ;;  %v1696_v56 = vadd.f32 %v5201_v54, %v1658_v50  ;;  %v1697_v4 = vadd.f32 %v5201_v54, %v1659_v45 }
 0x2a5   : > { %v1671_v25 = vmul.f32 %v1654_v1, %v5053_v23  ;;  %v1672_v19 = vmul.f32 %v1654_v1, %v5056_v58  ;;  %v1673_v55 = vmul.f32 %v1654_v1, %v5059_v48  ;;  %v1674_v6 = vmul.f32 %v1654_v1, %v5062_v14 }
 0x2a6   : > { %v1675_v10 = vmul.f32 %v1654_v1, %v5065_v17  ;;  %v1676_v33 = vmul.f32 %v1654_v1, %v5068_v29  ;;  %v5230_v3 = vmax.f32 %v1696_v56, 0.0  ;;  %v5232_v31 = vmax.f32 %v1697_v4, 0.0 }
 0x2a7   : > { %v1677_v34 = vmul.f32 %v1654_v1, %v5070_v13  ;;  %v1678_v53 = vmul.f32 %v1654_v1, %v5073_v16  ;;  %v1680_v23 = vmul.f32 %v1654_v1, %v5078_v60  ;;  %v1681_v58 = vmul.f32 %v1654_v1, %v5080_v21 }
 0x2a8   : > { %v1684_v48 = vmul.f32 %v1654_v1, %v5086_v47  ;;  %v1686_v14 = vmul.f32 %v1654_v1, %v5090_v5  ;;  %v1687_v17 = vmul.f32 %v1654_v1, %v5092_v39  ;;  %v4025_v29 = vpack.i.bf16 %v5232_v31, %v5230_v3 }
 0x2a9   : > { %v1679_v37 = vmul.f32 %v1654_v1, %v5076_v35  ;;  %v1682_v61 = vmul.f32 %v1654_v1, %v5082_v62  ;;  %v1694_v13 = vadd.f32 %v5201_v54, %v1656_v0  ;;  %v1695_v16 = vadd.f32 %v5201_v54, %v1657_v20 }
 0x2aa   : > { %v1683_v60 = vmul.f32 %v1654_v1, %v5084_v26  ;;  %4026 = vrot.lane.b32.xlu1 %v4025_v29, %s4230_s9  ;;  %v1698_v21 = vadd.f32 %v5201_v54, %v1660_v38  ;;  %v1699_v47 = vadd.f32 %v5201_v54, %v1661_v51  ;;  %v1700_v5 = vadd.f32 %v5201_v54, %v1662_v44 }
 0x2ab   : > { %v1701_v39 = vadd.f32 %v5201_v54, %v1663_v15  ;;  %v1702_v35 = vadd.f32 %v5201_v54, %v1664_v52  ;;  %v1718_v62 = vadd.f32 %v5201_v54, %v1680_v23  ;;  %v1719_v36 = vadd.f32 %v5201_v54, %v1681_v58 }
 0x2ac   : > { %v1703_v41 = vadd.f32 %v5201_v54, %v1665_v57  ;;  %v1722_v26 = vadd.f32 %v5201_v54, %v1684_v48  ;;  %v1724_v63 = vadd.f32 %v5201_v54, %v1686_v14  ;;  %v1725_v28 = vadd.f32 %v5201_v54, %v1687_v17 }
 0x2ad   : > { %v1704_v46 = vadd.f32 %v5201_v54, %v1666_v27  ;;  %v1705_v43 = vadd.f32 %v5201_v54, %v1667_v40  ;;  %v5262_v12 = vmax.f32 %v1694_v13, 0.0  ;;  %v5264_v49 = vmax.f32 %v1695_v16, 0.0 }
 0x2ae   : > { %v1706_v11 = vadd.f32 %v5201_v54, %v1668_v32  ;;  %v1707_v59 = vadd.f32 %v5201_v54, %v1669_v24  ;;  %v1708_v9 = vadd.f32 %v5201_v54, %v1670_v18  ;;  %v1709_v42 = vadd.f32 %v5201_v54, %v1671_v25  ;;  %v5295_v24 = vld [vmem:[%s6522_s4 + $0x8] sm:$0x3f]  }
 0x2af   : > { %v1710_v1 = vadd.f32 %v5201_v54, %v1672_v19  ;;  %v1711_v8 = vadd.f32 %v5201_v54, %v1673_v55  ;;  %v1712_v30 = vadd.f32 %v5201_v54, %v1674_v6  ;;  %v4020_v50 = vpack.i.bf16 %v5264_v49, %v5262_v12  ;;  %3847 = vmatprep.subr.msk.bf16.mxu1 %vm905_vm0, %v5295_v24 }
 0x2b0   : > { %v1713_v45 = vadd.f32 %v5201_v54, %v1675_v10  ;;  %v1714_v0 = vadd.f32 %v5201_v54, %v1676_v33  ;;  %v1715_v20 = vadd.f32 %v5201_v54, %v1677_v34  ;;  %v1716_v38 = vadd.f32 %v5201_v54, %v1678_v53 }
 0x2b1   : > { %v1717_v51 = vadd.f32 %v5201_v54, %v1679_v37  ;;  %v1720_v44 = vadd.f32 %v5201_v54, %v1682_v61  ;;  %v1721_v15 = vadd.f32 %v5201_v54, %v1683_v60  ;;  %v1820_v52 = vrot.slane %v5230_v3, 7  ;;  %4021 = vrot.lane.b32.xlu0 %v4020_v50, %s4230_s9 }
 0x2b2   : > { %v5284_v57 = vmax.f32 %v1698_v21, 0.0  ;;  %v5286_v27 = vmax.f32 %v1699_v47, 0.0  ;;  %v5288_v40 = vmax.f32 %v1700_v5, 0.0  ;;  %v5290_v32 = vmax.f32 %v1701_v39, 0.0 }
 0x2b3   : > { %v5297_v18 = vmax.f32 %v1702_v35, 0.0  ;;  %v5299_v54 = vmax.f32 %v1703_v41, 0.0  ;;  %v5301_v56 = vmax.f32 %v1704_v46, 0.0  ;;  %v5303_v4 = vmax.f32 %v1705_v43, 0.0 }
 0x2b4   : > { %v5305_v25 = vmax.f32 %v1706_v11, 0.0  ;;  %v5307_v19 = vmax.f32 %v1707_v59, 0.0  ;;  %v5309_v55 = vmax.f32 %v1708_v9, 0.0  ;;  %v5311_v6 = vmax.f32 %v1709_v42, 0.0 }
 0x2b5   : > { %v5315_v10 = vmax.f32 %v1710_v1, 0.0  ;;  %v1775_v33 = vrot.slane %v5230_v3, 1  ;;  %v1821_v34 = vrot.slane %v5232_v31, 7  ;;  %v1910_v53 = vrot.slane %v5232_v31, 1 }
 0x2b6   : > { %v5320_v23 = vmax.f32 %v1711_v8, 0.0  ;;  %v5322_v58 = vmax.f32 %v1712_v30, 0.0  ;;  %v5324_v48 = vmax.f32 %v1713_v45, 0.0  ;;  %v5326_v14 = vmax.f32 %v1714_v0, 0.0 }
 0x2b7   : > { %v5328_v17 = vmax.f32 %v1715_v20, 0.0  ;;  %v5330_v29 = vmax.f32 %v1716_v38, 0.0  ;;  %v1911_v37 = vsel %vm465_vm1, %v1775_v33, %v1910_v53  ;;  %v1970_v61 = vsel %vm465_vm1, %v1910_v53, %v1821_v34 }
 0x2b8   : > { %v5338_v13 = vmax.f32 %v1717_v51, 0.0  ;;  %v5340_v16 = vmax.f32 %v1718_v62, 0.0  ;;  %v5342_v60 = vmax.f32 %v1719_v36, 0.0  ;;  %v4040_v21 = vpack.i.bf16 %v1970_v61, %v1911_v37 }
 0x2b9   : > { %v5344_v47 = vmax.f32 %v1720_v44, 0.0  ;;  %v5346_v5 = vmax.f32 %v1721_v15, 0.0  ;;  %v5348_v39 = vmax.f32 %v1722_v26, 0.0  ;;  %v5350_v35 = vmax.f32 %v1724_v63, 0.0 }
 0x2ba   : > { %v5352_v41 = vmax.f32 %v1725_v28, 0.0  ;;  %4041 = vrot.lane.b32.xlu1 %v4040_v21, %s4231_s10  ;;  %v6541_v46 = vrot.slane %v5262_v12, 1  ;;  %v6544_v62 = vrot.slane %v5264_v49, 7  ;;  %v1912_v36 = vrot.slane %v5264_v49, 1 }
 0x2bb   : > { %v1778_v11 = vrot.slane %v5288_v40, 1  ;;  %v1830_v59 = vrot.slane %v5290_v32, 7  ;;  %v1916_v26 = vrot.slane %v5290_v32, 1  ;;  %v4045_v9 = vpack.i.bf16 %v5290_v32, %v5288_v40 }
 0x2bc   : > { %v1913_v63 = vsel %vm465_vm1, %v6541_v46, %v1912_v36  ;;  %v1971_v28 = vsel %vm465_vm1, %v1912_v36, %v6544_v62  ;;  %v6545_v42 = vrot.slane %v5284_v57, 1  ;;  %v1914_v50 = vrot.slane %v5286_v27, 1 }
 0x2bd   : > { %v4030_v1 = vpack.i.bf16 %v1971_v28, %v1913_v63  ;;  %v1917_v8 = vsel %vm465_vm1, %v1778_v11, %v1916_v26  ;;  %v1973_v30 = vsel %vm465_vm1, %v1916_v26, %v1830_v59  ;;  %v1829_v0 = vrot.slane %v5288_v40, 7 }
 0x2be   : > { %4046 = vrot.lane.b32.xlu1 %v4045_v9, %s4230_s9  ;;  %v1827_v38 = vrot.slane %v5286_v27, 7  ;;  %v6542_v44 = vrot.slane %v5301_v56, 1  ;;  %v6543_v15 = vrot.slane %v5303_v4, 7  ;;  %v1920_v53 = vrot.slane %v5303_v4, 1 }
 0x2bf   : > { %4031 = vrot.lane.b32.xlu0 %v4030_v1, %s4231_s10  ;;  %v4060_v36 = vpack.i.bf16 %v1973_v30, %v1917_v8  ;;  %v4035_v63 = vpack.i.bf16 %v5286_v27, %v5284_v57  ;;  %v1915_v28 = vsel %vm465_vm1, %v6545_v42, %v1914_v50  ;;  %v4065_v9 = vpack.i.bf16 %v5303_v4, %v5301_v56 }
 0x2c0   : > { %v1972_v1 = vsel %vm465_vm1, %v1914_v50, %v1827_v38  ;;  %v6555_v8 = vrot.slane %v5297_v18, 1  ;;  %v1833_v30 = vrot.slane %v5299_v54, 7  ;;  %v1918_v2 = vrot.slane %v5299_v54, 1 }
 0x2c1   : > { %v1921_v21 = vsel %vm465_vm1, %v6542_v44, %v1920_v53  ;;  %v6549_v26 = vrot.slane %v5309_v55, 1  ;;  %v1924_v50 = vrot.slane %v5311_v6, 1  ;;  %v6554_v37 = vrot.slane %v5311_v6, 7 }
 0x2c2   : > { %4061 = vrot.lane.b32.xlu1 %v4060_v36, %s4231_s10  ;;  %v1975_v36 = vsel %vm465_vm1, %v1920_v53, %v6543_v15  ;;  %v6546_v61 = vrot.slane %v5305_v25, 1  ;;  %v6547_v20 = vrot.slane %v5307_v19, 7  ;;  %v4050_v46 = vpack.i.bf16 %v1972_v1, %v1915_v28 }
 0x2c3   : > { %4036 = vrot.lane.b32.xlu0 %v4035_v63, %s4230_s9  ;;  %v1922_v63 = vrot.slane %v5307_v19, 1  ;;  %v6548_v44 = vrot.slane %v5322_v58, 1  ;;  %v6550_v43 = vrot.slane %v5324_v48, 7  ;;  %v4055_v62 = vpack.i.bf16 %v5299_v54, %v5297_v18 }
 0x2c4   : > { %v1928_v42 = vrot.slane %v5324_v48, 1  ;;  %v4080_v45 = vpack.i.bf16 %v1975_v36, %v1921_v21  ;;  %v1919_v28 = vsel %vm465_vm1, %v6555_v8, %v1918_v2  ;;  %v1974_v1 = vsel %vm465_vm1, %v1918_v2, %v1833_v30 }
 0x2c5   : > { %v1977_v15 = vsel %vm465_vm1, %v1924_v50, %v6554_v37  ;;  %v5449_v21 = vsel %vm465_vm1, %v1922_v63, %v6547_v20  ;;  %v6551_v2 = vrot.slane %v5315_v10, 1  ;;  %v6552_v51 = vrot.slane %v5320_v23, 7 }
 0x2c6   : > { %4066 = vrot.lane.b32.xlu1 %v4065_v9, %s4230_s9  ;;  %v1925_v9 = vsel %vm465_vm1, %v6549_v26, %v1924_v50  ;;  %v5455_v36 = vsel %vm465_vm1, %v6548_v44, %v1928_v42  ;;  %v5460_v50 = vsel %vm465_vm1, %v1928_v42, %v6550_v43  ;;  %v1926_v53 = vrot.slane %v5320_v23, 1 }
 0x2c7   : > { %4051 = vrot.lane.b32.xlu0 %v4050_v46, %s4231_s10  ;;  %v5444_v46 = vsel %vm465_vm1, %v6546_v61, %v1922_v63  ;;  %v4085_v44 = vpack.i.bf16 %v5311_v6, %v5309_v55  ;;  %v4070_v26 = vpack.i.bf16 %v1974_v1, %v1919_v28  ;;  %v4075_v42 = vpack.i.bf16 %v5307_v19, %v5305_v25 }
 0x2c8   : > { %v4105_v43 = vpack.i.bf16 %v5324_v48, %v5322_v58  ;;  %v4100_v63 = vpack.i.bf16 %v1977_v15, %v1925_v9  ;;  %v4090_v20 = vpack.i.bf16 %v5449_v21, %v5444_v46  ;;  %v5486_v28 = vsel %vm465_vm1, %v6551_v2, %v1926_v53 }
 0x2c9   : > { %v5491_v1 = vsel %vm465_vm1, %v1926_v53, %v6552_v51  ;;  %v6553_v21 = vrot.slane %v5340_v16, 1  ;;  %v1857_v61 = vrot.slane %v5342_v60, 7  ;;  %v1789_v15 = vrot.slane %v5348_v39, 1 }
 0x2ca   : > { %4081 = vrot.lane.b32.xlu1 %v4080_v45, %s4231_s10  ;;  %v1934_v45 = vrot.slane %v5342_v60, 1  ;;  %v1863_v9 = vrot.slane %v5219_v22, 7  ;;  %v2258_v51 = vrot.slane %v5350_v35, 1  ;;  %v5573_v3 = vsel %vm374_vm2, %v1778_v11, %v1829_v0 }
 0x2cb   : > { %4056 = vrot.lane.b32.xlu0 %v4055_v62, %s4230_s9  ;;  %v2267_v62 = vrot.slane %v5352_v41, 1  ;;  %v6575_v40 = vrot.slane %v5264_v49, 7  ;;  %v6576_v11 = vrot.slane %v5262_v12, 7  ;;  %v1860_v27 = vrot.slane %v5346_v5, 7 }
 0x2cc   : > { %v5509_v46 = vsel %vm465_vm1, %v6553_v21, %v1934_v45  ;;  %v5512_v2 = vsel %vm465_vm1, %v1934_v45, %v1857_v61  ;;  %v5524_v21 = vld [vmem:[%s6522_s4] sm:$0x3f]   ;;  %v6579_v49 = vrot.slane %v5303_v4, 7  ;;  %v6624_v8 = vrot.slane %v5338_v13, 7 }
 0x2cd   : > { %v5556_v53 = vsel %vm465_vm1, %v2258_v51, %v2267_v62 }
 0x2ce   : > { %4086 = vrot.lane.b32.xlu1 %v4085_v44, %s4230_s9  ;;  %v2262_v44 = vrot.slane %v5352_v41, 7 }
 0x2cf   : > { %4071 = vrot.lane.b32.xlu0 %v4070_v26, %s4231_s10  ;;  %v1938_v26 = vrot.slane %v5219_v22, 1 }
 0x2d0   : > { %v5559_v31 = vsel %vm465_vm1, %v2267_v62, %v2262_v44 }
 0x2d1   : > { %v5528_v45 = vsel %vm465_vm1, %v1789_v15, %v1938_v26  ;;  %v5531_v37 = vsel %vm465_vm1, %v1938_v26, %v1863_v9  ;;  %v5551_v26 = vsel %vm374_vm2, %v1775_v33, %v1820_v52 }
 0x2d2   : > { %4101 = vrot.lane.b32.xlu1 %v4100_v63, %s4231_s10  ;;  %v5544_v63 = vsel %vm374_vm2, %v1820_v52, %v1821_v34  ;;  %v5566_v34 = vsel %vm374_vm2, %v1829_v0, %v1830_v59  ;;  %v4175_v52 = vpack.i.bf16 %v5559_v31, %v5556_v53  ;;  %v6574_v59 = vrot.slane %v5284_v57, 1 }
 0x2d3   : > { %4076 = vrot.lane.b32.xlu0 %v4075_v42, %s4230_s9  ;;  %v2347_v42 = vsel %vm905_vm0, %v5295_v24, 0  ;;  %v6572_v24 = vrot.slane %v5284_v57, 7  ;;  %v5596_v0 = vsel %vm374_vm2, %v6576_v11, %v6575_v40  ;;  %v6578_v57 = vrot.slane %v5262_v12, 1 }
 0x2d4   : > { %3615 = vmatpush3.bf16.msra.mxu1 %v2347_v42  ;;  %v6580_v42 = vrot.slane %v5301_v56, 7  ;;  %v6583_v12 = vrot.slane %v5297_v18, 7  ;;  %v6585_v40 = vrot.slane %v5297_v18, 1  ;;  %v6591_v18 = vrot.slane %v5305_v25, 7 }
 0x2d5   : > { %v5582_v32 = vsel %vm374_vm2, %v6572_v24, %v1827_v38  ;;  %v6573_v33 = vmov %v6572_v24  ;;  %3848 = vmatprep.subr.msk.bf16.mxu1 %vm905_vm0, %v5524_v21  ;;  %v6577_v38 = vmov %v6576_v11 }
 0x2d6   : > { %v5589_v62 = vsel %vm374_vm2, %v6574_v59, %v6573_v33  ;;  %4106 = vrot.lane.b32.xlu1 %v4105_v43, %s4230_s9  ;;  %v5607_v53 = vsel %vm374_vm2, %v6578_v57, %v6577_v38  ;;  %v5614_v31 = vsel %vm374_vm2, %v6580_v42, %v6579_v49  ;;  %v6581_v24 = vmov %v6580_v42 }
 0x2d7   : > { %v6582_v43 = vrot.slane %v5301_v56, 1  ;;  %4091 = vrot.lane.b32.xlu0 %v4090_v20, %s4231_s10  ;;  %v5629_v4 = vsel %vm374_vm2, %v6583_v12, %v1833_v30  ;;  %v6584_v59 = vmov %v6583_v12  ;;  %v6586_v56 = vrot.slane %v5311_v6, 7 }
 0x2d8   : > { %v5636_v11 = vsel %vm374_vm2, %v6585_v40, %v6584_v59  ;;  %v6587_v38 = vrot.slane %v5309_v55, 7  ;;  %v6589_v57 = vrot.slane %v5309_v55, 1  ;;  %v6590_v49 = vrot.slane %v5307_v19, 7 }
 0x2d9   : > { %v5621_v33 = vsel %vm374_vm2, %v6582_v43, %v6581_v24  ;;  %v6592_v6 = vmov %v6591_v18  ;;  %v6593_v24 = vrot.slane %v5305_v25, 1  ;;  %v6594_v12 = vrot.slane %v5324_v48, 7 }
 0x2da   : > { %v5643_v20 = vsel %vm374_vm2, %v6587_v38, %v6586_v56  ;;  %v6588_v54 = vmov %v6587_v38  ;;  %v5657_v42 = vsel %vm374_vm2, %v6591_v18, %v6590_v49  ;;  %v6595_v55 = vrot.slane %v5322_v58, 7 }
 0x2db   : > { %v5650_v30 = vsel %vm374_vm2, %v6589_v57, %v6588_v54  ;;  %v5664_v43 = vsel %vm374_vm2, %v6593_v24, %v6592_v6  ;;  %v6597_v40 = vrot.slane %v5322_v58, 1  ;;  %v6598_v38 = vrot.slane %v5320_v23, 7 }
 0x2dc   : > { %v5671_v59 = vsel %vm374_vm2, %v6595_v55, %v6594_v12  ;;  %v6596_v19 = vmov %v6595_v55  ;;  %v6599_v25 = vrot.slane %v5315_v10, 7  ;;  %v6601_v57 = vrot.slane %v5315_v10, 1 }
 0x2dd   : > { %v5678_v56 = vsel %vm374_vm2, %v6597_v40, %v6596_v19  ;;  %v6602_v18 = vrot.slane %v5338_v13, 7  ;;  %v6603_v58 = vrot.slane %v5330_v29, 7  ;;  %v6605_v12 = vrot.slane %v5330_v29, 1 }
 0x2de   : > { %v5685_v54 = vsel %vm374_vm2, %v6599_v25, %v6598_v38  ;;  %v6600_v48 = vmov %v6599_v25  ;;  %v6606_v19 = vpack.i.bf16 %v5460_v50, %v5455_v36  ;;  %v6607_v40 = vrot.slane %v5328_v17, 7 }
 0x2df   : > { %v5692_v49 = vsel %vm374_vm2, %v6601_v57, %v6600_v48  ;;  %v5699_v6 = vsel %vm374_vm2, %v6603_v58, %v6602_v18  ;;  %v6604_v24 = vmov %v6603_v58  ;;  %v6608_v38 = vrot.slane %v5326_v14, 7 }
 0x2e0   : > { %v5706_v55 = vsel %vm374_vm2, %v6605_v12, %v6604_v24  ;;  %4121 = vrot.lane.b32.xlu1 %v6606_v19, %s4231_s10  ;;  %v6610_v57 = vrot.slane %v5326_v14, 1  ;;  %v6611_v58 = vrot.slane %v5344_v47, 7  ;;  %v6613_v50 = vrot.slane %v5344_v47, 1 }
 0x2e1   : > { %v5717_v25 = vsel %vm374_vm2, %v6608_v38, %v6607_v40  ;;  %v6609_v48 = vmov %v6608_v38  ;;  %v6614_v19 = vpack.i.bf16 %v5320_v23, %v5315_v10  ;;  %v6615_v40 = vrot.slane %v5340_v16, 7 }
 0x2e2   : > { %v5724_v18 = vsel %vm374_vm2, %v6610_v57, %v6609_v48  ;;  %v5729_v24 = vsel %vm374_vm2, %v6611_v58, %v1860_v27  ;;  %v6612_v36 = vmov %v6611_v58  ;;  %v6617_v57 = vrot.slane %v5340_v16, 1 }
 0x2e3   : > { %v5736_v12 = vsel %vm374_vm2, %v6613_v50, %v6612_v36  ;;  %4096 = vrot.lane.b32.xlu0 %v6614_v19, %s4230_s9  ;;  %v5745_v38 = vsel %vm374_vm2, %v6615_v40, %v1857_v61  ;;  %v6616_v48 = vmov %v6615_v40  ;;  %v6618_v36 = vrot.slane %v5348_v39, 7 }
 0x2e4   : > { %v5752_v58 = vsel %vm374_vm2, %v6617_v57, %v6616_v48  ;;  %v4125_v61 = vpack.i.bf16 %v5338_v13, %v5330_v29  ;;  %v6620_v19 = vrot.slane %v5350_v35, 7 }
 0x2e5   : > { %v5757_v50 = vsel %vm374_vm2, %v6618_v36, %v1863_v9  ;;  %v6619_v10 = vmov %v6618_v36  ;;  %v4110_v9 = vpack.i.bf16 %v5491_v1, %v5486_v28  ;;  %v6622_v36 = vrot.slane %v5338_v13, 1 }
 0x2e6   : > { %v5762_v23 = vsel %vm374_vm2, %v1789_v15, %v6619_v10  ;;  %v5769_v40 = vsel %vm374_vm2, %v6620_v19, %v2262_v44  ;;  %v6621_v48 = vmov %v6620_v19  ;;  %v6623_v15 = vrot.slane %v5330_v29, 1  ;;  %4126 = vrot.lane.b32.xlu1 %v4125_v61, %s4230_s9 }
 0x2e7   : > { %v5774_v57 = vsel %vm374_vm2, %v2258_v51, %v6621_v48  ;;  %v6625_v7 = vmov %v6622_v36  ;;  %v1930_v51 = vrot.slane %v5328_v17, 1  ;;  %4111 = vrot.lane.b32.xlu0 %v4110_v9, %s4231_s10  ;;  %v4115_v28 = vpack.i.bf16 %v5328_v17, %v5326_v14 }
 0x2e8   : > { %v1933_v10 = vsel %vm465_vm1, %v6623_v15, %v6622_v36  ;;  %v1981_v44 = vsel %vm465_vm1, %v6625_v7, %v6624_v8  ;;  %v1936_v29 = vrot.slane %v5346_v5, 1  ;;  %v6626_v1 = vrot.slane %v5326_v14, 1 }
 0x2e9   : > { %v4140_v19 = vpack.i.bf16 %v1981_v44, %v1933_v10  ;;  %v6627_v7 = vrot.slane %v5328_v17, 7  ;;  %v4145_v61 = vpack.i.bf16 %v5346_v5, %v5344_v47  ;;  %v6628_v9 = vrot.slane %v5344_v47, 1 }
 0x2ea   : > { %v1931_v13 = vsel %vm465_vm1, %v6626_v1, %v1930_v51  ;;  %v1983_v15 = vsel %vm465_vm1, %v1936_v29, %v1860_v27  ;;  %v6629_v17 = vpack.i.bf16 %v5342_v60, %v5340_v16  ;;  %v6630_v47 = vpack.i.bf16 %v5531_v37, %v5528_v45 }
 0x2eb   : > { %4141 = vrot.lane.b32.xlu1 %v4140_v19, %s4231_s10  ;;  %v1980_v8 = vsel %vm465_vm1, %v1930_v51, %v6627_v7  ;;  %4116 = vrot.lane.b32.xlu0 %v4115_v28, %s4230_s9  ;;  %v1937_v36 = vsel %vm465_vm1, %v6628_v9, %v1936_v29  ;;  %v6631_v5 = vpack.i.bf16 %v5512_v2, %v5509_v46 }
 0x2ec   : > { %v4130_v48 = vpack.i.bf16 %v1980_v8, %v1931_v13  ;;  %v4160_v14 = vpack.i.bf16 %v1983_v15, %v1937_v36  ;;  %v6632_v27 = vpack.i.bf16 %v5219_v22, %v5348_v39  ;;  %v6633_v16 = vpack.i.bf16 %v5352_v41, %v5350_v35 }
 0x2ef   : > { %4146 = vrot.lane.b32.xlu1 %v4145_v61, %s4230_s9  ;;  %4131 = vrot.lane.b32.xlu0 %v4130_v48, %s4231_s10 }
 0x2f3   : > { %4161 = vrot.lane.b32.xlu1 %v4160_v14, %s4231_s10  ;;  %4136 = vrot.lane.b32.xlu0 %v6629_v17, %s4230_s9 }
 0x2f7   : > { %4166 = vrot.lane.b32.xlu1 %v6630_v47, %s4231_s10  ;;  %4151 = vrot.lane.b32.xlu0 %v6631_v5, %s4231_s10 }
 0x2fb   : > { %4176 = vrot.lane.b32.xlu1 %v4175_v52, %s4231_s10  ;;  %4156 = vrot.lane.b32.xlu0 %v6632_v27, %s4230_s9 }
 0x2ff   : > { %4171 = vrot.lane.b32.xlu0 %v6633_v16, %s4230_s9 }
 0x31c   : > { %v4027_v60 = vpop.permute.xlu1 %4026 }
 0x31d   : > { %v4029_v37 = vunpack.i.h.bf16 %v4027_v60  ;;  %v4028_v45 = vunpack.i.l.bf16 %v4027_v60 }
 0x31f   : > { %v2180_v46 = vsel %vm736_vm3, %v5551_v26, %v4028_v45  ;;  %v2181_v52 = vsel %vm736_vm3, %v5544_v63, %v4029_v37 }
 0x323   : > { %v4022_v10 = vpop.permute.xlu0 %4021 }
 0x324   : > { %v4024_v22 = vunpack.i.h.bf16 %v4022_v10  ;;  %v4023_v39 = vunpack.i.l.bf16 %v4022_v10 }
 0x326   : > { %v2182_v26 = vsel %vm736_vm3, %v5607_v53, %v4023_v39  ;;  %v2183_v63 = vsel %vm736_vm3, %v5596_v0, %v4024_v22  ;;  %v2516_v53 = vsel %vm905_vm0, %v5524_v21, 0  ;;  %v5857_v0 = vld [vmem:[%s6522_s4 + $0x10] sm:$0x3f]  }
 0x32c   : > { %v4042_v44 = vpop.permute.xlu1 %4041 }
 0x32d   : > { %v4044_v51 = vunpack.i.h.bf16 %v4042_v44  ;;  %v4043_v2 = vunpack.i.l.bf16 %v4042_v44 }
 0x32f   : > { %v2211_v19 = vsel %vm767_vm4, %v2181_v52, %v4044_v51  ;;  %v2210_v35 = vsel %vm767_vm4, %v2180_v46, %v4043_v2 }
 0x330   : > { %v5838_v41 = vpack.c.bf16 %v2211_v19, %v2210_v35  ;;  %v4047_v28 = vpop.permute.xlu1 %4046 }
 0x331   : > { %v4032_v29 = vpop.permute.xlu0 %4031  ;;  %v4049_v7 = vunpack.i.h.bf16 %v4047_v28  ;;  %v4048_v8 = vunpack.i.l.bf16 %v4047_v28 }
 0x332   : > { %v4034_v1 = vunpack.i.h.bf16 %v4032_v29  ;;  %v4033_v13 = vunpack.i.l.bf16 %v4032_v29 }
 0x333   : > { %v2187_v47 = vsel %vm736_vm3, %v5566_v34, %v4049_v7  ;;  %v2186_v5 = vsel %vm736_vm3, %v5573_v3, %v4048_v8 }
 0x334   : > { %v2212_v61 = vsel %vm767_vm4, %v2182_v26, %v4033_v13  ;;  %v2213_v48 = vsel %vm767_vm4, %v2183_v63, %v4034_v1  ;;  %v4062_v9 = vpop.permute.xlu1 %4061 }
 0x335   : > { %v4037_v36 = vpop.permute.xlu0 %4036  ;;  %v5846_v15 = vpack.c.bf16 %v2213_v48, %v2212_v61  ;;  %v4064_v14 = vunpack.i.h.bf16 %v4062_v9  ;;  %v4063_v17 = vunpack.i.l.bf16 %v4062_v9 }
 0x336   : > { %v4039_v27 = vunpack.i.h.bf16 %v4037_v36  ;;  %v4038_v16 = vunpack.i.l.bf16 %v4037_v36 }
 0x337   : > { %3616 = vmatprep.mubr.msk.bf16.mxu1 %vm856_vm5, %v5846_v15  ;;  %v2216_v60 = vsel %vm767_vm4, %v2186_v5, %v4063_v17  ;;  %v2217_v34 = vsel %vm767_vm4, %v2187_v47, %v4064_v14 }
 0x338   : > { %3617 = vmatmul.mubr.msk.bf16.vlgmr.msra.gmra.mrb[0].mxu1 %vm856_vm5, %v5838_v41  ;;  %v5865_v3 = vpack.c.bf16 %v2217_v34, %v2216_v60  ;;  %v4067_v21 = vpop.permute.xlu1 %4066  ;;  %v2185_v2 = vsel %vm736_vm3, %v5582_v32, %v4039_v27  ;;  %v2184_v46 = vsel %vm736_vm3, %v5589_v62, %v4038_v16 }
 0x339   : > { %3649 = vmatpush3.bf16.msra.mxu1 %v2516_v53  ;;  %v4052_v37 = vpop.permute.xlu0 %4051  ;;  %v4069_v44 = vunpack.i.h.bf16 %v4067_v21  ;;  %v4068_v51 = vunpack.i.l.bf16 %v4067_v21 }
 0x33a   : > { %v4054_v45 = vunpack.i.h.bf16 %v4052_v37  ;;  %v4053_v10 = vunpack.i.l.bf16 %v4052_v37  ;;  %3849 = vmatprep.subr.msk.bf16.mxu1 %vm905_vm0, %v5857_v0 }
 0x33b   : > { %v2191_v1 = vsel %vm736_vm3, %v5614_v31, %v4069_v44  ;;  %v2190_v13 = vsel %vm736_vm3, %v5621_v33, %v4068_v51 }
 0x33c   : > { %v2214_v52 = vsel %vm767_vm4, %v2184_v46, %v4053_v10  ;;  %v2215_v22 = vsel %vm767_vm4, %v2185_v2, %v4054_v45  ;;  %v4082_v39 = vpop.permute.xlu1 %4081 }
 0x33d   : > { %v5875_v19 = vpack.c.bf16 %v2215_v22, %v2214_v52  ;;  %v4057_v35 = vpop.permute.xlu0 %4056  ;;  %v4084_v28 = vunpack.i.h.bf16 %v4082_v39  ;;  %v4083_v29 = vunpack.i.l.bf16 %v4082_v39 }
 0x33e   : > { %v4059_v32 = vunpack.i.h.bf16 %v4057_v35  ;;  %v4058_v7 = vunpack.i.l.bf16 %v4057_v35 }
 0x33f   : > { %3620 = vmatprep.mubr.msk.bf16.mxu1 %vm856_vm5, %v5875_v19  ;;  %v2220_v62 = vsel %vm767_vm4, %v2190_v13, %v4083_v29  ;;  %v2221_v8 = vsel %vm767_vm4, %v2191_v1, %v4084_v28 }
 0x340   : > { %3621 = vmatmul.mubr.msk.bf16.gmra.mrb[4].mxu1 %vm856_vm5, %v5865_v3  ;;  %v5887_v26 = vpack.c.bf16 %v2221_v8, %v2220_v62  ;;  %v4087_v63 = vpop.permute.xlu1 %4086  ;;  %v2189_v36 = vsel %vm736_vm3, %v5629_v4, %v4059_v32  ;;  %v2188_v14 = vsel %vm736_vm3, %v5636_v11, %v4058_v7 }
 0x341   : > { %v4072_v61 = vpop.permute.xlu0 %4071  ;;  %v4089_v9 = vunpack.i.h.bf16 %v4087_v63  ;;  %v4088_v33 = vunpack.i.l.bf16 %v4087_v63 }
 0x342   : > { %v4074_v31 = vunpack.i.h.bf16 %v4072_v61  ;;  %v4073_v48 = vunpack.i.l.bf16 %v4072_v61 }
 0x343   : > { %v2195_v34 = vsel %vm736_vm3, %v5643_v20, %v4089_v9  ;;  %v2194_v21 = vsel %vm736_vm3, %v5650_v30, %v4088_v33 }
 0x344   : > { %v2218_v17 = vsel %vm767_vm4, %v2188_v14, %v4073_v48  ;;  %v2219_v47 = vsel %vm767_vm4, %v2189_v36, %v4074_v31  ;;  %v4102_v5 = vpop.permute.xlu1 %4101 }
 0x345   : > { %v5895_v53 = vpack.c.bf16 %v2219_v47, %v2218_v17  ;;  %v4077_v27 = vpop.permute.xlu0 %4076  ;;  %v4104_v16 = vunpack.i.h.bf16 %v4102_v5  ;;  %v4103_v60 = vunpack.i.l.bf16 %v4102_v5 }
 0x346   : > { %v4079_v4 = vunpack.i.h.bf16 %v4077_v27  ;;  %v4078_v37 = vunpack.i.l.bf16 %v4077_v27 }
 0x347   : > { %3624 = vmatprep.mubr.msk.bf16.mxu1 %vm856_vm5, %v5895_v53  ;;  %v2224_v11 = vsel %vm767_vm4, %v2194_v21, %v4103_v60  ;;  %v2225_v45 = vsel %vm767_vm4, %v2195_v34, %v4104_v16 }
 0x348   : > { %3625 = vmatmul.mubr.msk.bf16.gmra.mrb[8].mxu1 %vm856_vm5, %v5887_v26  ;;  %v5907_v10 = vpack.c.bf16 %v2225_v45, %v2224_v11  ;;  %v4107_v44 = vpop.permute.xlu1 %4106  ;;  %v2193_v52 = vsel %vm736_vm3, %v5657_v42, %v4079_v4  ;;  %v2192_v22 = vsel %vm736_vm3, %v5664_v43, %v4078_v37 }
 0x349   : > { %v4092_v51 = vpop.permute.xlu0 %4091  ;;  %v4109_v46 = vunpack.i.h.bf16 %v4107_v44  ;;  %v4108_v30 = vunpack.i.l.bf16 %v4107_v44 }
 0x34a   : > { %v4094_v20 = vunpack.i.h.bf16 %v4092_v51  ;;  %v4093_v2 = vunpack.i.l.bf16 %v4092_v51 }
 0x34b   : > { %v2199_v7 = vsel %vm736_vm3, %v5671_v59, %v4109_v46  ;;  %v2198_v62 = vsel %vm736_vm3, %v5678_v56, %v4108_v30 }
 0x34c   : > { %v2222_v39 = vsel %vm767_vm4, %v2192_v22, %v4093_v2  ;;  %v2223_v35 = vsel %vm767_vm4, %v2193_v52, %v4094_v20 }
 0x34d   : > { %v5915_v29 = vpack.c.bf16 %v2223_v35, %v2222_v39 }
 0x34f   : > { %3628 = vmatprep.mubr.msk.bf16.mxu1 %vm856_vm5, %v5915_v29 }
 0x350   : > { %3629 = vmatmul.mubr.msk.bf16.gmra.mrb[12].mxu1 %vm856_vm5, %v5907_v10 }
 0x352   : > { %v4122_v28 = vpop.permute.xlu1 %4121 }
 0x353   : > { %v4124_v13 = vunpack.i.h.bf16 %v4122_v28  ;;  %v4123_v32 = vunpack.i.l.bf16 %v4122_v28 }
 0x355   : > { %v4097_v1 = vpop.permute.xlu0 %4096  ;;  %v2228_v43 = vsel %vm767_vm4, %v2198_v62, %v4123_v32  ;;  %v2229_v63 = vsel %vm767_vm4, %v2199_v7, %v4124_v13 }
 0x356   : > { %v4099_v42 = vunpack.i.h.bf16 %v4097_v1  ;;  %v4098_v8 = vunpack.i.l.bf16 %v4097_v1  ;;  %v5927_v61 = vpack.c.bf16 %v2229_v63, %v2228_v43 }
 0x358   : > { %v4127_v31 = vpop.permute.xlu1 %4126  ;;  %v2197_v36 = vsel %vm736_vm3, %v5685_v54, %v4099_v42  ;;  %v2196_v14 = vsel %vm736_vm3, %v5692_v49, %v4098_v8 }
 0x359   : > { %v4112_v48 = vpop.permute.xlu0 %4111  ;;  %v4129_v33 = vunpack.i.h.bf16 %v4127_v31  ;;  %v4128_v56 = vunpack.i.l.bf16 %v4127_v31 }
 0x35a   : > { %v4114_v59 = vunpack.i.h.bf16 %v4112_v48  ;;  %v4113_v9 = vunpack.i.l.bf16 %v4112_v48 }
 0x35b   : > { %v2203_v21 = vsel %vm736_vm3, %v5699_v6, %v4129_v33  ;;  %v2202_v4 = vsel %vm736_vm3, %v5706_v55, %v4128_v56 }
 0x35c   : > { %v2226_v17 = vsel %vm767_vm4, %v2196_v14, %v4113_v9  ;;  %v2227_v47 = vsel %vm767_vm4, %v2197_v36, %v4114_v59 }
 0x35d   : > { %v4142_v5 = vpop.permute.xlu1 %4141  ;;  %v5935_v27 = vpack.c.bf16 %v2227_v47, %v2226_v17  ;;  %v4117_v16 = vpop.permute.xlu0 %4116 }
 0x35e   : > { %v4144_v60 = vunpack.i.h.bf16 %v4142_v5  ;;  %v4143_v34 = vunpack.i.l.bf16 %v4142_v5  ;;  %v4119_v54 = vunpack.i.h.bf16 %v4117_v16  ;;  %v4118_v37 = vunpack.i.l.bf16 %v4117_v16 }
 0x35f   : > { %3632 = vmatprep.mubr.msk.bf16.mxu1 %vm856_vm5, %v5935_v27 }
 0x360   : > { %v2232_v49 = vsel %vm767_vm4, %v2202_v4, %v4143_v34  ;;  %v2233_v11 = vsel %vm767_vm4, %v2203_v21, %v4144_v60  ;;  %3633 = vmatmul.mubr.msk.bf16.gmra.mrb[16].mxu1 %vm856_vm5, %v5927_v61  ;;  %v2201_v46 = vsel %vm736_vm3, %v5717_v25, %v4119_v54  ;;  %v2200_v30 = vsel %vm736_vm3, %v5724_v18, %v4118_v37 }
 0x361   : > { %v5947_v45 = vpack.c.bf16 %v2233_v11, %v2232_v49  ;;  %v4147_v44 = vpop.permute.xlu1 %4146  ;;  %v4132_v51 = vpop.permute.xlu0 %4131 }
 0x362   : > { %v4134_v6 = vunpack.i.h.bf16 %v4132_v51  ;;  %v4133_v20 = vunpack.i.l.bf16 %v4132_v51  ;;  %v4149_v2 = vunpack.i.h.bf16 %v4147_v44  ;;  %v4148_v55 = vunpack.i.l.bf16 %v4147_v44 }
 0x364   : > { %v2230_v52 = vsel %vm767_vm4, %v2200_v30, %v4133_v20  ;;  %v2231_v22 = vsel %vm767_vm4, %v2201_v46, %v4134_v6  ;;  %v2207_v32 = vsel %vm736_vm3, %v5729_v24, %v4149_v2  ;;  %v2206_v7 = vsel %vm736_vm3, %v5736_v12, %v4148_v55 }
 0x365   : > { %v4162_v39 = vpop.permute.xlu1 %4161  ;;  %v5955_v35 = vpack.c.bf16 %v2231_v22, %v2230_v52  ;;  %v4137_v28 = vpop.permute.xlu0 %4136  ;;  %v2688_v6 = vsel %vm905_vm0, %v5857_v0, 0 }
 0x366   : > { %v4164_v1 = vunpack.i.h.bf16 %v4162_v39  ;;  %v4163_v13 = vunpack.i.l.bf16 %v4162_v39  ;;  %v4139_v25 = vunpack.i.h.bf16 %v4137_v28  ;;  %v4138_v62 = vunpack.i.l.bf16 %v4137_v28 }
 0x367   : > { %3636 = vmatprep.mubr.msk.bf16.mxu1 %vm856_vm5, %v5955_v35 }
 0x368   : > { %v2236_v18 = vsel %vm767_vm4, %v2206_v7, %v4163_v13  ;;  %v2237_v42 = vsel %vm767_vm4, %v2207_v32, %v4164_v1  ;;  %3637 = vmatmul.mubr.msk.bf16.gmra.mrb[20].mxu1 %vm856_vm5, %v5947_v45  ;;  %v2205_v12 = vsel %vm736_vm3, %v5745_v38, %v4139_v25  ;;  %v2204_v48 = vsel %vm736_vm3, %v5752_v58, %v4138_v62 }
 0x369   : > { %v5967_v8 = vpack.c.bf16 %v2237_v42, %v2236_v18  ;;  %v4167_v43 = vpop.permute.xlu1 %4166  ;;  %v4152_v63 = vpop.permute.xlu0 %4151 }
 0x36a   : > { %v4154_v24 = vunpack.i.h.bf16 %v4152_v63  ;;  %v4153_v31 = vunpack.i.l.bf16 %v4152_v63  ;;  %v4169_v56 = vunpack.i.h.bf16 %v4167_v43  ;;  %v4168_v36 = vunpack.i.l.bf16 %v4167_v43 }
 0x36c   : > { %v2234_v59 = vsel %vm767_vm4, %v2204_v48, %v4153_v31  ;;  %v2235_v9 = vsel %vm767_vm4, %v2205_v12, %v4154_v24 }
 0x36d   : > { %v2252_v33 = vpack.c.bf16 %v2235_v9, %v2234_v59  ;;  %v4157_v14 = vpop.permute.xlu0 %4156  ;;  %v4177_v5 = vpop.permute.xlu1 %4176 }
 0x36e   : > { %v4159_v17 = vunpack.i.h.bf16 %v4157_v14  ;;  %v4158_v47 = vunpack.i.l.bf16 %v4157_v14  ;;  %v4179_v58 = vunpack.i.h.bf16 %v4177_v5  ;;  %v4178_v60 = vunpack.i.l.bf16 %v4177_v5 }
 0x36f   : > { %3640 = vmatprep.mubr.msk.bf16.mxu1 %vm856_vm5, %v2252_v33 }
 0x370   : > { %v2209_v16 = vsel %vm736_vm3, %v5757_v50, %v4159_v17  ;;  %v2208_v38 = vsel %vm736_vm3, %v5762_v23, %v4158_v47  ;;  %3641 = vmatmul.mubr.msk.bf16.gmra.mrb[24].mxu1 %vm856_vm5, %v5967_v8 }
 0x371   : > { %v4172_v34 = vpop.permute.xlu0 %4171  ;;  %v2238_v21 = vsel %vm767_vm4, %v2208_v38, %v4168_v36  ;;  %v2239_v4 = vsel %vm767_vm4, %v2209_v16, %v4169_v56 }
 0x372   : > { %v4174_v54 = vunpack.i.h.bf16 %v4172_v34  ;;  %v4173_v37 = vunpack.i.l.bf16 %v4172_v34  ;;  %v2254_v49 = vpack.c.bf16 %v2239_v4, %v2238_v21 }
 0x374   : > { %v2286_v11 = vsel %vm736_vm3, %v5769_v40, %v4174_v54  ;;  %v2285_v50 = vsel %vm736_vm3, %v5774_v57, %v4173_v37  ;;  %3644 = vmatprep.mubr.msk.bf16.mxu1 %vm856_vm5, %v2254_v49 }
 0x375   : > { %v2288_v23 = vsel %vm767_vm4, %v2286_v11, %v4179_v58  ;;  %v2287_v44 = vsel %vm767_vm4, %v2285_v50, %v4178_v60 }
 0x376   : > { %v2289_v51 = vpack.c.bf16 %v2288_v23, %v2287_v44 }
 0x378   : > { %3645 = vmatmul.mubr.msk.bf16.gmra.mrb[28].mxu1 %vm856_vm5, %v2289_v51 }
 0x379   : > { %3650 = vmatprep.mubr.msk.bf16.mxu1 %vm856_vm5, %v5838_v41 }
 0x380   : > { %3651 = vmatmul.mubr.msk.bf16.vlgmr.msra.gmra.mrb[0].mxu1 %vm856_vm5, %v5846_v15 }
 0x381   : > { %3683 = vmatpush3.bf16.msra.mxu1 %v2688_v6  ;;  %3654 = vmatprep.mubr.msk.bf16.mxu1 %vm856_vm5, %v5838_v41 }
 0x388   : > { %3655 = vmatmul.mubr.msk.bf16.gmra.mrb[4].mxu1 %vm856_vm5, %v5875_v19 }
 0x389   : > { %3658 = vmatprep.mubr.msk.bf16.mxu1 %vm856_vm5, %v5865_v3 }
 0x390   : > { %3659 = vmatmul.mubr.msk.bf16.gmra.mrb[8].mxu1 %vm856_vm5, %v5895_v53 }
 0x391   : > { %3662 = vmatprep.mubr.msk.bf16.mxu1 %vm856_vm5, %v5887_v26 }
 0x398   : > { %3663 = vmatmul.mubr.msk.bf16.gmra.mrb[12].mxu1 %vm856_vm5, %v5915_v29 }
 0x399   : > { %3666 = vmatprep.mubr.msk.bf16.mxu1 %vm856_vm5, %v5907_v10 }
 0x3a0   : > { %3667 = vmatmul.mubr.msk.bf16.gmra.mrb[16].mxu1 %vm856_vm5, %v5935_v27 }
 0x3a1   : > { %3670 = vmatprep.mubr.msk.bf16.mxu1 %vm856_vm5, %v5927_v61 }
 0x3a8   : > { %3671 = vmatmul.mubr.msk.bf16.gmra.mrb[20].mxu1 %vm856_vm5, %v5955_v35 }
 0x3a9   : > { %3674 = vmatprep.mubr.msk.bf16.mxu1 %vm856_vm5, %v5947_v45 }
 0x3b0   : > { %3675 = vmatmul.mubr.msk.bf16.gmra.mrb[24].mxu1 %vm856_vm5, %v2252_v33 }
 0x3b1   : > { %3678 = vmatprep.mubr.msk.bf16.mxu1 %vm856_vm5, %v5967_v8 }
 0x3b8   : > { %3679 = vmatmul.mubr.msk.bf16.gmra.mrb[28].mxu1 %vm856_vm5, %v2254_v49 }
 0x3b9   : > { %3684 = vmatprep.mubr.msk.bf16.mxu1 %vm856_vm5, %v5838_v41 }
 0x3c0   : > { %3685 = vmatmul.mubr.msk.bf16.vlgmr.msra.gmra.mrb[0].mxu1 %vm856_vm5, %v5875_v19 }
 0x3c1   : > { %3688 = vmatprep.mubr.msk.bf16.mxu1 %vm856_vm5, %v5865_v3 }
 0x3c8   : > { %3689 = vmatmul.mubr.msk.bf16.gmra.mrb[4].mxu1 %vm856_vm5, %v5895_v53 }
 0x3c9   : > { %3692 = vmatprep.mubr.msk.bf16.mxu1 %vm856_vm5, %v5887_v26 }
 0x3d0   : > { %3693 = vmatmul.mubr.msk.bf16.gmra.mrb[8].mxu1 %vm856_vm5, %v5915_v29 }
 0x3d1   : > { %3696 = vmatprep.mubr.msk.bf16.mxu1 %vm856_vm5, %v5907_v10 }
 0x3d8   : > { %3697 = vmatmul.mubr.msk.bf16.gmra.mrb[12].mxu1 %vm856_vm5, %v5935_v27 }
 0x3d9   : > { %3700 = vmatprep.mubr.msk.bf16.mxu1 %vm856_vm5, %v5927_v61 }
 0x3e0   : > { %3701 = vmatmul.mubr.msk.bf16.gmra.mrb[16].mxu1 %vm856_vm5, %v5955_v35 }
 0x3e1   : > { %3704 = vmatprep.mubr.msk.bf16.mxu1 %vm856_vm5, %v5947_v45 }
 0x3e8   : > { %3705 = vmatmul.mubr.msk.bf16.gmra.mrb[20].mxu1 %vm856_vm5, %v2252_v33 }
 0x3e9   : > { %3708 = vmatprep.mubr.msk.bf16.mxu1 %vm856_vm5, %v5967_v8 }
 0x3f0   : > { %3709 = vmatmul.mubr.msk.bf16.gmra.mrb[24].mxu1 %vm856_vm5, %v2254_v49 }
 0x3f1   : > { %3712 = vmatprep.mubr.msk.bf16.mxu1 %vm856_vm5, %v2289_v51 }
 0x3f8   : > { %3713 = vmatmul.mubr.msk.bf16.gmra.mrb[28].mxu1 %vm856_vm5, %v2254_v49 }
 0x493   : > { %v6052_v40 = vpop.f32.mrb[0].mxu1 }
 0x494   : > { %v6054_v57 = vpop.f32.mrb[1].mxu1  ;;  %v2886_v26 = vsel %vm736_vm3, %v6052_v40, 0.0 }
 0x495   : > { %v6056_v41 = vpop.f32.mrb[2].mxu1  ;;  %v2883_v0 = vsel %vm736_vm3, %v6054_v57, 0.0 }
 0x496   : > { %v6058_v15 = vpop.f32.mrb[3].mxu1  ;;  %v2888_v10 = vsel %vm736_vm3, %v6056_v41, 0.0 }
 0x497   : > { %v2884_v3 = vsel %vm736_vm3, %v6058_v15, 0.0 }
 0x498   : > { %v2885_v19 = vadd.f32 %v2884_v3, %v2883_v0 }
 0x49a   : > { %v2887_v53 = vadd.f32 %v2886_v26, %v2885_v19 }
 0x49b   : > { %v6068_v29 = vpop.f32.mrb[4].mxu1 }
 0x49c   : > { %v6070_v61 = vpop.f32.mrb[5].mxu1  ;;  %v2889_v27 = vadd.f32 %v2888_v10, %v2887_v53  ;;  %v2894_v52 = vsel %vm736_vm3, %v6068_v29, 0.0 }
 0x49d   : > { %v2890_v45 = vsel %vm736_vm3, %v6070_v61, 0.0  ;;  %v6074_v20 = vpop.f32.mrb[6].mxu1 }
 0x49e   : > { %v2891_v2 = vadd.f32 %v2890_v45, %v2889_v27  ;;  %v6076_v55 = vpop.f32.mrb[7].mxu1  ;;  %v2896_v39 = vsel %vm736_vm3, %v6074_v20, 0.0 }
 0x49f   : > { %v2892_v46 = vsel %vm736_vm3, %v6076_v55, 0.0 }
 0x4a0   : > { %v2893_v30 = vadd.f32 %v2892_v46, %v2891_v2 }
 0x4a2   : > { %v2895_v22 = vadd.f32 %v2894_v52, %v2893_v30 }
 0x4a3   : > { %v6084_v35 = vpop.f32.mrb[8].mxu1 }
 0x4a4   : > { %v6086_v28 = vpop.f32.mrb[9].mxu1  ;;  %v2897_v1 = vadd.f32 %v2896_v39, %v2895_v22  ;;  %v2902_v42 = vsel %vm736_vm3, %v6084_v35, 0.0 }
 0x4a5   : > { %v2898_v13 = vsel %vm736_vm3, %v6086_v28, 0.0  ;;  %v6090_v32 = vpop.f32.mrb[10].mxu1 }
 0x4a6   : > { %v2899_v7 = vadd.f32 %v2898_v13, %v2897_v1  ;;  %v6092_v25 = vpop.f32.mrb[11].mxu1  ;;  %v2904_v43 = vsel %vm736_vm3, %v6090_v32, 0.0 }
 0x4a7   : > { %v2900_v62 = vsel %vm736_vm3, %v6092_v25, 0.0 }
 0x4a8   : > { %v2901_v18 = vadd.f32 %v2900_v62, %v2899_v7 }
 0x4aa   : > { %v2903_v8 = vadd.f32 %v2902_v42, %v2901_v18 }
 0x4ab   : > { %v6100_v63 = vpop.f32.mrb[12].mxu1 }
 0x4ac   : > { %v6102_v24 = vpop.f32.mrb[13].mxu1  ;;  %v2905_v31 = vadd.f32 %v2904_v43, %v2903_v8  ;;  %v2910_v36 = vsel %vm736_vm3, %v6100_v63, 0.0 }
 0x4ad   : > { %v2906_v12 = vsel %vm736_vm3, %v6102_v24, 0.0  ;;  %v6106_v48 = vpop.f32.mrb[14].mxu1 }
 0x4ae   : > { %v2907_v59 = vadd.f32 %v2906_v12, %v2905_v31  ;;  %v6108_v9 = vpop.f32.mrb[15].mxu1  ;;  %v2912_v17 = vsel %vm736_vm3, %v6106_v48, 0.0 }
 0x4af   : > { %v2908_v33 = vsel %vm736_vm3, %v6108_v9, 0.0 }
 0x4b0   : > { %v2909_v56 = vadd.f32 %v2908_v33, %v2907_v59 }
 0x4b2   : > { %v2911_v14 = vadd.f32 %v2910_v36, %v2909_v56 }
 0x4b3   : > { %v6116_v47 = vpop.f32.mrb[16].mxu1 }
 0x4b4   : > { %v6118_v5 = vpop.f32.mrb[17].mxu1  ;;  %v2913_v16 = vadd.f32 %v2912_v17, %v2911_v14  ;;  %v2918_v54 = vsel %vm736_vm3, %v6116_v47, 0.0 }
 0x4b5   : > { %v2914_v38 = vsel %vm736_vm3, %v6118_v5, 0.0  ;;  %v6122_v58 = vpop.f32.mrb[18].mxu1 }
 0x4b6   : > { %v2915_v60 = vadd.f32 %v2914_v38, %v2913_v16  ;;  %v6124_v34 = vpop.f32.mrb[19].mxu1  ;;  %v2920_v49 = vsel %vm736_vm3, %v6122_v58, 0.0 }
 0x4b7   : > { %v2916_v21 = vsel %vm736_vm3, %v6124_v34, 0.0 }
 0x4b8   : > { %v2917_v4 = vadd.f32 %v2916_v21, %v2915_v60 }
 0x4ba   : > { %v2919_v37 = vadd.f32 %v2918_v54, %v2917_v4 }
 0x4bb   : > { %v6132_v11 = vpop.f32.mrb[20].mxu1 }
 0x4bc   : > { %v6134_v50 = vpop.f32.mrb[21].mxu1  ;;  %v2921_v23 = vadd.f32 %v2920_v49, %v2919_v37  ;;  %v2926_v26 = vsel %vm736_vm3, %v6132_v11, 0.0 }
 0x4bd   : > { %v2922_v44 = vsel %vm736_vm3, %v6134_v50, 0.0  ;;  %v6138_v51 = vpop.f32.mrb[22].mxu1 }
 0x4be   : > { %v2923_v6 = vadd.f32 %v2922_v44, %v2921_v23  ;;  %v2807_v0 = vpop.f32.mrb[23].mxu1  ;;  %v2928_v10 = vsel %vm736_vm3, %v6138_v51, 0.0 }
 0x4bf   : > { %v2924_v3 = vsel %vm736_vm3, %v2807_v0, 0.0 }
 0x4c0   : > { %v2925_v19 = vadd.f32 %v2924_v3, %v2923_v6 }
 0x4c2   : > { %v2927_v53 = vadd.f32 %v2926_v26, %v2925_v19 }
 0x4c3   : > { %v3710_v27 = vpop.f32.mrb[24].mxu1 }
 0x4c4   : > { %v2820_v45 = vpop.f32.mrb[25].mxu1  ;;  %v2929_v2 = vadd.f32 %v2928_v10, %v2927_v53  ;;  %v2934_v13 = vsel %vm736_vm3, %v3710_v27, 0.0 }
 0x4c5   : > { %v2930_v46 = vsel %vm736_vm3, %v2820_v45, 0.0  ;;  %v3711_v30 = vpop.f32.mrb[26].mxu1 }
 0x4c6   : > { %v2931_v52 = vadd.f32 %v2930_v46, %v2929_v2  ;;  %v2823_v22 = vpop.f32.mrb[27].mxu1  ;;  %v2936_v62 = vsel %vm736_vm3, %v3711_v30, 0.0 }
 0x4c7   : > { %v2932_v39 = vsel %vm736_vm3, %v2823_v22, 0.0 }
 0x4c8   : > { %v2933_v1 = vadd.f32 %v2932_v39, %v2931_v52 }
 0x4ca   : > { %v2935_v7 = vadd.f32 %v2934_v13, %v2933_v1 }
 0x4cb   : > { %v3714_v18 = vpop.f32.mrb[28].mxu1 }
 0x4cc   : > { %v2836_v42 = vpop.f32.mrb[29].mxu1  ;;  %v2937_v8 = vadd.f32 %v2936_v62, %v2935_v7  ;;  %v2942_v36 = vsel %vm736_vm3, %v3714_v18, 0.0 }
 0x4cd   : > { %v2938_v43 = vsel %vm736_vm3, %v2836_v42, 0.0  ;;  %v3715_v31 = vpop.f32.mrb[30].mxu1 }
 0x4ce   : > { %v2939_v12 = vadd.f32 %v2938_v43, %v2937_v8  ;;  %v2839_v59 = vpop.f32.mrb[31].mxu1  ;;  %v2944_v17 = vsel %vm736_vm3, %v3715_v31, 0.0 }
 0x4cf   : > { %v2940_v33 = vsel %vm736_vm3, %v2839_v59, 0.0 }
 0x4d0   : > { %v2941_v56 = vadd.f32 %v2940_v33, %v2939_v12 }
 0x4d2   : > { %v2943_v14 = vadd.f32 %v2942_v36, %v2941_v56 }
 0x4d4   : > { %v2945_v16 = vadd.f32 %v2944_v17, %v2943_v14 }
 0x4d6   : > { %v2946_v38 = vrot.slane %v2945_v16, 4 }
 0x4d8   : > { %v2947_v60 = vadd.f32 %v2946_v38, %v2945_v16 }
 0x4da   : > { %v2948_v21 = vrot.slane %v2947_v60, 2 }
 0x4dc   : > { %v2949_v4 = vadd.f32 %v2948_v21, %v2947_v60 }
 0x4de   : > { %v2950_v54 = vrot.slane %v2949_v4, 1 }
 0x4e0   : > { %v2951_v37 = vadd.f32 %v2950_v54, %v2949_v4 }
 0x4e2   : > { %v2952_v49 = vmul.f32 0.00390625, %v2951_v37 }
 0x4e4   : > { %v6154_v23 = vsub.f32 %v6054_v57, %v2952_v49  ;;  %v6157_v44 = vsub.f32 %v6058_v15, %v2952_v49  ;;  %v6160_v6 = vsub.f32 %v6052_v40, %v2952_v49  ;;  %v6163_v3 = vsub.f32 %v6056_v41, %v2952_v49 }
 0x4e5   : > { %v6166_v19 = vsub.f32 %v6070_v61, %v2952_v49  ;;  %v6169_v26 = vsub.f32 %v6076_v55, %v2952_v49  ;;  %v6172_v53 = vsub.f32 %v6068_v29, %v2952_v49  ;;  %v6175_v57 = vsub.f32 %v6074_v20, %v2952_v49 }
 0x4e6   : > { %v6178_v15 = vsub.f32 %v6086_v28, %v2952_v49  ;;  %v6181_v40 = vsub.f32 %v6092_v25, %v2952_v49  ;;  %v6184_v41 = vsub.f32 %v6084_v35, %v2952_v49  ;;  %v6187_v61 = vsub.f32 %v6090_v32, %v2952_v49 }
 0x4e7   : > { %v6190_v55 = vsub.f32 %v6102_v24, %v2952_v49  ;;  %v6193_v29 = vsub.f32 %v6108_v9, %v2952_v49  ;;  %v6196_v20 = vsub.f32 %v6100_v63, %v2952_v49  ;;  %v6199_v28 = vsub.f32 %v6106_v48, %v2952_v49 }
 0x4e8   : > { %v6202_v25 = vsub.f32 %v6118_v5, %v2952_v49  ;;  %v6205_v35 = vsub.f32 %v6124_v34, %v2952_v49  ;;  %v6208_v32 = vsub.f32 %v6116_v47, %v2952_v49  ;;  %v6211_v24 = vsub.f32 %v6122_v58, %v2952_v49 }
 0x4e9   : > { %v6214_v9 = vsub.f32 %v6134_v50, %v2952_v49  ;;  %v6216_v63 = vsub.f32 %v2807_v0, %v2952_v49  ;;  %v6219_v48 = vsub.f32 %v6132_v11, %v2952_v49  ;;  %v6222_v5 = vsub.f32 %v6138_v51, %v2952_v49 }
 0x4ea   : > { %v6224_v10 = vsub.f32 %v2820_v45, %v2952_v49  ;;  %v6226_v34 = vsub.f32 %v2823_v22, %v2952_v49  ;;  %v6228_v47 = vsub.f32 %v3710_v27, %v2952_v49  ;;  %v6230_v2 = vsub.f32 %v3711_v30, %v2952_v49 }
 0x4eb   : > { %v6232_v58 = vsub.f32 %v2836_v42, %v2952_v49  ;;  %v6234_v50 = vsub.f32 %v2839_v59, %v2952_v49  ;;  %v6236_v0 = vsub.f32 %v3714_v18, %v2952_v49  ;;  %v6238_v46 = vsub.f32 %v3715_v31, %v2952_v49 }
 0x4ec   : > { %v2985_v11 = vmul.f32 %v6154_v23, %v6154_v23  ;;  %v2986_v51 = vmul.f32 %v6157_v44, %v6157_v44  ;;  %v2987_v27 = vmul.f32 %v6160_v6, %v6160_v6  ;;  %v2988_v45 = vmul.f32 %v6163_v3, %v6163_v3 }
 0x4ed   : > { %v2989_v39 = vmul.f32 %v6166_v19, %v6166_v19  ;;  %v2990_v7 = vmul.f32 %v6169_v26, %v6169_v26  ;;  %v2991_v42 = vmul.f32 %v6172_v53, %v6172_v53  ;;  %v2992_v31 = vmul.f32 %v6175_v57, %v6175_v57 }
 0x4ee   : > { %v3017_v30 = vsel %vm736_vm3, %v2985_v11, 0.0  ;;  %v3018_v52 = vsel %vm736_vm3, %v2986_v51, 0.0  ;;  %v3020_v1 = vsel %vm736_vm3, %v2987_v27, 0.0  ;;  %v3022_v62 = vsel %vm736_vm3, %v2988_v45, 0.0 }
 0x4ef   : > { %v3019_v22 = vadd.f32 %v3018_v52, %v3017_v30  ;;  %v3024_v8 = vsel %vm736_vm3, %v2989_v39, 0.0  ;;  %v3026_v12 = vsel %vm736_vm3, %v2990_v7, 0.0  ;;  %v2993_v33 = vmul.f32 %v6178_v15, %v6178_v15 }
 0x4f0   : > { %v3028_v56 = vsel %vm736_vm3, %v2991_v42, 0.0  ;;  %v2994_v14 = vmul.f32 %v6181_v40, %v6181_v40  ;;  %v3030_v17 = vsel %vm736_vm3, %v2992_v31, 0.0  ;;  %v2995_v38 = vmul.f32 %v6184_v41, %v6184_v41 }
 0x4f1   : > { %v3021_v13 = vadd.f32 %v3020_v1, %v3019_v22  ;;  %v3032_v60 = vsel %vm736_vm3, %v2993_v33, 0.0  ;;  %v2996_v4 = vmul.f32 %v6187_v61, %v6187_v61  ;;  %v2997_v49 = vmul.f32 %v6190_v55, %v6190_v55 }
 0x4f2   : > { %v3034_v54 = vsel %vm736_vm3, %v2994_v14, 0.0  ;;  %v3036_v11 = vsel %vm736_vm3, %v2995_v38, 0.0  ;;  %v2998_v27 = vmul.f32 %v6193_v29, %v6193_v29  ;;  %v2999_v52 = vmul.f32 %v6196_v20, %v6196_v20 }
 0x4f3   : > { %v3023_v18 = vadd.f32 %v3022_v62, %v3021_v13  ;;  %v3038_v45 = vsel %vm736_vm3, %v2996_v4, 0.0  ;;  %v3040_v22 = vsel %vm736_vm3, %v2997_v49, 0.0  ;;  %v3000_v1 = vmul.f32 %v6199_v28, %v6199_v28 }
 0x4f4   : > { %v3042_v13 = vsel %vm736_vm3, %v2998_v27, 0.0  ;;  %v3001_v62 = vmul.f32 %v6202_v25, %v6202_v25 }
 0x4f5   : > { %v3025_v43 = vadd.f32 %v3024_v8, %v3023_v18  ;;  %v3044_v18 = vsel %vm736_vm3, %v2999_v52, 0.0  ;;  %v3002_v8 = vmul.f32 %v6205_v35, %v6205_v35 }
 0x4f7   : > { %v3027_v59 = vadd.f32 %v3026_v12, %v3025_v43  ;;  %v3046_v43 = vsel %vm736_vm3, %v3000_v1, 0.0  ;;  %v3003_v12 = vmul.f32 %v6208_v32, %v6208_v32 }
 0x4f9   : > { %v3029_v36 = vadd.f32 %v3028_v56, %v3027_v59  ;;  %v3048_v59 = vsel %vm736_vm3, %v3001_v62, 0.0  ;;  %v3004_v56 = vmul.f32 %v6211_v24, %v6211_v24 }
 0x4fb   : > { %v3031_v16 = vadd.f32 %v3030_v17, %v3029_v36  ;;  %v3050_v36 = vsel %vm736_vm3, %v3002_v8, 0.0  ;;  %v3005_v17 = vmul.f32 %v6214_v9, %v6214_v9 }
 0x4fd   : > { %v3033_v21 = vadd.f32 %v3032_v60, %v3031_v16  ;;  %v3052_v16 = vsel %vm736_vm3, %v3003_v12, 0.0  ;;  %v3006_v60 = vmul.f32 %v6216_v63, %v6216_v63 }
 0x4ff   : > { %v3035_v37 = vadd.f32 %v3034_v54, %v3033_v21  ;;  %v3054_v21 = vsel %vm736_vm3, %v3004_v56, 0.0  ;;  %v3007_v54 = vmul.f32 %v6219_v48, %v6219_v48 }
 0x501   : > { %v3037_v51 = vadd.f32 %v3036_v11, %v3035_v37  ;;  %v3056_v37 = vsel %vm736_vm3, %v3005_v17, 0.0  ;;  %v3008_v11 = vmul.f32 %v6222_v5, %v6222_v5 }
 0x503   : > { %v3039_v30 = vadd.f32 %v3038_v45, %v3037_v51  ;;  %v3058_v51 = vsel %vm736_vm3, %v3006_v60, 0.0  ;;  %v3009_v45 = vmul.f32 %v6224_v10, %v6224_v10 }
 0x505   : > { %v3041_v39 = vadd.f32 %v3040_v22, %v3039_v30  ;;  %v3060_v30 = vsel %vm736_vm3, %v3007_v54, 0.0  ;;  %v3010_v22 = vmul.f32 %v6226_v34, %v6226_v34 }
 0x507   : > { %v3043_v7 = vadd.f32 %v3042_v13, %v3041_v39  ;;  %v3062_v39 = vsel %vm736_vm3, %v3008_v11, 0.0  ;;  %v3011_v13 = vmul.f32 %v6228_v47, %v6228_v47 }
 0x509   : > { %v3045_v42 = vadd.f32 %v3044_v18, %v3043_v7  ;;  %v3064_v7 = vsel %vm736_vm3, %v3009_v45, 0.0  ;;  %v3012_v18 = vmul.f32 %v6230_v2, %v6230_v2 }
 0x50b   : > { %v3047_v31 = vadd.f32 %v3046_v43, %v3045_v42  ;;  %v3066_v42 = vsel %vm736_vm3, %v3010_v22, 0.0  ;;  %v3013_v43 = vmul.f32 %v6232_v58, %v6232_v58 }
 0x50d   : > { %v3049_v33 = vadd.f32 %v3048_v59, %v3047_v31  ;;  %v3068_v31 = vsel %vm736_vm3, %v3011_v13, 0.0  ;;  %v3014_v59 = vmul.f32 %v6234_v50, %v6234_v50 }
 0x50f   : > { %v3051_v14 = vadd.f32 %v3050_v36, %v3049_v33  ;;  %v3070_v33 = vsel %vm736_vm3, %v3012_v18, 0.0  ;;  %v3015_v36 = vmul.f32 %v6236_v0, %v6236_v0 }
 0x511   : > { %v3053_v38 = vadd.f32 %v3052_v16, %v3051_v14  ;;  %v3072_v14 = vsel %vm736_vm3, %v3013_v43, 0.0  ;;  %v3016_v16 = vmul.f32 %v6238_v46, %v6238_v46 }
 0x513   : > { %v3055_v4 = vadd.f32 %v3054_v21, %v3053_v38  ;;  %v3074_v38 = vsel %vm736_vm3, %v3014_v59, 0.0  ;;  %v3076_v21 = vsel %vm736_vm3, %v3015_v36, 0.0  ;;  %v3078_v54 = vsel %vm736_vm3, %v3016_v16, 0.0 }
 0x515   : > { %v3057_v49 = vadd.f32 %v3056_v37, %v3055_v4 }
 0x517   : > { %v3059_v27 = vadd.f32 %v3058_v51, %v3057_v49 }
 0x519   : > { %v3061_v52 = vadd.f32 %v3060_v30, %v3059_v27 }
 0x51b   : > { %v3063_v1 = vadd.f32 %v3062_v39, %v3061_v52  ;;  %v1758_v39 = vld [vmem:[%s6523_s5] sm:$0x1] }
 0x51d   : > { %v3065_v62 = vadd.f32 %v3064_v7, %v3063_v1  ;;  %v6634_v7 = vld [vmem:[#allocation2_spill] sm:$0xff] }
 0x51f   : > { %v3067_v8 = vadd.f32 %v3066_v42, %v3065_v62  ;;  %v6635_v62 = vsub.s32 0, %v6634_v7 }
 0x521   : > { %v3069_v12 = vadd.f32 %v3068_v31, %v3067_v8 }
 0x523   : > { %v3071_v56 = vadd.f32 %v3070_v33, %v3069_v12 }
 0x525   : > { %v3073_v17 = vadd.f32 %v3072_v14, %v3071_v56 }
 0x527   : > { %v3075_v60 = vadd.f32 %v3074_v38, %v3073_v17 }
 0x529   : > { %v3077_v4 = vadd.f32 %v3076_v21, %v3075_v60 }
 0x52b   : > { %v3079_v37 = vadd.f32 %v3078_v54, %v3077_v4 }
 0x52d   : > { %v3080_v49 = vrot.slane %v3079_v37, 4 }
 0x52f   : > { %v3081_v11 = vadd.f32 %v3080_v49, %v3079_v37 }
 0x531   : > { %v3082_v51 = vrot.slane %v3081_v11, 2 }
 0x533   : > { %v3083_v27 = vadd.f32 %v3082_v51, %v3081_v11 }
 0x535   : > { %v3084_v45 = vrot.slane %v3083_v27, 1 }
 0x537   : > { %v3085_v30 = vadd.f32 %v3084_v45, %v3083_v27 }
 0x539   : > { %v3086_v52 = vmul.f32 0.00390625, %v3085_v30 }
 0x53b   : > { %v3087_v22 = vadd.f32 1e-05, %v3086_v52 }
 0x53d   : > { %4188 = vrsqrt.f32 %v3087_v22 }
 0x547   : > { %v4189_v1 = vpop.eup %4188 }
 0x548   : > { %v3089_v13 = vmul.f32 %v4189_v1, %v1758_v39 }
 0x54a   : > { %v3094_v18 = vrot.slane %v3089_v13, %v6635_v62 }
 0x54c   : > { %v3096_v42 = vmul.f32 %v3094_v18, %v6154_v23  ;;  %v3097_v8 = vmul.f32 %v3094_v18, %v6157_v44  ;;  %v3098_v43 = vmul.f32 %v3094_v18, %v6160_v6  ;;  %v3099_v31 = vmul.f32 %v3094_v18, %v6163_v3 }
 0x54d   : > { %v3100_v12 = vmul.f32 %v3094_v18, %v6166_v19  ;;  %v3101_v59 = vmul.f32 %v3094_v18, %v6169_v26  ;;  %v3102_v33 = vmul.f32 %v3094_v18, %v6172_v53  ;;  %v3103_v56 = vmul.f32 %v3094_v18, %v6175_v57 }
 0x54e   : > { %v3104_v36 = vmul.f32 %v3094_v18, %v6178_v15  ;;  %v3105_v14 = vmul.f32 %v3094_v18, %v6181_v40  ;;  %v3106_v23 = vmul.f32 %v3094_v18, %v6184_v41  ;;  %v3107_v44 = vmul.f32 %v3094_v18, %v6187_v61  ;;  %v3405_v41 = vld [vmem:[%s6524_s6] ss:$0 sm:$0xff] }
 0x54f   : > { %v3108_v6 = vmul.f32 %v3094_v18, %v6190_v55  ;;  %v3109_v3 = vmul.f32 %v3094_v18, %v6193_v29  ;;  %v3110_v19 = vmul.f32 %v3094_v18, %v6196_v20  ;;  %v3111_v26 = vmul.f32 %v3094_v18, %v6199_v28 }
 0x550   : > { %v3112_v53 = vmul.f32 %v3094_v18, %v6202_v25  ;;  %v3113_v57 = vmul.f32 %v3094_v18, %v6205_v35  ;;  %v3114_v15 = vmul.f32 %v3094_v18, %v6208_v32  ;;  %v3115_v40 = vmul.f32 %v3094_v18, %v6211_v24 }
 0x551   : > { %v3116_v61 = vmul.f32 %v3094_v18, %v6214_v9  ;;  %v3117_v55 = vmul.f32 %v3094_v18, %v6216_v63  ;;  %v3118_v29 = vmul.f32 %v3094_v18, %v6219_v48  ;;  %v3119_v20 = vmul.f32 %v3094_v18, %v6222_v5 }
 0x552   : > { %v3120_v28 = vmul.f32 %v3094_v18, %v6224_v10  ;;  %v3121_v25 = vmul.f32 %v3094_v18, %v6226_v34  ;;  %v3122_v35 = vmul.f32 %v3094_v18, %v6228_v47  ;;  %v3123_v32 = vmul.f32 %v3094_v18, %v6230_v2 }
 0x553   : > { %v3124_v24 = vmul.f32 %v3094_v18, %v6232_v58  ;;  %v3125_v17 = vmul.f32 %v3094_v18, %v6234_v50  ;;  %v3126_v9 = vmul.f32 %v3094_v18, %v6236_v0  ;;  %v3127_v63 = vmul.f32 %v3094_v18, %v6238_v46 }
 0x554   : > { %v3134_v16 = vadd.f32 %v3405_v41, %v3096_v42  ;;  %v3135_v48 = vadd.f32 %v3405_v41, %v3097_v8  ;;  %v3136_v38 = vadd.f32 %v3405_v41, %v3098_v43  ;;  %v3137_v5 = vadd.f32 %v3405_v41, %v3099_v31  ;;  %v4190_v8 = vld [vmem:[%s4291_s8] sm:$0xff]  ;;  %v4191_v31 = vld [vmem:[%s4291_s8 + $0x8] sm:$0xff] }
 0x555   : > { %v3138_v60 = vadd.f32 %v3405_v41, %v3100_v12  ;;  %v3139_v10 = vadd.f32 %v3405_v41, %v3101_v59  ;;  %v3140_v21 = vadd.f32 %v3405_v41, %v3102_v33  ;;  %v3141_v34 = vadd.f32 %v3405_v41, %v3103_v56  ;;  %v4192_v59 = vld [vmem:[%s4291_s8 + $0x10] sm:$0xff]  ;;  %v4193_v56 = vld [vmem:[%s4291_s8 + $0x18] sm:$0xff] }
 0x556   : > { %v3142_v4 = vadd.f32 %v3405_v41, %v3104_v36  ;;  %v3143_v47 = vadd.f32 %v3405_v41, %v3105_v14  ;;  %v3144_v54 = vadd.f32 %v3405_v41, %v3106_v23  ;;  %v3145_v2 = vadd.f32 %v3405_v41, %v3107_v44  ;;  %v4194_v14 = vld [vmem:[%s4291_s8 + $0x20] sm:$0xff]  ;;  %v4195_v44 = vld [vmem:[%s4291_s8 + $0x28] sm:$0xff] }
 0x557   : > { %v3146_v37 = vadd.f32 %v3405_v41, %v3108_v6  ;;  %v3147_v58 = vadd.f32 %v3405_v41, %v3109_v3  ;;  %v3148_v50 = vadd.f32 %v3405_v41, %v3110_v19  ;;  %v3149_v49 = vadd.f32 %v3405_v41, %v3111_v26  ;;  %v4196_v3 = vld [vmem:[%s4291_s8 + $0x30] sm:$0xff]  ;;  %v4197_v26 = vld [vmem:[%s4291_s8 + $0x38] sm:$0xff] }
 0x558   : > { %v3150_v0 = vadd.f32 %v3405_v41, %v3112_v53  ;;  %v3151_v11 = vadd.f32 %v3405_v41, %v3113_v57  ;;  %v3152_v46 = vadd.f32 %v3405_v41, %v3114_v15  ;;  %v3153_v51 = vadd.f32 %v3405_v41, %v3115_v40  ;;  %v4198_v57 = vld [vmem:[%s4291_s8 + $0x40] sm:$0xff]  ;;  %v4199_v40 = vld [vmem:[%s4291_s8 + $0x48] sm:$0xff] }
 0x559   : > { %v6376_v27 = vadd.f32 %v3405_v41, %v3116_v61  ;;  %v6378_v45 = vadd.f32 %v3405_v41, %v3117_v55  ;;  %v6380_v30 = vadd.f32 %v3405_v41, %v3118_v29  ;;  %v6382_v52 = vadd.f32 %v3405_v41, %v3119_v20  ;;  %v4200_v61 = vld [vmem:[%s4291_s8 + $0x50] sm:$0xff]  ;;  %v4201_v29 = vld [vmem:[%s4291_s8 + $0x58] sm:$0xff] }
 0x55a   : > { %v6384_v22 = vadd.f32 %v3405_v41, %v3120_v28  ;;  %v6386_v39 = vadd.f32 %v3405_v41, %v3121_v25  ;;  %v6388_v1 = vadd.f32 %v3405_v41, %v3122_v35  ;;  %v6390_v13 = vadd.f32 %v3405_v41, %v3123_v32  ;;  %v4202_v28 = vld [vmem:[%s4291_s8 + $0x60] sm:$0xff]  ;;  %v4203_v35 = vld [vmem:[%s4291_s8 + $0x68] sm:$0xff] }
 0x55b   : > { %v6399_v7 = vadd.f32 %v3405_v41, %v3124_v24  ;;  %v6401_v62 = vadd.f32 %v3405_v41, %v3125_v17  ;;  %v6403_v18 = vadd.f32 %v3405_v41, %v3126_v9  ;;  %v6405_v42 = vadd.f32 %v3405_v41, %v3127_v63  ;;  %v4204_v24 = vld [vmem:[%s4291_s8 + $0x70] sm:$0xff]  ;;  %v4205_v9 = vld [vmem:[%s4291_s8 + $0x78] sm:$0xff] }
 0x55c   : > { %v3166_v43 = vadd.f32 %v4190_v8, %v3134_v16  ;;  %v3167_v12 = vadd.f32 %v4191_v31, %v3135_v48  ;;  %v3168_v33 = vadd.f32 %v4192_v59, %v3136_v38  ;;  %v3169_v36 = vadd.f32 %v4193_v56, %v3137_v5  ;;  %v4206_v16 = vld [vmem:[%s4291_s8 + $0x80] sm:$0xff]  ;;  %v4207_v38 = vld [vmem:[%s4291_s8 + $0x88] sm:$0xff]  ;;  %v4220_v8 = vld [vmem:[%s4291_s8 + $0xf0] sm:$0xff] }
 0x55d   : > { %v3170_v23 = vadd.f32 %v4194_v14, %v3138_v60  ;;  %v3171_v6 = vadd.f32 %v4195_v44, %v3139_v10  ;;  %v3172_v19 = vadd.f32 %v4196_v3, %v3140_v21  ;;  %v3173_v53 = vadd.f32 %v4197_v26, %v3141_v34  ;;  %v4208_v60 = vld [vmem:[%s4291_s8 + $0x90] sm:$0xff]  ;;  %v4209_v21 = vld [vmem:[%s4291_s8 + $0x98] sm:$0xff] }
 0x55e   : > { %v3174_v15 = vadd.f32 %v4198_v57, %v3142_v4  ;;  %v3175_v41 = vadd.f32 %v4199_v40, %v3143_v47  ;;  %v3176_v55 = vadd.f32 %v4200_v61, %v3144_v54  ;;  %v3177_v20 = vadd.f32 %v4201_v29, %v3145_v2  ;;  %3198 = vst.msk [vmem:[%s6397_s12] sm:$0xff] %vm736_vm3, %v3166_v43  ;;  %v4210_v4 = vld [vmem:[%s4291_s8 + $0xa0] sm:$0xff]  ;;  %v4211_v54 = vld [vmem:[%s4291_s8 + $0xa8] sm:$0xff]  ;;  %v4221_v31 = vld [vmem:[%s4291_s8 + $0xf8] sm:$0xff] }
 0x55f   : > { %3199 = vst.msk [vmem:[%s6397_s12 + $0x8] sm:$0xff] %vm736_vm3, %v3167_v12  ;;  %3200 = vst.msk [vmem:[%s6397_s12 + $0x10] sm:$0xff] %vm736_vm3, %v3168_v33  ;;  %v3178_v25 = vadd.f32 %v4202_v28, %v3146_v37  ;;  %v3179_v32 = vadd.f32 %v4203_v35, %v3147_v58  ;;  %v3180_v17 = vadd.f32 %v4204_v24, %v3148_v50  ;;  %v4212_v37 = vld [vmem:[%s4291_s8 + $0xb0] sm:$0xff]  ;;  %v4213_v50 = vld [vmem:[%s4291_s8 + $0xb8] sm:$0xff] }
 0x560   : > { %3201 = vst.msk [vmem:[%s6397_s12 + $0x18] sm:$0xff] %vm736_vm3, %v3169_v36  ;;  %v3181_v63 = vadd.f32 %v4205_v9, %v3149_v49  ;;  %3202 = vst.msk [vmem:[%s6397_s12 + $0x20] sm:$0xff] %vm736_vm3, %v3170_v23  ;;  %v3182_v48 = vadd.f32 %v4206_v16, %v3150_v0  ;;  %v3183_v5 = vadd.f32 %v4207_v38, %v3151_v11  ;;  %v4214_v0 = vld [vmem:[%s4291_s8 + $0xc0] sm:$0xff] }
 0x561   : > { %3203 = vst.msk [vmem:[%s6397_s12 + $0x28] sm:$0xff] %vm736_vm3, %v3171_v6  ;;  %3204 = vst.msk [vmem:[%s6397_s12 + $0x30] sm:$0xff] %vm736_vm3, %v3172_v19  ;;  %v3184_v10 = vadd.f32 %v4208_v60, %v3152_v46  ;;  %v3185_v34 = vadd.f32 %v4209_v21, %v3153_v51  ;;  %v3186_v47 = vadd.f32 %v4210_v4, %v6376_v27  ;;  %v4215_v46 = vld [vmem:[%s4291_s8 + $0xc8] sm:$0xff]  ;;  %v4216_v27 = vld [vmem:[%s4291_s8 + $0xd0] sm:$0xff] }
 0x562   : > { %3205 = vst.msk [vmem:[%s6397_s12 + $0x38] sm:$0xff] %vm736_vm3, %v3173_v53  ;;  %3206 = vst.msk [vmem:[%s6397_s12 + $0x40] sm:$0xff] %vm736_vm3, %v3174_v15  ;;  %v3187_v2 = vadd.f32 %v4211_v54, %v6378_v45  ;;  %v3188_v58 = vadd.f32 %v4212_v37, %v6380_v30  ;;  %v3189_v49 = vadd.f32 %v4213_v50, %v6382_v52  ;;  %v4217_v30 = vld [vmem:[%s4291_s8 + $0xd8] sm:$0xff] }
 0x563   : > { %3207 = vst.msk [vmem:[%s6397_s12 + $0x48] sm:$0xff] %vm736_vm3, %v3175_v41  ;;  %3208 = vst.msk [vmem:[%s6397_s12 + $0x50] sm:$0xff] %vm736_vm3, %v3176_v55  ;;  %v3190_v11 = vadd.f32 %v4214_v0, %v6384_v22  ;;  %v3191_v51 = vadd.f32 %v4215_v46, %v6386_v39  ;;  %v3192_v45 = vadd.f32 %v4216_v27, %v6388_v1  ;;  %v4218_v22 = vld [vmem:[%s4291_s8 + $0xe0] sm:$0xff]  ;;  %v4219_v1 = vld [vmem:[%s4291_s8 + $0xe8] sm:$0xff] }
 0x564   : > { %3209 = vst.msk [vmem:[%s6397_s12 + $0x58] sm:$0xff] %vm736_vm3, %v3177_v20  ;;  %3210 = vst.msk [vmem:[%s6397_s12 + $0x60] sm:$0xff] %vm736_vm3, %v3178_v25  ;;  %v3193_v52 = vadd.f32 %v4217_v30, %v6390_v13  ;;  %v3194_v39 = vadd.f32 %v4218_v22, %v6399_v7  ;;  %v3195_v13 = vadd.f32 %v4219_v1, %v6401_v62 }
 0x565   : > { %3211 = vst.msk [vmem:[%s6397_s12 + $0x68] sm:$0xff] %vm736_vm3, %v3179_v32  ;;  %3212 = vst.msk [vmem:[%s6397_s12 + $0x70] sm:$0xff] %vm736_vm3, %v3180_v17  ;;  %v3196_v43 = vadd.f32 %v4220_v8, %v6403_v18  ;;  %v3197_v12 = vadd.f32 %v4221_v31, %v6405_v42 }
 0x566   : > { %3213 = vst.msk [vmem:[%s6397_s12 + $0x78] sm:$0xff] %vm736_vm3, %v3181_v63  ;;  %3214 = vst.msk [vmem:[%s6397_s12 + $0x80] sm:$0xff] %vm736_vm3, %v3182_v48 }
 0x567   : > { %3215 = vst.msk [vmem:[%s6397_s12 + $0x88] sm:$0xff] %vm736_vm3, %v3183_v5  ;;  %3216 = vst.msk [vmem:[%s6397_s12 + $0x90] sm:$0xff] %vm736_vm3, %v3184_v10 }
 0x568   : > { %3217 = vst.msk [vmem:[%s6397_s12 + $0x98] sm:$0xff] %vm736_vm3, %v3185_v34  ;;  %3218 = vst.msk [vmem:[%s6397_s12 + $0xa0] sm:$0xff] %vm736_vm3, %v3186_v47 }
 0x569   : > { %3219 = vst.msk [vmem:[%s6397_s12 + $0xa8] sm:$0xff] %vm736_vm3, %v3187_v2  ;;  %3220 = vst.msk [vmem:[%s6397_s12 + $0xb0] sm:$0xff] %vm736_vm3, %v3188_v58 }
 0x56a   : > { %3221 = vst.msk [vmem:[%s6397_s12 + $0xb8] sm:$0xff] %vm736_vm3, %v3189_v49  ;;  %3222 = vst.msk [vmem:[%s6397_s12 + $0xc0] sm:$0xff] %vm736_vm3, %v3190_v11 }
 0x56b   : > { %3223 = vst.msk [vmem:[%s6397_s12 + $0xc8] sm:$0xff] %vm736_vm3, %v3191_v51  ;;  %3224 = vst.msk [vmem:[%s6397_s12 + $0xd0] sm:$0xff] %vm736_vm3, %v3192_v45 }
 0x56c   : > { %3225 = vst.msk [vmem:[%s6397_s12 + $0xd8] sm:$0xff] %vm736_vm3, %v3193_v52  ;;  %3226 = vst.msk [vmem:[%s6397_s12 + $0xe0] sm:$0xff] %vm736_vm3, %v3194_v39 }
 0x56d   : > { %3227 = vst.msk [vmem:[%s6397_s12 + $0xe8] sm:$0xff] %vm736_vm3, %v3195_v13  ;;  %3228 = vst.msk [vmem:[%s6397_s12 + $0xf0] sm:$0xff] %vm736_vm3, %v3196_v43 }
 0x56e   : > { %3229 = vst.msk [vmem:[%s6397_s12 + $0xf8] sm:$0xff] %vm736_vm3, %v3197_v12 }
 0x56f PF: > { %s17_s24 = sadd.s32 1, %s4228_s24  }
 0x570   : > { %p14_p4 = scmp.ge.s32.totalorder %s17_s24, 4  }
 0x572   :  { %16 = sbr.rel (!%p14_p4) target bundleno = 1 (0x1), region = 82 }

</bundles_post_ra>
